<compile_context>
chip_gen: v5e
topology: v5e:2x2
jax: 0.10.0
libtpu: 0.0.40
codegen_flags: <defaults>
</compile_context>

<pallas_src>
import math

import jax
import jax.numpy as jnp
from jax.experimental import pallas as pl

# ---- configuration (mirrors Transformer(...) constructor arguments) ----
SRC_VOCAB = 11
TGT_VOCAB = 13
MODEL_DIM = 32          # model_dim
NUM_HEADS = 4
HIDDEN_DIM = 32         # hidden_dim (== model_dim, required by the reference)
NUM_LAYERS = 2
SEQ_LEN_ARG = 32        # `seq_len` ctor arg (== model_dim, swapped PE args)
DROPOUT_RATE = 0.0      # dropout(p=0) is the identity
HEAD_DIM = HIDDEN_DIM // NUM_HEADS   # 8
TOK_LEN = 8             # actual token sequence length (== HEAD_DIM, see assert)
BATCH = 2
BS = BATCH * TOK_LEN    # 16 rows in the fused (batch*seq, dim) layout
VOCAB_PAD = 16          # padded vocab rows for the one-hot embedding matmul
LOGITS_PAD = 128        # lane-dense padded logits width (>= TGT_VOCAB)

F32 = jnp.float32
SCALE = 1.0 / math.sqrt(HEAD_DIM)
NEG_FILL = -1000000000.0
NEG_INF = -1e30         # additive mask for cross-batch score entries

assert MODEL_DIM == HIDDEN_DIM, "reference requires hidden_dim == model_dim"
assert TOK_LEN == HEAD_DIM, "reference masked_fill broadcast requires seq == head_dim"


# ============================ fused Pallas kernel ============================

def _transformer_kernel(
    src_tok_ref, tgt_tok_ref,
    vocab_iota_ref, pe_ref, enc_emb_ref, dec_emb_ref,
    head_blk_ref, sum_mat_ref, batch_neg_ref, causal_ref, poseq_ref, batch_eq_ref,
    enc_qkv_w_ref, enc_qkv_b_ref, enc_wo_w_ref, enc_wo_b_ref,
    enc_ff_w1_ref, enc_ff_b1_ref, enc_ff_w2_ref, enc_ff_b2_ref,
    enc_ln_g_ref, enc_ln_b_ref,
    dsa_qkv_w_ref, dsa_qkv_b_ref, dsa_wo_w_ref, dsa_wo_b_ref,
    dca_qkv_w_ref, dca_qkv_b_ref, dca_wo_w_ref, dca_wo_b_ref,
    dec_ff_w1_ref, dec_ff_b1_ref, dec_ff_w2_ref, dec_ff_b2_ref,
    dec_ln_g_ref, dec_ln_b_ref,
    fc_w_ref, fc_b_ref,
    out_ref,
):
    D, HD, HID = MODEL_DIM, HEAD_DIM, HIDDEN_DIM

    head_blk = head_blk_ref[...]     # (H*BS, HID) 0/1: head-block selector for K/V
    sum_mat = sum_mat_ref[...]       # (H*BS, H*BS) 0/1: per-head denom broadcast
    batch_neg = batch_neg_ref[...]   # (BS, H*BS) additive -1e30 on cross-batch keys

    # ---- embeddings (one-hot matmul) + positional encoding, in-kernel ----
    pe = pe_ref[...]
    vocab_ids = vocab_iota_ref[...]                  # (BS, VOCAB_PAD) int32
    src_tok = src_tok_ref[...]                       # (BS, 1) int32
    tgt_tok = tgt_tok_ref[...]                       # (BS, 1) int32
    src_x = jnp.dot((src_tok == vocab_ids).astype(F32), enc_emb_ref[...],
                    preferred_element_type=F32) + pe
    tgt_x = jnp.dot((tgt_tok == vocab_ids).astype(F32), dec_emb_ref[...],
                    preferred_element_type=F32) + pe
    # dropout(p=0) == identity

    # ---- fill masks, built once and reused by every MHA (hoisted compares) ----
    # src fill mask: [b*S+s, h*HD+d] = (src[b, d] != 0)
    src_nonpad = (src_tok != 0).astype(F32)                      # (BS, 1)
    src_fill = jnp.dot(batch_eq_ref[...], src_nonpad * poseq_ref[...],
                       preferred_element_type=F32) > 0.5         # (BS, HID) bool
    # tgt fill mask: [b*S+s, h*HD+d] = (tgt[b, s] != 0) & (d <= s)
    tgt_fill = jnp.logical_and(tgt_tok != 0, causal_ref[...] > 0.5)   # (BS, HID)

    def layer_norm(z, g, b):
        # LayerNorm over last dim, eps = 1e-5 (PyTorch default, biased variance)
        mu = jnp.mean(z, axis=-1, keepdims=True)
        d = z - mu
        var = jnp.mean(d * d, axis=-1, keepdims=True)
        return d * jax.lax.rsqrt(var + 1e-5) * g + b

    def ffn(x, w1, b1, w2, b2):
        h = jnp.maximum(jnp.dot(x, w1, preferred_element_type=F32) + b1, 0.0)
        return jnp.dot(h, w2, preferred_element_type=F32) + b2

    def mha(x, kv_src, qkv_w, qkv_b, wo_w, wo_b, fill, cross):
        # x, kv_src: (BS, D); qkv_w: (D, 3*HID); fill: (BS, HID) bool
        if cross:
            # fuse the Q and K/V projections: stack sources along sublanes
            xy = jnp.concatenate([x, kv_src], axis=0)                      # (2*BS, D)
            proj = jnp.dot(xy, qkv_w, preferred_element_type=F32) + qkv_b  # (2*BS, 3*HID)
            q = proj[:BS, :HID]
            k = proj[BS:, HID:2 * HID]
            v = proj[BS:, 2 * HID:]
        else:
            proj = jnp.dot(x, qkv_w, preferred_element_type=F32) + qkv_b   # (BS, 3*HID)
            q = proj[:, :HID]
            k = proj[:, HID:2 * HID]
            v = proj[:, 2 * HID:]
        # (1/sqrt(head_dim) is already folded into the Q weights/bias at init)

        # Block-diagonal K / V: heads stacked along sublanes so every head (and
        # both batches) is covered by a single matmul per stage.
        k2 = jnp.concatenate([k, k], axis=0)
        v2 = jnp.concatenate([v, v], axis=0)
        k_bd = jnp.concatenate([k2, k2], axis=0) * head_blk     # (H*BS, HID)
        v_bd = jnp.concatenate([v2, v2], axis=0) * head_blk     # (H*BS, HID)

        # scores for all (batch, head) pairs: (BS, H*BS); columns = h*BS + key_row
        s = jax.lax.dot_general(q, k_bd, (((1,), (1,)), ((), ())),
                                preferred_element_type=F32)
        s = s + batch_neg                                  # cross-batch -> -1e30
        s = s - jnp.max(s, axis=-1, keepdims=True)         # softmax-invariant shift
        p = jnp.exp(s)                                     # masked entries -> exactly 0
        # per-head row sums, broadcast back to the (BS, H*BS) layout via one 0/1 matmul
        denom = jnp.dot(p, sum_mat, preferred_element_type=F32)
        p = p / denom                                      # exact softmax
        a = jnp.dot(p, v_bd, preferred_element_type=F32)   # (BS, HID), heads combined
        # reference quirk: masked_fill applied AFTER softmax @ V
        a = jnp.where(fill, NEG_FILL, a)
        return jnp.dot(a, wo_w, preferred_element_type=F32) + wo_b

    # ------------------------------ encoder ------------------------------
    x = src_x
    for l in range(NUM_LAYERS):
        attn_out = mha(x, x,
                       enc_qkv_w_ref[l * D:(l + 1) * D, :], enc_qkv_b_ref[l:l + 1, :],
                       enc_wo_w_ref[l * HID:(l + 1) * HID, :], enc_wo_b_ref[l:l + 1, :],
                       src_fill, cross=False)
        x1 = layer_norm(x + attn_out,
                        enc_ln_g_ref[2 * l:2 * l + 1, :],
                        enc_ln_b_ref[2 * l:2 * l + 1, :])
        # reference quirk: encoder FFN consumes attn_output, not x1
        ff_out = ffn(attn_out,
                     enc_ff_w1_ref[l * D:(l + 1) * D, :], enc_ff_b1_ref[l:l + 1, :],
                     enc_ff_w2_ref[l * HID:(l + 1) * HID, :], enc_ff_b2_ref[l:l + 1, :])
        x = layer_norm(x1 + ff_out,
                       enc_ln_g_ref[2 * l + 1:2 * l + 2, :],
                       enc_ln_b_ref[2 * l + 1:2 * l + 2, :])
    enc_out = x

    # ------------------------------ decoder ------------------------------
    y = tgt_x
    for l in range(NUM_LAYERS):
        a = mha(y, y,
                dsa_qkv_w_ref[l * D:(l + 1) * D, :], dsa_qkv_b_ref[l:l + 1, :],
                dsa_wo_w_ref[l * HID:(l + 1) * HID, :], dsa_wo_b_ref[l:l + 1, :],
                tgt_fill, cross=False)
        y = layer_norm(y + a,
                       dec_ln_g_ref[3 * l:3 * l + 1, :],
                       dec_ln_b_ref[3 * l:3 * l + 1, :])
        a = mha(y, enc_out,
                dca_qkv_w_ref[l * D:(l + 1) * D, :], dca_qkv_b_ref[l:l + 1, :],
                dca_wo_w_ref[l * HID:(l + 1) * HID, :], dca_wo_b_ref[l:l + 1, :],
                src_fill, cross=True)
        y = layer_norm(y + a,
                       dec_ln_g_ref[3 * l + 1:3 * l + 2, :],
                       dec_ln_b_ref[3 * l + 1:3 * l + 2, :])
        f = ffn(y,
                dec_ff_w1_ref[l * D:(l + 1) * D, :], dec_ff_b1_ref[l:l + 1, :],
                dec_ff_w2_ref[l * HID:(l + 1) * HID, :], dec_ff_b2_ref[l:l + 1, :])
        y = layer_norm(y + f,
                       dec_ln_g_ref[3 * l + 2:3 * l + 3, :],
                       dec_ln_b_ref[3 * l + 2:3 * l + 3, :])

    # ---------------- final projection (lane-dense, 128-wide output) ----------------
    out_ref[...] = jnp.dot(y, fc_w_ref[...], preferred_element_type=F32) + fc_b_ref[...]


# ============================ model glue (plain JAX) ============================

def positional_encoding_buffer():
    # Transformer calls PositionalEncoding(model_dim, seq_len) against a
    # (seq_len, model_dim) signature -> buffer shape (1, MODEL_DIM, SEQ_LEN_ARG).
    rows = MODEL_DIM      # used as "seq_len" inside PositionalEncoding
    cols = SEQ_LEN_ARG    # used as "model_dim" inside PositionalEncoding
    position = jnp.arange(rows, dtype=F32)[:, None]
    div_term = jnp.exp(jnp.arange(0, cols, 2, dtype=F32) * (-math.log(10000.0) / cols))
    enc = jnp.zeros((rows, cols), F32)
    enc = enc.at[:, 0::2].set(jnp.sin(position * div_term))
    enc = enc.at[:, 1::2].set(jnp.cos(position * div_term))
    return enc[None]      # (1, rows, cols)


def static_constants():
    H, S, HD = NUM_HEADS, TOK_LEN, HEAD_DIM
    r64 = jnp.arange(H * BS)
    c64 = jnp.arange(H * BS)
    c32 = jnp.arange(H * HD)
    r16 = jnp.arange(BS)
    # k_bd/v_bd head-block selector: [j, c] = 1 iff (j // BS) == (c // HD)
    head_blk = (r64[:, None] // BS == c32[None, :] // HD).astype(F32)        # (64, 32)
    # per-head denominator broadcast: [j, c] = 1 iff same head block
    sum_mat = (r64[:, None] // BS == c64[None, :] // BS).astype(F32)         # (64, 64)
    # additive cross-batch mask on the (BS, H*BS) score layout
    batch_neg = jnp.where((r16[:, None] // S) == ((c64[None, :] % BS) // S),
                          0.0, NEG_INF).astype(F32)                          # (16, 64)
    # causal part of the (head-tiled) tgt fill mask: [i, c] = 1 iff (c%HD) <= (i%S)
    causal_tiled = ((c32[None, :] % HD) <= (r16[:, None] % S)).astype(F32)   # (16, 32)
    # helpers to turn the (BS,1) src non-pad column into the (BS, HID) fill mask
    poseq = ((r16[:, None] % S) == (c32[None, :] % HD)).astype(F32)          # (16, 32)
    batch_eq = ((r16[:, None] // S) == (r16[None, :] // S)).astype(F32)      # (16, 16)
    vocab_iota = jnp.tile(jnp.arange(VOCAB_PAD, dtype=jnp.int32)[None, :], (BS, 1))
    return dict(head_blk=head_blk, sum_mat=sum_mat, batch_neg=batch_neg,
                causal_tiled=causal_tiled, poseq=poseq, batch_eq=batch_eq,
                vocab_iota=vocab_iota)


def transformer_forward(params, src, tgt):
    B, S = src.shape
    src_tok = src.reshape(B * S, 1).astype(jnp.int32)
    tgt_tok = tgt.reshape(B * S, 1).astype(jnp.int32)

    logits_pad = pl.pallas_call(
        _transformer_kernel,
        out_shape=jax.ShapeDtypeStruct((B * S, LOGITS_PAD), F32),
    )(
        src_tok, tgt_tok,
        params["vocab_iota"], params["pe_slab"],
        params["enc_emb_pad"], params["dec_emb_pad"],
        params["head_blk"], params["sum_mat"], params["batch_neg"],
        params["causal_tiled"], params["poseq"], params["batch_eq"],
        params["enc_qkv_w"], params["enc_qkv_b"], params["enc_wo_w"], params["enc_wo_b"],
        params["enc_ff_w1"], params["enc_ff_b1"], params["enc_ff_w2"], params["enc_ff_b2"],
        params["enc_ln_g"], params["enc_ln_b"],
        params["dsa_qkv_w"], params["dsa_qkv_b"], params["dsa_wo_w"], params["dsa_wo_b"],
        params["dca_qkv_w"], params["dca_qkv_b"], params["dca_wo_w"], params["dca_wo_b"],
        params["dec_ff_w1"], params["dec_ff_b1"], params["dec_ff_w2"], params["dec_ff_b2"],
        params["dec_ln_g"], params["dec_ln_b"],
        params["fc_w_pad"], params["fc_b_pad"],
    )

    return logits_pad[:, :TGT_VOCAB].reshape(B, S, TGT_VOCAB)


# ============================ deterministic parameter init ============================

def init_params(key):
    keys = iter(jax.random.split(key, 512))

    def nxt():
        return next(keys)

    def W(i, o):
        return jax.random.normal(nxt(), (i, o), F32) * (1.0 / math.sqrt(i))

    def bvec(o):
        return jax.random.normal(nxt(), (o,), F32) * 0.01

    def mha_block():
        wq, bq = W(MODEL_DIM, HIDDEN_DIM), bvec(HIDDEN_DIM)
        wk, bk = W(MODEL_DIM, HIDDEN_DIM), bvec(HIDDEN_DIM)
        wv, bv = W(MODEL_DIM, HIDDEN_DIM), bvec(HIDDEN_DIM)
        # fold the 1/sqrt(head_dim) attention scale into the Q projection (init-time)
        qkv_w = jnp.concatenate([wq * SCALE, wk, wv], axis=1)        # (D, 3*HID)
        qkv_b = jnp.concatenate([bq * SCALE, bk, bv], axis=0)        # (3*HID,)
        return qkv_w, qkv_b, W(HIDDEN_DIM, HIDDEN_DIM), bvec(HIDDEN_DIM)

    enc_qkv_w, enc_qkv_b, enc_wo_w, enc_wo_b = [], [], [], []
    enc_ff_w1, enc_ff_b1, enc_ff_w2, enc_ff_b2 = [], [], [], []
    for _ in range(NUM_LAYERS):
        qw, qb, ow, ob = mha_block()
        enc_qkv_w.append(qw); enc_qkv_b.append(qb); enc_wo_w.append(ow); enc_wo_b.append(ob)
        enc_ff_w1.append(W(MODEL_DIM, HIDDEN_DIM)); enc_ff_b1.append(bvec(HIDDEN_DIM))
        enc_ff_w2.append(W(HIDDEN_DIM, MODEL_DIM)); enc_ff_b2.append(bvec(MODEL_DIM))

    dsa_qkv_w, dsa_qkv_b, dsa_wo_w, dsa_wo_b = [], [], [], []
    dca_qkv_w, dca_qkv_b, dca_wo_w, dca_wo_b = [], [], [], []
    dec_ff_w1, dec_ff_b1, dec_ff_w2, dec_ff_b2 = [], [], [], []
    for _ in range(NUM_LAYERS):
        qw, qb, ow, ob = mha_block()
        dsa_qkv_w.append(qw); dsa_qkv_b.append(qb); dsa_wo_w.append(ow); dsa_wo_b.append(ob)
        qw, qb, ow, ob = mha_block()
        dca_qkv_w.append(qw); dca_qkv_b.append(qb); dca_wo_w.append(ow); dca_wo_b.append(ob)
        dec_ff_w1.append(W(MODEL_DIM, HIDDEN_DIM)); dec_ff_b1.append(bvec(HIDDEN_DIM))
        dec_ff_w2.append(W(HIDDEN_DIM, MODEL_DIM)); dec_ff_b2.append(bvec(MODEL_DIM))

    enc_emb = jax.random.normal(nxt(), (SRC_VOCAB, MODEL_DIM), F32)
    dec_emb = jax.random.normal(nxt(), (TGT_VOCAB, MODEL_DIM), F32)
    enc_emb_pad = jnp.zeros((VOCAB_PAD, MODEL_DIM), F32).at[:SRC_VOCAB].set(enc_emb)
    dec_emb_pad = jnp.zeros((VOCAB_PAD, MODEL_DIM), F32).at[:TGT_VOCAB].set(dec_emb)

    pe = positional_encoding_buffer()                                   # (1, 32, 32)
    pe_slab = jnp.tile(pe[0, :TOK_LEN, :], (BATCH, 1))                  # (B*S, D)

    fc_w = W(MODEL_DIM, TGT_VOCAB)
    fc_b = bvec(TGT_VOCAB)
    fc_w_pad = jnp.zeros((MODEL_DIM, LOGITS_PAD), F32).at[:, :TGT_VOCAB].set(fc_w)
    fc_b_pad = jnp.zeros((1, LOGITS_PAD), F32).at[0, :TGT_VOCAB].set(fc_b)

    params = dict(
        enc_emb_pad=enc_emb_pad,
        dec_emb_pad=dec_emb_pad,
        pe_slab=pe_slab,
        # encoder (weights row-stacked per layer, biases stacked per layer)
        enc_qkv_w=jnp.concatenate(enc_qkv_w, axis=0),    # (L*D, 3*HID)
        enc_qkv_b=jnp.stack(enc_qkv_b, axis=0),          # (L, 3*HID)
        enc_wo_w=jnp.concatenate(enc_wo_w, axis=0),      # (L*HID, HID)
        enc_wo_b=jnp.stack(enc_wo_b, axis=0),            # (L, HID)
        enc_ff_w1=jnp.concatenate(enc_ff_w1, axis=0),
        enc_ff_b1=jnp.stack(enc_ff_b1, axis=0),
        enc_ff_w2=jnp.concatenate(enc_ff_w2, axis=0),
        enc_ff_b2=jnp.stack(enc_ff_b2, axis=0),
        enc_ln_g=jnp.ones((NUM_LAYERS * 2, MODEL_DIM), F32),
        enc_ln_b=jnp.zeros((NUM_LAYERS * 2, MODEL_DIM), F32),
        # decoder
        dsa_qkv_w=jnp.concatenate(dsa_qkv_w, axis=0),
        dsa_qkv_b=jnp.stack(dsa_qkv_b, axis=0),
        dsa_wo_w=jnp.concatenate(dsa_wo_w, axis=0),
        dsa_wo_b=jnp.stack(dsa_wo_b, axis=0),
        dca_qkv_w=jnp.concatenate(dca_qkv_w, axis=0),
        dca_qkv_b=jnp.stack(dca_qkv_b, axis=0),
        dca_wo_w=jnp.concatenate(dca_wo_w, axis=0),
        dca_wo_b=jnp.stack(dca_wo_b, axis=0),
        dec_ff_w1=jnp.concatenate(dec_ff_w1, axis=0),
        dec_ff_b1=jnp.stack(dec_ff_b1, axis=0),
        dec_ff_w2=jnp.concatenate(dec_ff_w2, axis=0),
        dec_ff_b2=jnp.stack(dec_ff_b2, axis=0),
        dec_ln_g=jnp.ones((NUM_LAYERS * 3, MODEL_DIM), F32),
        dec_ln_b=jnp.zeros((NUM_LAYERS * 3, MODEL_DIM), F32),
        # final projection, zero-padded to a lane-dense width of 128
        fc_w_pad=fc_w_pad,
        fc_b_pad=fc_b_pad,
    )
    params.update(static_constants())
    return params


# ============================ main ============================

if __name__ == "__main__":
    root = jax.random.PRNGKey(0)
    pkey, skey, tkey = jax.random.split(root, 3)

    params = init_params(pkey)
    src = jax.random.randint(skey, (BATCH, TOK_LEN), 0, SRC_VOCAB, dtype=jnp.int32)
    tgt = jax.random.randint(tkey, (BATCH, TOK_LEN), 0, TGT_VOCAB, dtype=jnp.int32)

    out = jax.jit(transformer_forward)(params, src, tgt)
    out = jax.block_until_ready(out)

    assert out.shape == (BATCH, TOK_LEN, TGT_VOCAB), out.shape
    assert out.dtype == jnp.float32
    assert bool(jnp.all(jnp.isfinite(out)))
    print("KERNEL_OK")
</pallas_src>

<mosaic_0001>
module attributes {stable_mosaic.version = 11 : i64} {
  func.func @_transformer_kernel(%arg0: memref<16x1xi32, #tpu.memory_space<vmem>>, %arg1: memref<16x1xi32, #tpu.memory_space<vmem>>, %arg2: memref<16x16xi32, #tpu.memory_space<vmem>>, %arg3: memref<16x32xf32, #tpu.memory_space<vmem>>, %arg4: memref<16x32xf32, #tpu.memory_space<vmem>>, %arg5: memref<16x32xf32, #tpu.memory_space<vmem>>, %arg6: memref<64x32xf32, #tpu.memory_space<vmem>>, %arg7: memref<64x64xf32, #tpu.memory_space<vmem>>, %arg8: memref<16x64xf32, #tpu.memory_space<vmem>>, %arg9: memref<16x32xf32, #tpu.memory_space<vmem>>, %arg10: memref<16x32xf32, #tpu.memory_space<vmem>>, %arg11: memref<16x16xf32, #tpu.memory_space<vmem>>, %arg12: memref<64x96xf32, #tpu.memory_space<vmem>>, %arg13: memref<2x96xf32, #tpu.memory_space<vmem>>, %arg14: memref<64x32xf32, #tpu.memory_space<vmem>>, %arg15: memref<2x32xf32, #tpu.memory_space<vmem>>, %arg16: memref<64x32xf32, #tpu.memory_space<vmem>>, %arg17: memref<2x32xf32, #tpu.memory_space<vmem>>, %arg18: memref<64x32xf32, #tpu.memory_space<vmem>>, %arg19: memref<2x32xf32, #tpu.memory_space<vmem>>, %arg20: memref<4x32xf32, #tpu.memory_space<vmem>>, %arg21: memref<4x32xf32, #tpu.memory_space<vmem>>, %arg22: memref<64x96xf32, #tpu.memory_space<vmem>>, %arg23: memref<2x96xf32, #tpu.memory_space<vmem>>, %arg24: memref<64x32xf32, #tpu.memory_space<vmem>>, %arg25: memref<2x32xf32, #tpu.memory_space<vmem>>, %arg26: memref<64x96xf32, #tpu.memory_space<vmem>>, %arg27: memref<2x96xf32, #tpu.memory_space<vmem>>, %arg28: memref<64x32xf32, #tpu.memory_space<vmem>>, %arg29: memref<2x32xf32, #tpu.memory_space<vmem>>, %arg30: memref<64x32xf32, #tpu.memory_space<vmem>>, %arg31: memref<2x32xf32, #tpu.memory_space<vmem>>, %arg32: memref<64x32xf32, #tpu.memory_space<vmem>>, %arg33: memref<2x32xf32, #tpu.memory_space<vmem>>, %arg34: memref<6x32xf32, #tpu.memory_space<vmem>>, %arg35: memref<6x32xf32, #tpu.memory_space<vmem>>, %arg36: memref<32x128xf32, #tpu.memory_space<vmem>>, %arg37: memref<1x128xf32, #tpu.memory_space<vmem>>, %arg38: memref<16x128xf32, #tpu.memory_space<vmem>>) attributes {dimension_semantics = [], scalar_prefetch = 0 : i64, scratch_operands = 0 : i64, tpu.core_type = #tpu.core_type<tc>} {
    %c0 = arith.constant 0 : index
    %c0_0 = arith.constant 0 : index
    %0 = vector.load %arg6[%c0, %c0_0] : memref<64x32xf32, #tpu.memory_space<vmem>>, vector<64x32xf32>
    %c0_1 = arith.constant 0 : index
    %c0_2 = arith.constant 0 : index
    %1 = vector.load %arg7[%c0_1, %c0_2] : memref<64x64xf32, #tpu.memory_space<vmem>>, vector<64x64xf32>
    %c0_3 = arith.constant 0 : index
    %c0_4 = arith.constant 0 : index
    %2 = vector.load %arg8[%c0_3, %c0_4] : memref<16x64xf32, #tpu.memory_space<vmem>>, vector<16x64xf32>
    %c0_5 = arith.constant 0 : index
    %c0_6 = arith.constant 0 : index
    %3 = vector.load %arg3[%c0_5, %c0_6] : memref<16x32xf32, #tpu.memory_space<vmem>>, vector<16x32xf32>
    %c0_7 = arith.constant 0 : index
    %c0_8 = arith.constant 0 : index
    %4 = vector.load %arg2[%c0_7, %c0_8] : memref<16x16xi32, #tpu.memory_space<vmem>>, vector<16x16xi32>
    %c0_9 = arith.constant 0 : index
    %c0_10 = arith.constant 0 : index
    %5 = vector.load %arg0[%c0_9, %c0_10] : memref<16x1xi32, #tpu.memory_space<vmem>>, vector<16x1xi32>
    %c0_11 = arith.constant 0 : index
    %c0_12 = arith.constant 0 : index
    %6 = vector.load %arg1[%c0_11, %c0_12] : memref<16x1xi32, #tpu.memory_space<vmem>>, vector<16x1xi32>
    %7 = vector.broadcast %5 : vector<16x1xi32> to vector<16x16xi32>
    %8 = arith.cmpi eq, %7, %4 : vector<16x16xi32>
    %9 = arith.extui %8 : vector<16x16xi1> to vector<16x16xi32>
    %10 = arith.sitofp %9 : vector<16x16xi32> to vector<16x16xf32>
    %c0_13 = arith.constant 0 : index
    %c0_14 = arith.constant 0 : index
    %11 = vector.load %arg4[%c0_13, %c0_14] : memref<16x32xf32, #tpu.memory_space<vmem>>, vector<16x32xf32>
    %cst = arith.constant dense<0.000000e+00> : vector<16x32xf32>
    %12 = tpu.matmul %10, %11, %cst {dimension_numbers = #tpu.dot_dimension_numbers<[1], [0], [0], [1], [0, 0, 1, 1], [], []>} : vector<16x16xf32>, vector<16x32xf32>, vector<16x32xf32> -> vector<16x32xf32>
    %13 = arith.addf %12, %3 : vector<16x32xf32>
    %14 = vector.broadcast %6 : vector<16x1xi32> to vector<16x16xi32>
    %15 = arith.cmpi eq, %14, %4 : vector<16x16xi32>
    %16 = arith.extui %15 : vector<16x16xi1> to vector<16x16xi32>
    %17 = arith.sitofp %16 : vector<16x16xi32> to vector<16x16xf32>
    %c0_15 = arith.constant 0 : index
    %c0_16 = arith.constant 0 : index
    %18 = vector.load %arg5[%c0_15, %c0_16] : memref<16x32xf32, #tpu.memory_space<vmem>>, vector<16x32xf32>
    %cst_17 = arith.constant dense<0.000000e+00> : vector<16x32xf32>
    %19 = tpu.matmul %17, %18, %cst_17 {dimension_numbers = #tpu.dot_dimension_numbers<[1], [0], [0], [1], [0, 0, 1, 1], [], []>} : vector<16x16xf32>, vector<16x32xf32>, vector<16x32xf32> -> vector<16x32xf32>
    %20 = arith.addf %19, %3 : vector<16x32xf32>
    %c0_i32 = arith.constant 0 : i32
    %21 = vector.broadcast %c0_i32 : i32 to vector<16x1xi32>
    %22 = arith.cmpi ne, %5, %21 : vector<16x1xi32>
    %23 = arith.extui %22 : vector<16x1xi1> to vector<16x1xi32>
    %24 = arith.sitofp %23 : vector<16x1xi32> to vector<16x1xf32>
    %c0_18 = arith.constant 0 : index
    %c0_19 = arith.constant 0 : index
    %25 = vector.load %arg11[%c0_18, %c0_19] : memref<16x16xf32, #tpu.memory_space<vmem>>, vector<16x16xf32>
    %c0_20 = arith.constant 0 : index
    %c0_21 = arith.constant 0 : index
    %26 = vector.load %arg10[%c0_20, %c0_21] : memref<16x32xf32, #tpu.memory_space<vmem>>, vector<16x32xf32>
    %27 = vector.broadcast %24 : vector<16x1xf32> to vector<16x32xf32>
    %28 = arith.mulf %27, %26 : vector<16x32xf32>
    %cst_22 = arith.constant dense<0.000000e+00> : vector<16x32xf32>
    %29 = tpu.matmul %25, %28, %cst_22 {dimension_numbers = #tpu.dot_dimension_numbers<[1], [0], [0], [1], [0, 0, 1, 1], [], []>} : vector<16x16xf32>, vector<16x32xf32>, vector<16x32xf32> -> vector<16x32xf32>
    %cst_23 = arith.constant 5.000000e-01 : f32
    %30 = vector.broadcast %cst_23 : f32 to vector<16x32xf32>
    %31 = arith.cmpf ogt, %29, %30 : vector<16x32xf32>
    %c0_i32_24 = arith.constant 0 : i32
    %32 = vector.broadcast %c0_i32_24 : i32 to vector<16x1xi32>
    %33 = arith.cmpi ne, %6, %32 : vector<16x1xi32>
    %c0_25 = arith.constant 0 : index
    %c0_26 = arith.constant 0 : index
    %34 = vector.load %arg9[%c0_25, %c0_26] : memref<16x32xf32, #tpu.memory_space<vmem>>, vector<16x32xf32>
    %cst_27 = arith.constant 5.000000e-01 : f32
    %35 = vector.broadcast %cst_27 : f32 to vector<16x32xf32>
    %36 = arith.cmpf ogt, %34, %35 : vector<16x32xf32>
    %37 = vector.broadcast %33 : vector<16x1xi1> to vector<16x32xi1>
    %38 = arith.andi %37, %36 : vector<16x32xi1>
    %c0_28 = arith.constant 0 : index
    %c0_29 = arith.constant 0 : index
    %39 = vector.load %arg12[%c0_28, %c0_29] : memref<64x96xf32, #tpu.memory_space<vmem>>, vector<32x96xf32>
    %c0_30 = arith.constant 0 : index
    %c0_31 = arith.constant 0 : index
    %40 = vector.load %arg13[%c0_30, %c0_31] : memref<2x96xf32, #tpu.memory_space<vmem>>, vector<1x96xf32>
    %c0_32 = arith.constant 0 : index
    %c0_33 = arith.constant 0 : index
    %41 = vector.load %arg14[%c0_32, %c0_33] : memref<64x32xf32, #tpu.memory_space<vmem>>, vector<32x32xf32>
    %c0_34 = arith.constant 0 : index
    %c0_35 = arith.constant 0 : index
    %42 = vector.load %arg15[%c0_34, %c0_35] : memref<2x32xf32, #tpu.memory_space<vmem>>, vector<1x32xf32>
    %cst_36 = arith.constant dense<0.000000e+00> : vector<16x96xf32>
    %43 = tpu.matmul %13, %39, %cst_36 {dimension_numbers = #tpu.dot_dimension_numbers<[1], [0], [0], [1], [0, 0, 1, 1], [], []>} : vector<16x32xf32>, vector<32x96xf32>, vector<16x96xf32> -> vector<16x96xf32>
    %44 = vector.broadcast %40 : vector<1x96xf32> to vector<16x96xf32>
    %45 = arith.addf %43, %44 : vector<16x96xf32>
    %46 = vector.extract_strided_slice %45 {offsets = [0, 0], sizes = [16, 32], strides = [1, 1]} : vector<16x96xf32> to vector<16x32xf32>
    %47 = vector.extract_strided_slice %45 {offsets = [0, 32], sizes = [16, 32], strides = [1, 1]} : vector<16x96xf32> to vector<16x32xf32>
    %48 = vector.extract_strided_slice %45 {offsets = [0, 64], sizes = [16, 32], strides = [1, 1]} : vector<16x96xf32> to vector<16x32xf32>
    %49 = tpu.concatenate %47, %47 in 0 : vector<16x32xf32>, vector<16x32xf32> -> vector<32x32xf32>
    %50 = tpu.concatenate %48, %48 in 0 : vector<16x32xf32>, vector<16x32xf32> -> vector<32x32xf32>
    %51 = tpu.concatenate %49, %49 in 0 : vector<32x32xf32>, vector<32x32xf32> -> vector<64x32xf32>
    %52 = arith.mulf %51, %0 : vector<64x32xf32>
    %53 = tpu.concatenate %50, %50 in 0 : vector<32x32xf32>, vector<32x32xf32> -> vector<64x32xf32>
    %54 = arith.mulf %53, %0 : vector<64x32xf32>
    %cst_37 = arith.constant dense<0.000000e+00> : vector<16x64xf32>
    %55 = tpu.matmul %46, %52, %cst_37 {dimension_numbers = #tpu.dot_dimension_numbers<[1], [1], [0], [0], [0, 0, 1, 0], [], []>} : vector<16x32xf32>, vector<64x32xf32>, vector<16x64xf32> -> vector<16x64xf32>
    %56 = arith.addf %55, %2 : vector<16x64xf32>
    %cst_38 = arith.constant dense<0xFF800000> : vector<16xf32>
    %57 = vector.multi_reduction <maximumf>, %56, %cst_38 [1] : vector<16x64xf32> to vector<16xf32>
    %58 = vector.shape_cast %57 : vector<16xf32> to vector<16x1xf32>
    %59 = vector.broadcast %58 : vector<16x1xf32> to vector<16x64xf32>
    %60 = arith.subf %56, %59 : vector<16x64xf32>
    %61 = math.exp %60 : vector<16x64xf32>
    %cst_39 = arith.constant dense<0.000000e+00> : vector<16x64xf32>
    %62 = tpu.matmul %61, %1, %cst_39 {dimension_numbers = #tpu.dot_dimension_numbers<[1], [0], [0], [1], [0, 0, 1, 1], [], []>} : vector<16x64xf32>, vector<64x64xf32>, vector<16x64xf32> -> vector<16x64xf32>
    %63 = arith.divf %61, %62 : vector<16x64xf32>
    %cst_40 = arith.constant dense<0.000000e+00> : vector<16x32xf32>
    %64 = tpu.matmul %63, %54, %cst_40 {dimension_numbers = #tpu.dot_dimension_numbers<[1], [0], [0], [1], [0, 0, 1, 1], [], []>} : vector<16x64xf32>, vector<64x32xf32>, vector<16x32xf32> -> vector<16x32xf32>
    %cst_41 = arith.constant -1.000000e+09 : f32
    %65 = vector.broadcast %cst_41 : f32 to vector<16x32xf32>
    %66 = arith.select %31, %65, %64 : vector<16x32xi1>, vector<16x32xf32>
    %cst_42 = arith.constant dense<0.000000e+00> : vector<16x32xf32>
    %67 = tpu.matmul %66, %41, %cst_42 {dimension_numbers = #tpu.dot_dimension_numbers<[1], [0], [0], [1], [0, 0, 1, 1], [], []>} : vector<16x32xf32>, vector<32x32xf32>, vector<16x32xf32> -> vector<16x32xf32>
    %68 = vector.broadcast %42 : vector<1x32xf32> to vector<16x32xf32>
    %69 = arith.addf %67, %68 : vector<16x32xf32>
    %70 = arith.addf %13, %69 : vector<16x32xf32>
    %c0_43 = arith.constant 0 : index
    %c0_44 = arith.constant 0 : index
    %71 = vector.load %arg20[%c0_43, %c0_44] : memref<4x32xf32, #tpu.memory_space<vmem>>, vector<1x32xf32>
    %c0_45 = arith.constant 0 : index
    %c0_46 = arith.constant 0 : index
    %72 = vector.load %arg21[%c0_45, %c0_46] : memref<4x32xf32, #tpu.memory_space<vmem>>, vector<1x32xf32>
    %cst_47 = arith.constant dense<0.000000e+00> : vector<16xf32>
    %73 = vector.multi_reduction <add>, %70, %cst_47 [1] : vector<16x32xf32> to vector<16xf32>
    %74 = vector.shape_cast %73 : vector<16xf32> to vector<16x1xf32>
    %cst_48 = arith.constant 3.200000e+01 : f32
    %75 = vector.broadcast %cst_48 : f32 to vector<16x1xf32>
    %76 = arith.divf %74, %75 : vector<16x1xf32>
    %77 = vector.broadcast %76 : vector<16x1xf32> to vector<16x32xf32>
    %78 = arith.subf %70, %77 : vector<16x32xf32>
    %79 = arith.mulf %78, %78 : vector<16x32xf32>
    %cst_49 = arith.constant dense<0.000000e+00> : vector<16xf32>
    %80 = vector.multi_reduction <add>, %79, %cst_49 [1] : vector<16x32xf32> to vector<16xf32>
    %81 = vector.shape_cast %80 : vector<16xf32> to vector<16x1xf32>
    %cst_50 = arith.constant 3.200000e+01 : f32
    %82 = vector.broadcast %cst_50 : f32 to vector<16x1xf32>
    %83 = arith.divf %81, %82 : vector<16x1xf32>
    %cst_51 = arith.constant 9.99999974E-6 : f32
    %84 = vector.broadcast %cst_51 : f32 to vector<16x1xf32>
    %85 = arith.addf %83, %84 : vector<16x1xf32>
    %86 = math.rsqrt %85 : vector<16x1xf32>
    %87 = vector.broadcast %86 : vector<16x1xf32> to vector<16x32xf32>
    %88 = arith.mulf %78, %87 : vector<16x32xf32>
    %89 = vector.broadcast %71 : vector<1x32xf32> to vector<16x32xf32>
    %90 = arith.mulf %88, %89 : vector<16x32xf32>
    %91 = vector.broadcast %72 : vector<1x32xf32> to vector<16x32xf32>
    %92 = arith.addf %90, %91 : vector<16x32xf32>
    %c0_52 = arith.constant 0 : index
    %c0_53 = arith.constant 0 : index
    %93 = vector.load %arg16[%c0_52, %c0_53] : memref<64x32xf32, #tpu.memory_space<vmem>>, vector<32x32xf32>
    %c0_54 = arith.constant 0 : index
    %c0_55 = arith.constant 0 : index
    %94 = vector.load %arg17[%c0_54, %c0_55] : memref<2x32xf32, #tpu.memory_space<vmem>>, vector<1x32xf32>
    %c0_56 = arith.constant 0 : index
    %c0_57 = arith.constant 0 : index
    %95 = vector.load %arg18[%c0_56, %c0_57] : memref<64x32xf32, #tpu.memory_space<vmem>>, vector<32x32xf32>
    %c0_58 = arith.constant 0 : index
    %c0_59 = arith.constant 0 : index
    %96 = vector.load %arg19[%c0_58, %c0_59] : memref<2x32xf32, #tpu.memory_space<vmem>>, vector<1x32xf32>
    %cst_60 = arith.constant dense<0.000000e+00> : vector<16x32xf32>
    %97 = tpu.matmul %69, %93, %cst_60 {dimension_numbers = #tpu.dot_dimension_numbers<[1], [0], [0], [1], [0, 0, 1, 1], [], []>} : vector<16x32xf32>, vector<32x32xf32>, vector<16x32xf32> -> vector<16x32xf32>
    %98 = vector.broadcast %94 : vector<1x32xf32> to vector<16x32xf32>
    %99 = arith.addf %97, %98 : vector<16x32xf32>
    %cst_61 = arith.constant 0.000000e+00 : f32
    %100 = vector.broadcast %cst_61 : f32 to vector<16x32xf32>
    %101 = arith.maximumf %99, %100 : vector<16x32xf32>
    %cst_62 = arith.constant dense<0.000000e+00> : vector<16x32xf32>
    %102 = tpu.matmul %101, %95, %cst_62 {dimension_numbers = #tpu.dot_dimension_numbers<[1], [0], [0], [1], [0, 0, 1, 1], [], []>} : vector<16x32xf32>, vector<32x32xf32>, vector<16x32xf32> -> vector<16x32xf32>
    %103 = vector.broadcast %96 : vector<1x32xf32> to vector<16x32xf32>
    %104 = arith.addf %102, %103 : vector<16x32xf32>
    %105 = arith.addf %92, %104 : vector<16x32xf32>
    %c1 = arith.constant 1 : index
    %c0_63 = arith.constant 0 : index
    %106 = vector.load %arg20[%c1, %c0_63] : memref<4x32xf32, #tpu.memory_space<vmem>>, vector<1x32xf32>
    %c1_64 = arith.constant 1 : index
    %c0_65 = arith.constant 0 : index
    %107 = vector.load %arg21[%c1_64, %c0_65] : memref<4x32xf32, #tpu.memory_space<vmem>>, vector<1x32xf32>
    %cst_66 = arith.constant dense<0.000000e+00> : vector<16xf32>
    %108 = vector.multi_reduction <add>, %105, %cst_66 [1] : vector<16x32xf32> to vector<16xf32>
    %109 = vector.shape_cast %108 : vector<16xf32> to vector<16x1xf32>
    %cst_67 = arith.constant 3.200000e+01 : f32
    %110 = vector.broadcast %cst_67 : f32 to vector<16x1xf32>
    %111 = arith.divf %109, %110 : vector<16x1xf32>
    %112 = vector.broadcast %111 : vector<16x1xf32> to vector<16x32xf32>
    %113 = arith.subf %105, %112 : vector<16x32xf32>
    %114 = arith.mulf %113, %113 : vector<16x32xf32>
    %cst_68 = arith.constant dense<0.000000e+00> : vector<16xf32>
    %115 = vector.multi_reduction <add>, %114, %cst_68 [1] : vector<16x32xf32> to vector<16xf32>
    %116 = vector.shape_cast %115 : vector<16xf32> to vector<16x1xf32>
    %cst_69 = arith.constant 3.200000e+01 : f32
    %117 = vector.broadcast %cst_69 : f32 to vector<16x1xf32>
    %118 = arith.divf %116, %117 : vector<16x1xf32>
    %cst_70 = arith.constant 9.99999974E-6 : f32
    %119 = vector.broadcast %cst_70 : f32 to vector<16x1xf32>
    %120 = arith.addf %118, %119 : vector<16x1xf32>
    %121 = math.rsqrt %120 : vector<16x1xf32>
    %122 = vector.broadcast %121 : vector<16x1xf32> to vector<16x32xf32>
    %123 = arith.mulf %113, %122 : vector<16x32xf32>
    %124 = vector.broadcast %106 : vector<1x32xf32> to vector<16x32xf32>
    %125 = arith.mulf %123, %124 : vector<16x32xf32>
    %126 = vector.broadcast %107 : vector<1x32xf32> to vector<16x32xf32>
    %127 = arith.addf %125, %126 : vector<16x32xf32>
    %c32 = arith.constant 32 : index
    %c0_71 = arith.constant 0 : index
    %128 = vector.load %arg12[%c32, %c0_71] : memref<64x96xf32, #tpu.memory_space<vmem>>, vector<32x96xf32>
    %c1_72 = arith.constant 1 : index
    %c0_73 = arith.constant 0 : index
    %129 = vector.load %arg13[%c1_72, %c0_73] : memref<2x96xf32, #tpu.memory_space<vmem>>, vector<1x96xf32>
    %c32_74 = arith.constant 32 : index
    %c0_75 = arith.constant 0 : index
    %130 = vector.load %arg14[%c32_74, %c0_75] : memref<64x32xf32, #tpu.memory_space<vmem>>, vector<32x32xf32>
    %c1_76 = arith.constant 1 : index
    %c0_77 = arith.constant 0 : index
    %131 = vector.load %arg15[%c1_76, %c0_77] : memref<2x32xf32, #tpu.memory_space<vmem>>, vector<1x32xf32>
    %cst_78 = arith.constant dense<0.000000e+00> : vector<16x96xf32>
    %132 = tpu.matmul %127, %128, %cst_78 {dimension_numbers = #tpu.dot_dimension_numbers<[1], [0], [0], [1], [0, 0, 1, 1], [], []>} : vector<16x32xf32>, vector<32x96xf32>, vector<16x96xf32> -> vector<16x96xf32>
    %133 = vector.broadcast %129 : vector<1x96xf32> to vector<16x96xf32>
    %134 = arith.addf %132, %133 : vector<16x96xf32>
    %135 = vector.extract_strided_slice %134 {offsets = [0, 0], sizes = [16, 32], strides = [1, 1]} : vector<16x96xf32> to vector<16x32xf32>
    %136 = vector.extract_strided_slice %134 {offsets = [0, 32], sizes = [16, 32], strides = [1, 1]} : vector<16x96xf32> to vector<16x32xf32>
    %137 = vector.extract_strided_slice %134 {offsets = [0, 64], sizes = [16, 32], strides = [1, 1]} : vector<16x96xf32> to vector<16x32xf32>
    %138 = tpu.concatenate %136, %136 in 0 : vector<16x32xf32>, vector<16x32xf32> -> vector<32x32xf32>
    %139 = tpu.concatenate %137, %137 in 0 : vector<16x32xf32>, vector<16x32xf32> -> vector<32x32xf32>
    %140 = tpu.concatenate %138, %138 in 0 : vector<32x32xf32>, vector<32x32xf32> -> vector<64x32xf32>
    %141 = arith.mulf %140, %0 : vector<64x32xf32>
    %142 = tpu.concatenate %139, %139 in 0 : vector<32x32xf32>, vector<32x32xf32> -> vector<64x32xf32>
    %143 = arith.mulf %142, %0 : vector<64x32xf32>
    %cst_79 = arith.constant dense<0.000000e+00> : vector<16x64xf32>
    %144 = tpu.matmul %135, %141, %cst_79 {dimension_numbers = #tpu.dot_dimension_numbers<[1], [1], [0], [0], [0, 0, 1, 0], [], []>} : vector<16x32xf32>, vector<64x32xf32>, vector<16x64xf32> -> vector<16x64xf32>
    %145 = arith.addf %144, %2 : vector<16x64xf32>
    %cst_80 = arith.constant dense<0xFF800000> : vector<16xf32>
    %146 = vector.multi_reduction <maximumf>, %145, %cst_80 [1] : vector<16x64xf32> to vector<16xf32>
    %147 = vector.shape_cast %146 : vector<16xf32> to vector<16x1xf32>
    %148 = vector.broadcast %147 : vector<16x1xf32> to vector<16x64xf32>
    %149 = arith.subf %145, %148 : vector<16x64xf32>
    %150 = math.exp %149 : vector<16x64xf32>
    %cst_81 = arith.constant dense<0.000000e+00> : vector<16x64xf32>
    %151 = tpu.matmul %150, %1, %cst_81 {dimension_numbers = #tpu.dot_dimension_numbers<[1], [0], [0], [1], [0, 0, 1, 1], [], []>} : vector<16x64xf32>, vector<64x64xf32>, vector<16x64xf32> -> vector<16x64xf32>
    %152 = arith.divf %150, %151 : vector<16x64xf32>
    %cst_82 = arith.constant dense<0.000000e+00> : vector<16x32xf32>
    %153 = tpu.matmul %152, %143, %cst_82 {dimension_numbers = #tpu.dot_dimension_numbers<[1], [0], [0], [1], [0, 0, 1, 1], [], []>} : vector<16x64xf32>, vector<64x32xf32>, vector<16x32xf32> -> vector<16x32xf32>
    %cst_83 = arith.constant -1.000000e+09 : f32
    %154 = vector.broadcast %cst_83 : f32 to vector<16x32xf32>
    %155 = arith.select %31, %154, %153 : vector<16x32xi1>, vector<16x32xf32>
    %cst_84 = arith.constant dense<0.000000e+00> : vector<16x32xf32>
    %156 = tpu.matmul %155, %130, %cst_84 {dimension_numbers = #tpu.dot_dimension_numbers<[1], [0], [0], [1], [0, 0, 1, 1], [], []>} : vector<16x32xf32>, vector<32x32xf32>, vector<16x32xf32> -> vector<16x32xf32>
    %157 = vector.broadcast %131 : vector<1x32xf32> to vector<16x32xf32>
    %158 = arith.addf %156, %157 : vector<16x32xf32>
    %159 = arith.addf %127, %158 : vector<16x32xf32>
    %c2 = arith.constant 2 : index
    %c0_85 = arith.constant 0 : index
    %160 = vector.load %arg20[%c2, %c0_85] : memref<4x32xf32, #tpu.memory_space<vmem>>, vector<1x32xf32>
    %c2_86 = arith.constant 2 : index
    %c0_87 = arith.constant 0 : index
    %161 = vector.load %arg21[%c2_86, %c0_87] : memref<4x32xf32, #tpu.memory_space<vmem>>, vector<1x32xf32>
    %cst_88 = arith.constant dense<0.000000e+00> : vector<16xf32>
    %162 = vector.multi_reduction <add>, %159, %cst_88 [1] : vector<16x32xf32> to vector<16xf32>
    %163 = vector.shape_cast %162 : vector<16xf32> to vector<16x1xf32>
    %cst_89 = arith.constant 3.200000e+01 : f32
    %164 = vector.broadcast %cst_89 : f32 to vector<16x1xf32>
    %165 = arith.divf %163, %164 : vector<16x1xf32>
    %166 = vector.broadcast %165 : vector<16x1xf32> to vector<16x32xf32>
    %167 = arith.subf %159, %166 : vector<16x32xf32>
    %168 = arith.mulf %167, %167 : vector<16x32xf32>
    %cst_90 = arith.constant dense<0.000000e+00> : vector<16xf32>
    %169 = vector.multi_reduction <add>, %168, %cst_90 [1] : vector<16x32xf32> to vector<16xf32>
    %170 = vector.shape_cast %169 : vector<16xf32> to vector<16x1xf32>
    %cst_91 = arith.constant 3.200000e+01 : f32
    %171 = vector.broadcast %cst_91 : f32 to vector<16x1xf32>
    %172 = arith.divf %170, %171 : vector<16x1xf32>
    %cst_92 = arith.constant 9.99999974E-6 : f32
    %173 = vector.broadcast %cst_92 : f32 to vector<16x1xf32>
    %174 = arith.addf %172, %173 : vector<16x1xf32>
    %175 = math.rsqrt %174 : vector<16x1xf32>
    %176 = vector.broadcast %175 : vector<16x1xf32> to vector<16x32xf32>
    %177 = arith.mulf %167, %176 : vector<16x32xf32>
    %178 = vector.broadcast %160 : vector<1x32xf32> to vector<16x32xf32>
    %179 = arith.mulf %177, %178 : vector<16x32xf32>
    %180 = vector.broadcast %161 : vector<1x32xf32> to vector<16x32xf32>
    %181 = arith.addf %179, %180 : vector<16x32xf32>
    %c32_93 = arith.constant 32 : index
    %c0_94 = arith.constant 0 : index
    %182 = vector.load %arg16[%c32_93, %c0_94] : memref<64x32xf32, #tpu.memory_space<vmem>>, vector<32x32xf32>
    %c1_95 = arith.constant 1 : index
    %c0_96 = arith.constant 0 : index
    %183 = vector.load %arg17[%c1_95, %c0_96] : memref<2x32xf32, #tpu.memory_space<vmem>>, vector<1x32xf32>
    %c32_97 = arith.constant 32 : index
    %c0_98 = arith.constant 0 : index
    %184 = vector.load %arg18[%c32_97, %c0_98] : memref<64x32xf32, #tpu.memory_space<vmem>>, vector<32x32xf32>
    %c1_99 = arith.constant 1 : index
    %c0_100 = arith.constant 0 : index
    %185 = vector.load %arg19[%c1_99, %c0_100] : memref<2x32xf32, #tpu.memory_space<vmem>>, vector<1x32xf32>
    %cst_101 = arith.constant dense<0.000000e+00> : vector<16x32xf32>
    %186 = tpu.matmul %158, %182, %cst_101 {dimension_numbers = #tpu.dot_dimension_numbers<[1], [0], [0], [1], [0, 0, 1, 1], [], []>} : vector<16x32xf32>, vector<32x32xf32>, vector<16x32xf32> -> vector<16x32xf32>
    %187 = vector.broadcast %183 : vector<1x32xf32> to vector<16x32xf32>
    %188 = arith.addf %186, %187 : vector<16x32xf32>
    %cst_102 = arith.constant 0.000000e+00 : f32
    %189 = vector.broadcast %cst_102 : f32 to vector<16x32xf32>
    %190 = arith.maximumf %188, %189 : vector<16x32xf32>
    %cst_103 = arith.constant dense<0.000000e+00> : vector<16x32xf32>
    %191 = tpu.matmul %190, %184, %cst_103 {dimension_numbers = #tpu.dot_dimension_numbers<[1], [0], [0], [1], [0, 0, 1, 1], [], []>} : vector<16x32xf32>, vector<32x32xf32>, vector<16x32xf32> -> vector<16x32xf32>
    %192 = vector.broadcast %185 : vector<1x32xf32> to vector<16x32xf32>
    %193 = arith.addf %191, %192 : vector<16x32xf32>
    %194 = arith.addf %181, %193 : vector<16x32xf32>
    %c3 = arith.constant 3 : index
    %c0_104 = arith.constant 0 : index
    %195 = vector.load %arg20[%c3, %c0_104] : memref<4x32xf32, #tpu.memory_space<vmem>>, vector<1x32xf32>
    %c3_105 = arith.constant 3 : index
    %c0_106 = arith.constant 0 : index
    %196 = vector.load %arg21[%c3_105, %c0_106] : memref<4x32xf32, #tpu.memory_space<vmem>>, vector<1x32xf32>
    %cst_107 = arith.constant dense<0.000000e+00> : vector<16xf32>
    %197 = vector.multi_reduction <add>, %194, %cst_107 [1] : vector<16x32xf32> to vector<16xf32>
    %198 = vector.shape_cast %197 : vector<16xf32> to vector<16x1xf32>
    %cst_108 = arith.constant 3.200000e+01 : f32
    %199 = vector.broadcast %cst_108 : f32 to vector<16x1xf32>
    %200 = arith.divf %198, %199 : vector<16x1xf32>
    %201 = vector.broadcast %200 : vector<16x1xf32> to vector<16x32xf32>
    %202 = arith.subf %194, %201 : vector<16x32xf32>
    %203 = arith.mulf %202, %202 : vector<16x32xf32>
    %cst_109 = arith.constant dense<0.000000e+00> : vector<16xf32>
    %204 = vector.multi_reduction <add>, %203, %cst_109 [1] : vector<16x32xf32> to vector<16xf32>
    %205 = vector.shape_cast %204 : vector<16xf32> to vector<16x1xf32>
    %cst_110 = arith.constant 3.200000e+01 : f32
    %206 = vector.broadcast %cst_110 : f32 to vector<16x1xf32>
    %207 = arith.divf %205, %206 : vector<16x1xf32>
    %cst_111 = arith.constant 9.99999974E-6 : f32
    %208 = vector.broadcast %cst_111 : f32 to vector<16x1xf32>
    %209 = arith.addf %207, %208 : vector<16x1xf32>
    %210 = math.rsqrt %209 : vector<16x1xf32>
    %211 = vector.broadcast %210 : vector<16x1xf32> to vector<16x32xf32>
    %212 = arith.mulf %202, %211 : vector<16x32xf32>
    %213 = vector.broadcast %195 : vector<1x32xf32> to vector<16x32xf32>
    %214 = arith.mulf %212, %213 : vector<16x32xf32>
    %215 = vector.broadcast %196 : vector<1x32xf32> to vector<16x32xf32>
    %216 = arith.addf %214, %215 : vector<16x32xf32>
    %c0_112 = arith.constant 0 : index
    %c0_113 = arith.constant 0 : index
    %217 = vector.load %arg22[%c0_112, %c0_113] : memref<64x96xf32, #tpu.memory_space<vmem>>, vector<32x96xf32>
    %c0_114 = arith.constant 0 : index
    %c0_115 = arith.constant 0 : index
    %218 = vector.load %arg23[%c0_114, %c0_115] : memref<2x96xf32, #tpu.memory_space<vmem>>, vector<1x96xf32>
    %c0_116 = arith.constant 0 : index
    %c0_117 = arith.constant 0 : index
    %219 = vector.load %arg24[%c0_116, %c0_117] : memref<64x32xf32, #tpu.memory_space<vmem>>, vector<32x32xf32>
    %c0_118 = arith.constant 0 : index
    %c0_119 = arith.constant 0 : index
    %220 = vector.load %arg25[%c0_118, %c0_119] : memref<2x32xf32, #tpu.memory_space<vmem>>, vector<1x32xf32>
    %cst_120 = arith.constant dense<0.000000e+00> : vector<16x96xf32>
    %221 = tpu.matmul %20, %217, %cst_120 {dimension_numbers = #tpu.dot_dimension_numbers<[1], [0], [0], [1], [0, 0, 1, 1], [], []>} : vector<16x32xf32>, vector<32x96xf32>, vector<16x96xf32> -> vector<16x96xf32>
    %222 = vector.broadcast %218 : vector<1x96xf32> to vector<16x96xf32>
    %223 = arith.addf %221, %222 : vector<16x96xf32>
    %224 = vector.extract_strided_slice %223 {offsets = [0, 0], sizes = [16, 32], strides = [1, 1]} : vector<16x96xf32> to vector<16x32xf32>
    %225 = vector.extract_strided_slice %223 {offsets = [0, 32], sizes = [16, 32], strides = [1, 1]} : vector<16x96xf32> to vector<16x32xf32>
    %226 = vector.extract_strided_slice %223 {offsets = [0, 64], sizes = [16, 32], strides = [1, 1]} : vector<16x96xf32> to vector<16x32xf32>
    %227 = tpu.concatenate %225, %225 in 0 : vector<16x32xf32>, vector<16x32xf32> -> vector<32x32xf32>
    %228 = tpu.concatenate %226, %226 in 0 : vector<16x32xf32>, vector<16x32xf32> -> vector<32x32xf32>
    %229 = tpu.concatenate %227, %227 in 0 : vector<32x32xf32>, vector<32x32xf32> -> vector<64x32xf32>
    %230 = arith.mulf %229, %0 : vector<64x32xf32>
    %231 = tpu.concatenate %228, %228 in 0 : vector<32x32xf32>, vector<32x32xf32> -> vector<64x32xf32>
    %232 = arith.mulf %231, %0 : vector<64x32xf32>
    %cst_121 = arith.constant dense<0.000000e+00> : vector<16x64xf32>
    %233 = tpu.matmul %224, %230, %cst_121 {dimension_numbers = #tpu.dot_dimension_numbers<[1], [1], [0], [0], [0, 0, 1, 0], [], []>} : vector<16x32xf32>, vector<64x32xf32>, vector<16x64xf32> -> vector<16x64xf32>
    %234 = arith.addf %233, %2 : vector<16x64xf32>
    %cst_122 = arith.constant dense<0xFF800000> : vector<16xf32>
    %235 = vector.multi_reduction <maximumf>, %234, %cst_122 [1] : vector<16x64xf32> to vector<16xf32>
    %236 = vector.shape_cast %235 : vector<16xf32> to vector<16x1xf32>
    %237 = vector.broadcast %236 : vector<16x1xf32> to vector<16x64xf32>
    %238 = arith.subf %234, %237 : vector<16x64xf32>
    %239 = math.exp %238 : vector<16x64xf32>
    %cst_123 = arith.constant dense<0.000000e+00> : vector<16x64xf32>
    %240 = tpu.matmul %239, %1, %cst_123 {dimension_numbers = #tpu.dot_dimension_numbers<[1], [0], [0], [1], [0, 0, 1, 1], [], []>} : vector<16x64xf32>, vector<64x64xf32>, vector<16x64xf32> -> vector<16x64xf32>
    %241 = arith.divf %239, %240 : vector<16x64xf32>
    %cst_124 = arith.constant dense<0.000000e+00> : vector<16x32xf32>
    %242 = tpu.matmul %241, %232, %cst_124 {dimension_numbers = #tpu.dot_dimension_numbers<[1], [0], [0], [1], [0, 0, 1, 1], [], []>} : vector<16x64xf32>, vector<64x32xf32>, vector<16x32xf32> -> vector<16x32xf32>
    %cst_125 = arith.constant -1.000000e+09 : f32
    %243 = vector.broadcast %cst_125 : f32 to vector<16x32xf32>
    %244 = arith.select %38, %243, %242 : vector<16x32xi1>, vector<16x32xf32>
    %cst_126 = arith.constant dense<0.000000e+00> : vector<16x32xf32>
    %245 = tpu.matmul %244, %219, %cst_126 {dimension_numbers = #tpu.dot_dimension_numbers<[1], [0], [0], [1], [0, 0, 1, 1], [], []>} : vector<16x32xf32>, vector<32x32xf32>, vector<16x32xf32> -> vector<16x32xf32>
    %246 = vector.broadcast %220 : vector<1x32xf32> to vector<16x32xf32>
    %247 = arith.addf %245, %246 : vector<16x32xf32>
    %248 = arith.addf %20, %247 : vector<16x32xf32>
    %c0_127 = arith.constant 0 : index
    %c0_128 = arith.constant 0 : index
    %249 = vector.load %arg34[%c0_127, %c0_128] : memref<6x32xf32, #tpu.memory_space<vmem>>, vector<1x32xf32>
    %c0_129 = arith.constant 0 : index
    %c0_130 = arith.constant 0 : index
    %250 = vector.load %arg35[%c0_129, %c0_130] : memref<6x32xf32, #tpu.memory_space<vmem>>, vector<1x32xf32>
    %cst_131 = arith.constant dense<0.000000e+00> : vector<16xf32>
    %251 = vector.multi_reduction <add>, %248, %cst_131 [1] : vector<16x32xf32> to vector<16xf32>
    %252 = vector.shape_cast %251 : vector<16xf32> to vector<16x1xf32>
    %cst_132 = arith.constant 3.200000e+01 : f32
    %253 = vector.broadcast %cst_132 : f32 to vector<16x1xf32>
    %254 = arith.divf %252, %253 : vector<16x1xf32>
    %255 = vector.broadcast %254 : vector<16x1xf32> to vector<16x32xf32>
    %256 = arith.subf %248, %255 : vector<16x32xf32>
    %257 = arith.mulf %256, %256 : vector<16x32xf32>
    %cst_133 = arith.constant dense<0.000000e+00> : vector<16xf32>
    %258 = vector.multi_reduction <add>, %257, %cst_133 [1] : vector<16x32xf32> to vector<16xf32>
    %259 = vector.shape_cast %258 : vector<16xf32> to vector<16x1xf32>
    %cst_134 = arith.constant 3.200000e+01 : f32
    %260 = vector.broadcast %cst_134 : f32 to vector<16x1xf32>
    %261 = arith.divf %259, %260 : vector<16x1xf32>
    %cst_135 = arith.constant 9.99999974E-6 : f32
    %262 = vector.broadcast %cst_135 : f32 to vector<16x1xf32>
    %263 = arith.addf %261, %262 : vector<16x1xf32>
    %264 = math.rsqrt %263 : vector<16x1xf32>
    %265 = vector.broadcast %264 : vector<16x1xf32> to vector<16x32xf32>
    %266 = arith.mulf %256, %265 : vector<16x32xf32>
    %267 = vector.broadcast %249 : vector<1x32xf32> to vector<16x32xf32>
    %268 = arith.mulf %266, %267 : vector<16x32xf32>
    %269 = vector.broadcast %250 : vector<1x32xf32> to vector<16x32xf32>
    %270 = arith.addf %268, %269 : vector<16x32xf32>
    %c0_136 = arith.constant 0 : index
    %c0_137 = arith.constant 0 : index
    %271 = vector.load %arg26[%c0_136, %c0_137] : memref<64x96xf32, #tpu.memory_space<vmem>>, vector<32x96xf32>
    %c0_138 = arith.constant 0 : index
    %c0_139 = arith.constant 0 : index
    %272 = vector.load %arg27[%c0_138, %c0_139] : memref<2x96xf32, #tpu.memory_space<vmem>>, vector<1x96xf32>
    %c0_140 = arith.constant 0 : index
    %c0_141 = arith.constant 0 : index
    %273 = vector.load %arg28[%c0_140, %c0_141] : memref<64x32xf32, #tpu.memory_space<vmem>>, vector<32x32xf32>
    %c0_142 = arith.constant 0 : index
    %c0_143 = arith.constant 0 : index
    %274 = vector.load %arg29[%c0_142, %c0_143] : memref<2x32xf32, #tpu.memory_space<vmem>>, vector<1x32xf32>
    %275 = tpu.concatenate %270, %216 in 0 : vector<16x32xf32>, vector<16x32xf32> -> vector<32x32xf32>
    %cst_144 = arith.constant dense<0.000000e+00> : vector<32x96xf32>
    %276 = tpu.matmul %275, %271, %cst_144 {dimension_numbers = #tpu.dot_dimension_numbers<[1], [0], [0], [1], [0, 0, 1, 1], [], []>} : vector<32x32xf32>, vector<32x96xf32>, vector<32x96xf32> -> vector<32x96xf32>
    %277 = vector.broadcast %272 : vector<1x96xf32> to vector<32x96xf32>
    %278 = arith.addf %276, %277 : vector<32x96xf32>
    %279 = vector.extract_strided_slice %278 {offsets = [0, 0], sizes = [16, 32], strides = [1, 1]} : vector<32x96xf32> to vector<16x32xf32>
    %280 = vector.extract_strided_slice %278 {offsets = [16, 32], sizes = [16, 32], strides = [1, 1]} : vector<32x96xf32> to vector<16x32xf32>
    %281 = vector.extract_strided_slice %278 {offsets = [16, 64], sizes = [16, 32], strides = [1, 1]} : vector<32x96xf32> to vector<16x32xf32>
    %282 = tpu.concatenate %280, %280 in 0 : vector<16x32xf32>, vector<16x32xf32> -> vector<32x32xf32>
    %283 = tpu.concatenate %281, %281 in 0 : vector<16x32xf32>, vector<16x32xf32> -> vector<32x32xf32>
    %284 = tpu.concatenate %282, %282 in 0 : vector<32x32xf32>, vector<32x32xf32> -> vector<64x32xf32>
    %285 = arith.mulf %284, %0 : vector<64x32xf32>
    %286 = tpu.concatenate %283, %283 in 0 : vector<32x32xf32>, vector<32x32xf32> -> vector<64x32xf32>
    %287 = arith.mulf %286, %0 : vector<64x32xf32>
    %cst_145 = arith.constant dense<0.000000e+00> : vector<16x64xf32>
    %288 = tpu.matmul %279, %285, %cst_145 {dimension_numbers = #tpu.dot_dimension_numbers<[1], [1], [0], [0], [0, 0, 1, 0], [], []>} : vector<16x32xf32>, vector<64x32xf32>, vector<16x64xf32> -> vector<16x64xf32>
    %289 = arith.addf %288, %2 : vector<16x64xf32>
    %cst_146 = arith.constant dense<0xFF800000> : vector<16xf32>
    %290 = vector.multi_reduction <maximumf>, %289, %cst_146 [1] : vector<16x64xf32> to vector<16xf32>
    %291 = vector.shape_cast %290 : vector<16xf32> to vector<16x1xf32>
    %292 = vector.broadcast %291 : vector<16x1xf32> to vector<16x64xf32>
    %293 = arith.subf %289, %292 : vector<16x64xf32>
    %294 = math.exp %293 : vector<16x64xf32>
    %cst_147 = arith.constant dense<0.000000e+00> : vector<16x64xf32>
    %295 = tpu.matmul %294, %1, %cst_147 {dimension_numbers = #tpu.dot_dimension_numbers<[1], [0], [0], [1], [0, 0, 1, 1], [], []>} : vector<16x64xf32>, vector<64x64xf32>, vector<16x64xf32> -> vector<16x64xf32>
    %296 = arith.divf %294, %295 : vector<16x64xf32>
    %cst_148 = arith.constant dense<0.000000e+00> : vector<16x32xf32>
    %297 = tpu.matmul %296, %287, %cst_148 {dimension_numbers = #tpu.dot_dimension_numbers<[1], [0], [0], [1], [0, 0, 1, 1], [], []>} : vector<16x64xf32>, vector<64x32xf32>, vector<16x32xf32> -> vector<16x32xf32>
    %cst_149 = arith.constant -1.000000e+09 : f32
    %298 = vector.broadcast %cst_149 : f32 to vector<16x32xf32>
    %299 = arith.select %31, %298, %297 : vector<16x32xi1>, vector<16x32xf32>
    %cst_150 = arith.constant dense<0.000000e+00> : vector<16x32xf32>
    %300 = tpu.matmul %299, %273, %cst_150 {dimension_numbers = #tpu.dot_dimension_numbers<[1], [0], [0], [1], [0, 0, 1, 1], [], []>} : vector<16x32xf32>, vector<32x32xf32>, vector<16x32xf32> -> vector<16x32xf32>
    %301 = vector.broadcast %274 : vector<1x32xf32> to vector<16x32xf32>
    %302 = arith.addf %300, %301 : vector<16x32xf32>
    %303 = arith.addf %270, %302 : vector<16x32xf32>
    %c1_151 = arith.constant 1 : index
    %c0_152 = arith.constant 0 : index
    %304 = vector.load %arg34[%c1_151, %c0_152] : memref<6x32xf32, #tpu.memory_space<vmem>>, vector<1x32xf32>
    %c1_153 = arith.constant 1 : index
    %c0_154 = arith.constant 0 : index
    %305 = vector.load %arg35[%c1_153, %c0_154] : memref<6x32xf32, #tpu.memory_space<vmem>>, vector<1x32xf32>
    %cst_155 = arith.constant dense<0.000000e+00> : vector<16xf32>
    %306 = vector.multi_reduction <add>, %303, %cst_155 [1] : vector<16x32xf32> to vector<16xf32>
    %307 = vector.shape_cast %306 : vector<16xf32> to vector<16x1xf32>
    %cst_156 = arith.constant 3.200000e+01 : f32
    %308 = vector.broadcast %cst_156 : f32 to vector<16x1xf32>
    %309 = arith.divf %307, %308 : vector<16x1xf32>
    %310 = vector.broadcast %309 : vector<16x1xf32> to vector<16x32xf32>
    %311 = arith.subf %303, %310 : vector<16x32xf32>
    %312 = arith.mulf %311, %311 : vector<16x32xf32>
    %cst_157 = arith.constant dense<0.000000e+00> : vector<16xf32>
    %313 = vector.multi_reduction <add>, %312, %cst_157 [1] : vector<16x32xf32> to vector<16xf32>
    %314 = vector.shape_cast %313 : vector<16xf32> to vector<16x1xf32>
    %cst_158 = arith.constant 3.200000e+01 : f32
    %315 = vector.broadcast %cst_158 : f32 to vector<16x1xf32>
    %316 = arith.divf %314, %315 : vector<16x1xf32>
    %cst_159 = arith.constant 9.99999974E-6 : f32
    %317 = vector.broadcast %cst_159 : f32 to vector<16x1xf32>
    %318 = arith.addf %316, %317 : vector<16x1xf32>
    %319 = math.rsqrt %318 : vector<16x1xf32>
    %320 = vector.broadcast %319 : vector<16x1xf32> to vector<16x32xf32>
    %321 = arith.mulf %311, %320 : vector<16x32xf32>
    %322 = vector.broadcast %304 : vector<1x32xf32> to vector<16x32xf32>
    %323 = arith.mulf %321, %322 : vector<16x32xf32>
    %324 = vector.broadcast %305 : vector<1x32xf32> to vector<16x32xf32>
    %325 = arith.addf %323, %324 : vector<16x32xf32>
    %c0_160 = arith.constant 0 : index
    %c0_161 = arith.constant 0 : index
    %326 = vector.load %arg30[%c0_160, %c0_161] : memref<64x32xf32, #tpu.memory_space<vmem>>, vector<32x32xf32>
    %c0_162 = arith.constant 0 : index
    %c0_163 = arith.constant 0 : index
    %327 = vector.load %arg31[%c0_162, %c0_163] : memref<2x32xf32, #tpu.memory_space<vmem>>, vector<1x32xf32>
    %c0_164 = arith.constant 0 : index
    %c0_165 = arith.constant 0 : index
    %328 = vector.load %arg32[%c0_164, %c0_165] : memref<64x32xf32, #tpu.memory_space<vmem>>, vector<32x32xf32>
    %c0_166 = arith.constant 0 : index
    %c0_167 = arith.constant 0 : index
    %329 = vector.load %arg33[%c0_166, %c0_167] : memref<2x32xf32, #tpu.memory_space<vmem>>, vector<1x32xf32>
    %cst_168 = arith.constant dense<0.000000e+00> : vector<16x32xf32>
    %330 = tpu.matmul %325, %326, %cst_168 {dimension_numbers = #tpu.dot_dimension_numbers<[1], [0], [0], [1], [0, 0, 1, 1], [], []>} : vector<16x32xf32>, vector<32x32xf32>, vector<16x32xf32> -> vector<16x32xf32>
    %331 = vector.broadcast %327 : vector<1x32xf32> to vector<16x32xf32>
    %332 = arith.addf %330, %331 : vector<16x32xf32>
    %cst_169 = arith.constant 0.000000e+00 : f32
    %333 = vector.broadcast %cst_169 : f32 to vector<16x32xf32>
    %334 = arith.maximumf %332, %333 : vector<16x32xf32>
    %cst_170 = arith.constant dense<0.000000e+00> : vector<16x32xf32>
    %335 = tpu.matmul %334, %328, %cst_170 {dimension_numbers = #tpu.dot_dimension_numbers<[1], [0], [0], [1], [0, 0, 1, 1], [], []>} : vector<16x32xf32>, vector<32x32xf32>, vector<16x32xf32> -> vector<16x32xf32>
    %336 = vector.broadcast %329 : vector<1x32xf32> to vector<16x32xf32>
    %337 = arith.addf %335, %336 : vector<16x32xf32>
    %338 = arith.addf %325, %337 : vector<16x32xf32>
    %c2_171 = arith.constant 2 : index
    %c0_172 = arith.constant 0 : index
    %339 = vector.load %arg34[%c2_171, %c0_172] : memref<6x32xf32, #tpu.memory_space<vmem>>, vector<1x32xf32>
    %c2_173 = arith.constant 2 : index
    %c0_174 = arith.constant 0 : index
    %340 = vector.load %arg35[%c2_173, %c0_174] : memref<6x32xf32, #tpu.memory_space<vmem>>, vector<1x32xf32>
    %cst_175 = arith.constant dense<0.000000e+00> : vector<16xf32>
    %341 = vector.multi_reduction <add>, %338, %cst_175 [1] : vector<16x32xf32> to vector<16xf32>
    %342 = vector.shape_cast %341 : vector<16xf32> to vector<16x1xf32>
    %cst_176 = arith.constant 3.200000e+01 : f32
    %343 = vector.broadcast %cst_176 : f32 to vector<16x1xf32>
    %344 = arith.divf %342, %343 : vector<16x1xf32>
    %345 = vector.broadcast %344 : vector<16x1xf32> to vector<16x32xf32>
    %346 = arith.subf %338, %345 : vector<16x32xf32>
    %347 = arith.mulf %346, %346 : vector<16x32xf32>
    %cst_177 = arith.constant dense<0.000000e+00> : vector<16xf32>
    %348 = vector.multi_reduction <add>, %347, %cst_177 [1] : vector<16x32xf32> to vector<16xf32>
    %349 = vector.shape_cast %348 : vector<16xf32> to vector<16x1xf32>
    %cst_178 = arith.constant 3.200000e+01 : f32
    %350 = vector.broadcast %cst_178 : f32 to vector<16x1xf32>
    %351 = arith.divf %349, %350 : vector<16x1xf32>
    %cst_179 = arith.constant 9.99999974E-6 : f32
    %352 = vector.broadcast %cst_179 : f32 to vector<16x1xf32>
    %353 = arith.addf %351, %352 : vector<16x1xf32>
    %354 = math.rsqrt %353 : vector<16x1xf32>
    %355 = vector.broadcast %354 : vector<16x1xf32> to vector<16x32xf32>
    %356 = arith.mulf %346, %355 : vector<16x32xf32>
    %357 = vector.broadcast %339 : vector<1x32xf32> to vector<16x32xf32>
    %358 = arith.mulf %356, %357 : vector<16x32xf32>
    %359 = vector.broadcast %340 : vector<1x32xf32> to vector<16x32xf32>
    %360 = arith.addf %358, %359 : vector<16x32xf32>
    %c32_180 = arith.constant 32 : index
    %c0_181 = arith.constant 0 : index
    %361 = vector.load %arg22[%c32_180, %c0_181] : memref<64x96xf32, #tpu.memory_space<vmem>>, vector<32x96xf32>
    %c1_182 = arith.constant 1 : index
    %c0_183 = arith.constant 0 : index
    %362 = vector.load %arg23[%c1_182, %c0_183] : memref<2x96xf32, #tpu.memory_space<vmem>>, vector<1x96xf32>
    %c32_184 = arith.constant 32 : index
    %c0_185 = arith.constant 0 : index
    %363 = vector.load %arg24[%c32_184, %c0_185] : memref<64x32xf32, #tpu.memory_space<vmem>>, vector<32x32xf32>
    %c1_186 = arith.constant 1 : index
    %c0_187 = arith.constant 0 : index
    %364 = vector.load %arg25[%c1_186, %c0_187] : memref<2x32xf32, #tpu.memory_space<vmem>>, vector<1x32xf32>
    %cst_188 = arith.constant dense<0.000000e+00> : vector<16x96xf32>
    %365 = tpu.matmul %360, %361, %cst_188 {dimension_numbers = #tpu.dot_dimension_numbers<[1], [0], [0], [1], [0, 0, 1, 1], [], []>} : vector<16x32xf32>, vector<32x96xf32>, vector<16x96xf32> -> vector<16x96xf32>
    %366 = vector.broadcast %362 : vector<1x96xf32> to vector<16x96xf32>
    %367 = arith.addf %365, %366 : vector<16x96xf32>
    %368 = vector.extract_strided_slice %367 {offsets = [0, 0], sizes = [16, 32], strides = [1, 1]} : vector<16x96xf32> to vector<16x32xf32>
    %369 = vector.extract_strided_slice %367 {offsets = [0, 32], sizes = [16, 32], strides = [1, 1]} : vector<16x96xf32> to vector<16x32xf32>
    %370 = vector.extract_strided_slice %367 {offsets = [0, 64], sizes = [16, 32], strides = [1, 1]} : vector<16x96xf32> to vector<16x32xf32>
    %371 = tpu.concatenate %369, %369 in 0 : vector<16x32xf32>, vector<16x32xf32> -> vector<32x32xf32>
    %372 = tpu.concatenate %370, %370 in 0 : vector<16x32xf32>, vector<16x32xf32> -> vector<32x32xf32>
    %373 = tpu.concatenate %371, %371 in 0 : vector<32x32xf32>, vector<32x32xf32> -> vector<64x32xf32>
    %374 = arith.mulf %373, %0 : vector<64x32xf32>
    %375 = tpu.concatenate %372, %372 in 0 : vector<32x32xf32>, vector<32x32xf32> -> vector<64x32xf32>
    %376 = arith.mulf %375, %0 : vector<64x32xf32>
    %cst_189 = arith.constant dense<0.000000e+00> : vector<16x64xf32>
    %377 = tpu.matmul %368, %374, %cst_189 {dimension_numbers = #tpu.dot_dimension_numbers<[1], [1], [0], [0], [0, 0, 1, 0], [], []>} : vector<16x32xf32>, vector<64x32xf32>, vector<16x64xf32> -> vector<16x64xf32>
    %378 = arith.addf %377, %2 : vector<16x64xf32>
    %cst_190 = arith.constant dense<0xFF800000> : vector<16xf32>
    %379 = vector.multi_reduction <maximumf>, %378, %cst_190 [1] : vector<16x64xf32> to vector<16xf32>
    %380 = vector.shape_cast %379 : vector<16xf32> to vector<16x1xf32>
    %381 = vector.broadcast %380 : vector<16x1xf32> to vector<16x64xf32>
    %382 = arith.subf %378, %381 : vector<16x64xf32>
    %383 = math.exp %382 : vector<16x64xf32>
    %cst_191 = arith.constant dense<0.000000e+00> : vector<16x64xf32>
    %384 = tpu.matmul %383, %1, %cst_191 {dimension_numbers = #tpu.dot_dimension_numbers<[1], [0], [0], [1], [0, 0, 1, 1], [], []>} : vector<16x64xf32>, vector<64x64xf32>, vector<16x64xf32> -> vector<16x64xf32>
    %385 = arith.divf %383, %384 : vector<16x64xf32>
    %cst_192 = arith.constant dense<0.000000e+00> : vector<16x32xf32>
    %386 = tpu.matmul %385, %376, %cst_192 {dimension_numbers = #tpu.dot_dimension_numbers<[1], [0], [0], [1], [0, 0, 1, 1], [], []>} : vector<16x64xf32>, vector<64x32xf32>, vector<16x32xf32> -> vector<16x32xf32>
    %cst_193 = arith.constant -1.000000e+09 : f32
    %387 = vector.broadcast %cst_193 : f32 to vector<16x32xf32>
    %388 = arith.select %38, %387, %386 : vector<16x32xi1>, vector<16x32xf32>
    %cst_194 = arith.constant dense<0.000000e+00> : vector<16x32xf32>
    %389 = tpu.matmul %388, %363, %cst_194 {dimension_numbers = #tpu.dot_dimension_numbers<[1], [0], [0], [1], [0, 0, 1, 1], [], []>} : vector<16x32xf32>, vector<32x32xf32>, vector<16x32xf32> -> vector<16x32xf32>
    %390 = vector.broadcast %364 : vector<1x32xf32> to vector<16x32xf32>
    %391 = arith.addf %389, %390 : vector<16x32xf32>
    %392 = arith.addf %360, %391 : vector<16x32xf32>
    %c3_195 = arith.constant 3 : index
    %c0_196 = arith.constant 0 : index
    %393 = vector.load %arg34[%c3_195, %c0_196] : memref<6x32xf32, #tpu.memory_space<vmem>>, vector<1x32xf32>
    %c3_197 = arith.constant 3 : index
    %c0_198 = arith.constant 0 : index
    %394 = vector.load %arg35[%c3_197, %c0_198] : memref<6x32xf32, #tpu.memory_space<vmem>>, vector<1x32xf32>
    %cst_199 = arith.constant dense<0.000000e+00> : vector<16xf32>
    %395 = vector.multi_reduction <add>, %392, %cst_199 [1] : vector<16x32xf32> to vector<16xf32>
    %396 = vector.shape_cast %395 : vector<16xf32> to vector<16x1xf32>
    %cst_200 = arith.constant 3.200000e+01 : f32
    %397 = vector.broadcast %cst_200 : f32 to vector<16x1xf32>
    %398 = arith.divf %396, %397 : vector<16x1xf32>
    %399 = vector.broadcast %398 : vector<16x1xf32> to vector<16x32xf32>
    %400 = arith.subf %392, %399 : vector<16x32xf32>
    %401 = arith.mulf %400, %400 : vector<16x32xf32>
    %cst_201 = arith.constant dense<0.000000e+00> : vector<16xf32>
    %402 = vector.multi_reduction <add>, %401, %cst_201 [1] : vector<16x32xf32> to vector<16xf32>
    %403 = vector.shape_cast %402 : vector<16xf32> to vector<16x1xf32>
    %cst_202 = arith.constant 3.200000e+01 : f32
    %404 = vector.broadcast %cst_202 : f32 to vector<16x1xf32>
    %405 = arith.divf %403, %404 : vector<16x1xf32>
    %cst_203 = arith.constant 9.99999974E-6 : f32
    %406 = vector.broadcast %cst_203 : f32 to vector<16x1xf32>
    %407 = arith.addf %405, %406 : vector<16x1xf32>
    %408 = math.rsqrt %407 : vector<16x1xf32>
    %409 = vector.broadcast %408 : vector<16x1xf32> to vector<16x32xf32>
    %410 = arith.mulf %400, %409 : vector<16x32xf32>
    %411 = vector.broadcast %393 : vector<1x32xf32> to vector<16x32xf32>
    %412 = arith.mulf %410, %411 : vector<16x32xf32>
    %413 = vector.broadcast %394 : vector<1x32xf32> to vector<16x32xf32>
    %414 = arith.addf %412, %413 : vector<16x32xf32>
    %c32_204 = arith.constant 32 : index
    %c0_205 = arith.constant 0 : index
    %415 = vector.load %arg26[%c32_204, %c0_205] : memref<64x96xf32, #tpu.memory_space<vmem>>, vector<32x96xf32>
    %c1_206 = arith.constant 1 : index
    %c0_207 = arith.constant 0 : index
    %416 = vector.load %arg27[%c1_206, %c0_207] : memref<2x96xf32, #tpu.memory_space<vmem>>, vector<1x96xf32>
    %c32_208 = arith.constant 32 : index
    %c0_209 = arith.constant 0 : index
    %417 = vector.load %arg28[%c32_208, %c0_209] : memref<64x32xf32, #tpu.memory_space<vmem>>, vector<32x32xf32>
    %c1_210 = arith.constant 1 : index
    %c0_211 = arith.constant 0 : index
    %418 = vector.load %arg29[%c1_210, %c0_211] : memref<2x32xf32, #tpu.memory_space<vmem>>, vector<1x32xf32>
    %419 = tpu.concatenate %414, %216 in 0 : vector<16x32xf32>, vector<16x32xf32> -> vector<32x32xf32>
    %cst_212 = arith.constant dense<0.000000e+00> : vector<32x96xf32>
    %420 = tpu.matmul %419, %415, %cst_212 {dimension_numbers = #tpu.dot_dimension_numbers<[1], [0], [0], [1], [0, 0, 1, 1], [], []>} : vector<32x32xf32>, vector<32x96xf32>, vector<32x96xf32> -> vector<32x96xf32>
    %421 = vector.broadcast %416 : vector<1x96xf32> to vector<32x96xf32>
    %422 = arith.addf %420, %421 : vector<32x96xf32>
    %423 = vector.extract_strided_slice %422 {offsets = [0, 0], sizes = [16, 32], strides = [1, 1]} : vector<32x96xf32> to vector<16x32xf32>
    %424 = vector.extract_strided_slice %422 {offsets = [16, 32], sizes = [16, 32], strides = [1, 1]} : vector<32x96xf32> to vector<16x32xf32>
    %425 = vector.extract_strided_slice %422 {offsets = [16, 64], sizes = [16, 32], strides = [1, 1]} : vector<32x96xf32> to vector<16x32xf32>
    %426 = tpu.concatenate %424, %424 in 0 : vector<16x32xf32>, vector<16x32xf32> -> vector<32x32xf32>
    %427 = tpu.concatenate %425, %425 in 0 : vector<16x32xf32>, vector<16x32xf32> -> vector<32x32xf32>
    %428 = tpu.concatenate %426, %426 in 0 : vector<32x32xf32>, vector<32x32xf32> -> vector<64x32xf32>
    %429 = arith.mulf %428, %0 : vector<64x32xf32>
    %430 = tpu.concatenate %427, %427 in 0 : vector<32x32xf32>, vector<32x32xf32> -> vector<64x32xf32>
    %431 = arith.mulf %430, %0 : vector<64x32xf32>
    %cst_213 = arith.constant dense<0.000000e+00> : vector<16x64xf32>
    %432 = tpu.matmul %423, %429, %cst_213 {dimension_numbers = #tpu.dot_dimension_numbers<[1], [1], [0], [0], [0, 0, 1, 0], [], []>} : vector<16x32xf32>, vector<64x32xf32>, vector<16x64xf32> -> vector<16x64xf32>
    %433 = arith.addf %432, %2 : vector<16x64xf32>
    %cst_214 = arith.constant dense<0xFF800000> : vector<16xf32>
    %434 = vector.multi_reduction <maximumf>, %433, %cst_214 [1] : vector<16x64xf32> to vector<16xf32>
    %435 = vector.shape_cast %434 : vector<16xf32> to vector<16x1xf32>
    %436 = vector.broadcast %435 : vector<16x1xf32> to vector<16x64xf32>
    %437 = arith.subf %433, %436 : vector<16x64xf32>
    %438 = math.exp %437 : vector<16x64xf32>
    %cst_215 = arith.constant dense<0.000000e+00> : vector<16x64xf32>
    %439 = tpu.matmul %438, %1, %cst_215 {dimension_numbers = #tpu.dot_dimension_numbers<[1], [0], [0], [1], [0, 0, 1, 1], [], []>} : vector<16x64xf32>, vector<64x64xf32>, vector<16x64xf32> -> vector<16x64xf32>
    %440 = arith.divf %438, %439 : vector<16x64xf32>
    %cst_216 = arith.constant dense<0.000000e+00> : vector<16x32xf32>
    %441 = tpu.matmul %440, %431, %cst_216 {dimension_numbers = #tpu.dot_dimension_numbers<[1], [0], [0], [1], [0, 0, 1, 1], [], []>} : vector<16x64xf32>, vector<64x32xf32>, vector<16x32xf32> -> vector<16x32xf32>
    %cst_217 = arith.constant -1.000000e+09 : f32
    %442 = vector.broadcast %cst_217 : f32 to vector<16x32xf32>
    %443 = arith.select %31, %442, %441 : vector<16x32xi1>, vector<16x32xf32>
    %cst_218 = arith.constant dense<0.000000e+00> : vector<16x32xf32>
    %444 = tpu.matmul %443, %417, %cst_218 {dimension_numbers = #tpu.dot_dimension_numbers<[1], [0], [0], [1], [0, 0, 1, 1], [], []>} : vector<16x32xf32>, vector<32x32xf32>, vector<16x32xf32> -> vector<16x32xf32>
    %445 = vector.broadcast %418 : vector<1x32xf32> to vector<16x32xf32>
    %446 = arith.addf %444, %445 : vector<16x32xf32>
    %447 = arith.addf %414, %446 : vector<16x32xf32>
    %c4 = arith.constant 4 : index
    %c0_219 = arith.constant 0 : index
    %448 = vector.load %arg34[%c4, %c0_219] : memref<6x32xf32, #tpu.memory_space<vmem>>, vector<1x32xf32>
    %c4_220 = arith.constant 4 : index
    %c0_221 = arith.constant 0 : index
    %449 = vector.load %arg35[%c4_220, %c0_221] : memref<6x32xf32, #tpu.memory_space<vmem>>, vector<1x32xf32>
    %cst_222 = arith.constant dense<0.000000e+00> : vector<16xf32>
    %450 = vector.multi_reduction <add>, %447, %cst_222 [1] : vector<16x32xf32> to vector<16xf32>
    %451 = vector.shape_cast %450 : vector<16xf32> to vector<16x1xf32>
    %cst_223 = arith.constant 3.200000e+01 : f32
    %452 = vector.broadcast %cst_223 : f32 to vector<16x1xf32>
    %453 = arith.divf %451, %452 : vector<16x1xf32>
    %454 = vector.broadcast %453 : vector<16x1xf32> to vector<16x32xf32>
    %455 = arith.subf %447, %454 : vector<16x32xf32>
    %456 = arith.mulf %455, %455 : vector<16x32xf32>
    %cst_224 = arith.constant dense<0.000000e+00> : vector<16xf32>
    %457 = vector.multi_reduction <add>, %456, %cst_224 [1] : vector<16x32xf32> to vector<16xf32>
    %458 = vector.shape_cast %457 : vector<16xf32> to vector<16x1xf32>
    %cst_225 = arith.constant 3.200000e+01 : f32
    %459 = vector.broadcast %cst_225 : f32 to vector<16x1xf32>
    %460 = arith.divf %458, %459 : vector<16x1xf32>
    %cst_226 = arith.constant 9.99999974E-6 : f32
    %461 = vector.broadcast %cst_226 : f32 to vector<16x1xf32>
    %462 = arith.addf %460, %461 : vector<16x1xf32>
    %463 = math.rsqrt %462 : vector<16x1xf32>
    %464 = vector.broadcast %463 : vector<16x1xf32> to vector<16x32xf32>
    %465 = arith.mulf %455, %464 : vector<16x32xf32>
    %466 = vector.broadcast %448 : vector<1x32xf32> to vector<16x32xf32>
    %467 = arith.mulf %465, %466 : vector<16x32xf32>
    %468 = vector.broadcast %449 : vector<1x32xf32> to vector<16x32xf32>
    %469 = arith.addf %467, %468 : vector<16x32xf32>
    %c32_227 = arith.constant 32 : index
    %c0_228 = arith.constant 0 : index
    %470 = vector.load %arg30[%c32_227, %c0_228] : memref<64x32xf32, #tpu.memory_space<vmem>>, vector<32x32xf32>
    %c1_229 = arith.constant 1 : index
    %c0_230 = arith.constant 0 : index
    %471 = vector.load %arg31[%c1_229, %c0_230] : memref<2x32xf32, #tpu.memory_space<vmem>>, vector<1x32xf32>
    %c32_231 = arith.constant 32 : index
    %c0_232 = arith.constant 0 : index
    %472 = vector.load %arg32[%c32_231, %c0_232] : memref<64x32xf32, #tpu.memory_space<vmem>>, vector<32x32xf32>
    %c1_233 = arith.constant 1 : index
    %c0_234 = arith.constant 0 : index
    %473 = vector.load %arg33[%c1_233, %c0_234] : memref<2x32xf32, #tpu.memory_space<vmem>>, vector<1x32xf32>
    %cst_235 = arith.constant dense<0.000000e+00> : vector<16x32xf32>
    %474 = tpu.matmul %469, %470, %cst_235 {dimension_numbers = #tpu.dot_dimension_numbers<[1], [0], [0], [1], [0, 0, 1, 1], [], []>} : vector<16x32xf32>, vector<32x32xf32>, vector<16x32xf32> -> vector<16x32xf32>
    %475 = vector.broadcast %471 : vector<1x32xf32> to vector<16x32xf32>
    %476 = arith.addf %474, %475 : vector<16x32xf32>
    %cst_236 = arith.constant 0.000000e+00 : f32
    %477 = vector.broadcast %cst_236 : f32 to vector<16x32xf32>
    %478 = arith.maximumf %476, %477 : vector<16x32xf32>
    %cst_237 = arith.constant dense<0.000000e+00> : vector<16x32xf32>
    %479 = tpu.matmul %478, %472, %cst_237 {dimension_numbers = #tpu.dot_dimension_numbers<[1], [0], [0], [1], [0, 0, 1, 1], [], []>} : vector<16x32xf32>, vector<32x32xf32>, vector<16x32xf32> -> vector<16x32xf32>
    %480 = vector.broadcast %473 : vector<1x32xf32> to vector<16x32xf32>
    %481 = arith.addf %479, %480 : vector<16x32xf32>
    %482 = arith.addf %469, %481 : vector<16x32xf32>
    %c5 = arith.constant 5 : index
    %c0_238 = arith.constant 0 : index
    %483 = vector.load %arg34[%c5, %c0_238] : memref<6x32xf32, #tpu.memory_space<vmem>>, vector<1x32xf32>
    %c5_239 = arith.constant 5 : index
    %c0_240 = arith.constant 0 : index
    %484 = vector.load %arg35[%c5_239, %c0_240] : memref<6x32xf32, #tpu.memory_space<vmem>>, vector<1x32xf32>
    %cst_241 = arith.constant dense<0.000000e+00> : vector<16xf32>
    %485 = vector.multi_reduction <add>, %482, %cst_241 [1] : vector<16x32xf32> to vector<16xf32>
    %486 = vector.shape_cast %485 : vector<16xf32> to vector<16x1xf32>
    %cst_242 = arith.constant 3.200000e+01 : f32
    %487 = vector.broadcast %cst_242 : f32 to vector<16x1xf32>
    %488 = arith.divf %486, %487 : vector<16x1xf32>
    %489 = vector.broadcast %488 : vector<16x1xf32> to vector<16x32xf32>
    %490 = arith.subf %482, %489 : vector<16x32xf32>
    %491 = arith.mulf %490, %490 : vector<16x32xf32>
    %cst_243 = arith.constant dense<0.000000e+00> : vector<16xf32>
    %492 = vector.multi_reduction <add>, %491, %cst_243 [1] : vector<16x32xf32> to vector<16xf32>
    %493 = vector.shape_cast %492 : vector<16xf32> to vector<16x1xf32>
    %cst_244 = arith.constant 3.200000e+01 : f32
    %494 = vector.broadcast %cst_244 : f32 to vector<16x1xf32>
    %495 = arith.divf %493, %494 : vector<16x1xf32>
    %cst_245 = arith.constant 9.99999974E-6 : f32
    %496 = vector.broadcast %cst_245 : f32 to vector<16x1xf32>
    %497 = arith.addf %495, %496 : vector<16x1xf32>
    %498 = math.rsqrt %497 : vector<16x1xf32>
    %499 = vector.broadcast %498 : vector<16x1xf32> to vector<16x32xf32>
    %500 = arith.mulf %490, %499 : vector<16x32xf32>
    %501 = vector.broadcast %483 : vector<1x32xf32> to vector<16x32xf32>
    %502 = arith.mulf %500, %501 : vector<16x32xf32>
    %503 = vector.broadcast %484 : vector<1x32xf32> to vector<16x32xf32>
    %504 = arith.addf %502, %503 : vector<16x32xf32>
    %c0_246 = arith.constant 0 : index
    %c0_247 = arith.constant 0 : index
    %505 = vector.load %arg36[%c0_246, %c0_247] : memref<32x128xf32, #tpu.memory_space<vmem>>, vector<32x128xf32>
    %cst_248 = arith.constant dense<0.000000e+00> : vector<16x128xf32>
    %506 = tpu.matmul %504, %505, %cst_248 {dimension_numbers = #tpu.dot_dimension_numbers<[1], [0], [0], [1], [0, 0, 1, 1], [], []>} : vector<16x32xf32>, vector<32x128xf32>, vector<16x128xf32> -> vector<16x128xf32>
    %c0_249 = arith.constant 0 : index
    %c0_250 = arith.constant 0 : index
    %507 = vector.load %arg37[%c0_249, %c0_250] : memref<1x128xf32, #tpu.memory_space<vmem>>, vector<1x128xf32>
    %508 = vector.broadcast %507 : vector<1x128xf32> to vector<16x128xf32>
    %509 = arith.addf %506, %508 : vector<16x128xf32>
    %c0_251 = arith.constant 0 : index
    %c0_252 = arith.constant 0 : index
    %510 = vector.load %arg38[%c0_251, %c0_252] : memref<16x128xf32, #tpu.memory_space<vmem>>, vector<16x128xf32>
    tpu.vector_store %arg38[%c0_251, %c0_252], %509 {strides = array<i32>} : memref<16x128xf32, #tpu.memory_space<vmem>>, vector<16x128xf32>,
    return
  }
}

</mosaic_0001>

<bundles_post_ra>
// kernel: transformer_forward.1
= control target key start
LH: loop header
LB: loop body
LE: loop exit
PB: predicated region body
PF: predicated region fallthrough
CT: control target
= control target key end

     0   :  { %v3551_v0 = vmov 0   ;;  %s3552_s6 = smov 4   ;;  %s3553_s10 = smov 12   ;;  %vm198_vm0 = vcmask 130048   ;;  %v3555_v9 = vmov 0.0   ;;  %vm353_vm3 = vcmask 261120   ;;  %s4734_s0 = inlined_call_operand.smem [shape: u32[39], index: -1, kind: input, shape index: {}] }
   0x1   :  { %3269 = vset.pattern.permute.xlu0 %v3551_v0  ;;  %s1_s5 = sld [smem:[%s4734_s0]]   ;;  %3270 = vset.pattern.permute.xlu2 %v3551_v0  ;;  %s3554_s14 = smov 2   ;;  %vm524_vm8 = vcmask 523264  }
   0x2   :  { %s3033_s9 = sld [smem:[%s4734_s0 + %s3552_s6]]   ;;  %s3556_s18 = smov 6  }
   0x3   :  { %s3616_s13 = sld [smem:[%s4734_s0 + %s3553_s10]]   ;;  %s3557_s22 = smov 13  }
   0x4   :  { %s3031_s17 = sld [smem:[%s4734_s0 + %s3554_s14]]   ;;  %s3558_s26 = smov 32  }
   0x5   :  { %s3035_s21 = sld [smem:[%s4734_s0 + %s3556_s18]]   ;;  %s3559_s27 = smov 3  }
   0x6   :  { %s3640_s25 = sld [smem:[%s4734_s0 + %s3557_s22]]   ;;  %s3560_s1 = smov 96  }
   0x7   :  { %v3607_v1 = vld [vmem:[%s1_s5] sm:$0xff]  ;;  %v3610_v3 = vld [vmem:[%s1_s5 + $0x8] sm:$0xff]  ;;  %s3665_s30 = sld [smem:[%s4734_s0 + %s3559_s27]]   ;;  %s3561_s2 = smov 1  }
   0x8   :  { %185 = vperm.xlu0 %3269, %v3607_v1   ;;  %v197_v2 = vld [vmem:[%s3033_s9 + $0x8] sm:$0xff]  ;;  %v196_v4 = vld [vmem:[%s3033_s9] sm:$0xff]  ;;  %s3712_s5 = sld [smem:[%s4734_s0 + %s3561_s2]]   ;;  %s3562_s6 = smov 64   ;;  %vm271_vm4 = vcmp.ne.s32.totalorder %v3607_v1, 0  ;;  %vm272_vm5 = vcmp.ne.s32.totalorder %v3610_v3, 0 }
   0x9   :  { %219 = vmatpush.msra.mxu0 %v197_v2  ;;  %v345_v5 = vld [vmem:[%s3616_s13 + $0x18] sm:$0xff]  ;;  %v344_v6 = vld [vmem:[%s3616_s13 + $0x10] sm:$0xff]  ;;  %v343_v14 = vld [vmem:[%s3616_s13 + $0x8] sm:$0xff]  ;;  %v3076_v54 = vsel %vm271_vm4, 1.0, %v3555_v9  ;;  %v3077_v55 = vsel %vm272_vm5, 1.0, %v3555_v9  ;;  %s3563_s7 = smov 5  }
   0xa   :  { %372 = vmatpush.msra.mxu3 %v345_v5  ;;  %v3623_v7 = vld [vmem:[%s3031_s17] sm:$0xff]  ;;  %v3628_v11 = vld [vmem:[%s3031_s17 + $0x8] sm:$0xff]  ;;  %v3271_v56 = vpack.i.bf16 %v3076_v54, %v3077_v55  ;;  %s3034_s10 = sld [smem:[%s4734_s0 + %s3563_s7]]   ;;  %s3564_s11 = smov 10  }
   0xb   :  { %220 = vmatpush.msra.mxu0 %v196_v4  ;;  %v342_v15 = vld [vmem:[%s3616_s13] sm:$0xff]  ;;  %v3643_v16 = vld [vmem:[%s3035_s21 + $0x38] sm:$0xff]  ;;  %v164_v17 = vld [vmem:[%s3035_s21 + $0x30] sm:$0xff]  ;;  %s3039_s15 = sld [smem:[%s4734_s0 + %s3564_s11]]   ;;  %s3565_s16 = smov 8  }
   0xc   :  { %373 = vmatpush.msra.mxu3 %v344_v6  ;;  %405 = vrot.lane.b32.xlu1 %v3643_v16, %s3558_s26  ;;  %v3647_v18 = vld [vmem:[%s3035_s21 + $0x18] sm:$0xff]  ;;  %v163_v19 = vld [vmem:[%s3035_s21 + $0x28] sm:$0xff]  ;;  %v3653_v20 = vld [vmem:[%s3035_s21 + $0x10] sm:$0xff]  ;;  %s3786_s19 = sld [smem:[%s4734_s0 + %s3565_s16]]   ;;  %s3566_s20 = smov 7  }
   0xd   :  { %401 = vrot.lane.b32.xlu2 %v163_v19, %s3558_s26  ;;  %v3655_v21 = vld [vmem:[%s3035_s21] sm:$0xff]  ;;  %v159_v23 = vld [vmem:[%s3035_s21 + $0x8] sm:$0xff]  ;;  %s3791_s23 = sld [smem:[%s4734_s0 + %s3566_s20]]   ;;  %s3567_s24 = smov 11  }
   0xe   :  { %374 = vmatpush.msra.mxu3 %v343_v14  ;;  %v162_v22 = vld [vmem:[%s3035_s21 + $0x20] sm:$0xff]  ;;  %v177_v27 = vld [vmem:[%s3665_s30 + $0x8] sm:$0xff]  ;;  %s3040_s29 = sld [smem:[%s4734_s0 + %s3567_s24]]   ;;  %s3568_s2 = smov 15  }
   0xf   :  { %v176_v24 = vld [vmem:[%s3665_s30] sm:$0xff]  ;;  %v183_v52 = vld [vmem:[%s3712_s5 + $0x8] sm:$0xff]  ;;  %s3886_s7 = sld [smem:[%s4734_s0 + %s3568_s2]]   ;;  %s3569_s8 = smov 14  }
  0x10   :  { %188 = vperm.xlu0 %3269, %v3610_v3   ;;  %375 = vmatpush.msra.mxu3 %v342_v15  ;;  %v3396_v31 = vld [vmem:[%s3640_s25] ss:$0 sm:$0xff]  ;;  %v241_v58 = vld [vmem:[%s3034_s10 + $0x8] sm:$0xff]  ;;  %s3891_s11 = sld [smem:[%s4734_s0 + %s3569_s8]]   ;;  %s3570_s12 = smov 16  }
  0x11   :  { %v182_v50 = vld [vmem:[%s3712_s5] sm:$0xff]  ;;  %262 = vmatpush.msra.mxu1 %v241_v58  ;;  %s3900_s16 = sld [smem:[%s4734_s0 + %s3570_s12]]   ;;  %s3571_s17 = smov 17  }
  0x12   :  { %v240_v60 = vld [vmem:[%s3034_s10] sm:$0xff]  ;;  %s3929_s21 = sld [smem:[%s4734_s0 + %s3571_s17]]   ;;  %s3572_s22 = smov 18  }
  0x13   :  { %263 = vmatpush.msra.mxu1 %v240_v60  ;;  %v3836_v54 = vld [vmem:[%s3791_s23 + $0x10] sm:$0xff]  ;;  %v3843_v55 = vld [vmem:[%s3791_s23 + $0x8] sm:$0xff]  ;;  %s3941_s28 = sld [smem:[%s4734_s0 + %s3572_s22]]   ;;  %s3575_s8 = smov 20  }
  0x14   :  { %403 = vrot.lane.b32.xlu1 %v164_v17, %s3558_s26  ;;  %s3961_s12 = sld [smem:[%s4734_s0 + %s3575_s8]]   ;;  %s3576_s14 = smov 21  }
  0x15   :  { %399 = vrot.lane.b32.xlu2 %v162_v22, %s3558_s26  ;;  %s3967_s18 = sld [smem:[%s4734_s0 + %s3576_s14]]   ;;  %s3578_s22 = smov 23  }
  0x16   :  { %s3581_s8 = smov 9   ;;  %s3584_s27 = smov 27  }
  0x17   :  { %s3038_s14 = sld [smem:[%s4734_s0 + %s3581_s8]]  }
  0x18   :  { %397 = vrot.lane.b32.xlu0 %v3647_v18, %s3558_s26 }
  0x1c   :  { %395 = vrot.lane.b32.xlu1 %v3653_v20, %s3558_s26 }
  0x1d   :  { %393 = vrot.lane.b32.xlu2 %v159_v23, %s3558_s26 }
  0x20   :  { %391 = vrot.lane.b32.xlu0 %v3655_v21, %s3558_s26 }
  0x67   :  { %v3687_v36 = vpop.permute.xlu2 %401 }
  0x6f   :  { %v3702_v43 = vpop.permute.xlu2 %399 }
  0x77   :  { %v3723_v49 = vpop.permute.xlu2 %393 }
  0x7a   :  { %v186_v8 = vpop.permute.xlu0 %185 }
  0x7b   :  { %vm190_vm1 = vcmp.eq.s32.totalorder %v186_v8, %v3623_v7 }
  0x7c   :  { %v3068_v10 = vsel %vm190_vm1, 1.0, %v3555_v9 }
  0x7d   :  { %3070 = vmatmul.msk.f32.vlgmr.msra.gmra.mxu0 %vm198_vm0, %v3068_v10 }
  0x7e   :  { %v3678_v30 = vpop.permute.xlu1 %405 }
  0x82   :  { %v189_v12 = vpop.permute.xlu0 %188 }
  0x83   :  { %vm191_vm2 = vcmp.eq.s32.totalorder %v189_v12, %v3628_v11 }
  0x84   :  { %v3069_v13 = vsel %vm191_vm2, 1.0, %v3555_v9 }
  0x85   :  { %3071 = vmatmul.msk.f32.gmra.mxu0 %vm198_vm0, %v3069_v13 }
  0x86   :  { %v3683_v34 = vpop.permute.xlu1 %403 }
  0x8a   :  { %v3690_v37 = vpop.permute.xlu0 %397 }
  0x8e   :  { %v3705_v44 = vpop.permute.xlu1 %395 }
  0x92   :  { %v3707_v45 = vpop.permute.xlu0 %391 }
  0xfa   :  { %v222_v25 = vpop.f32.mrf.mxu0 }
  0xfb   :  { %v3669_v26 = vadd.f32 %v222_v25, %v176_v24 }
  0xfd   :  { %3080 = vmatmul.msk.f32.vlgmr.msra.gmra.mxu3 %vm353_vm3, %v3669_v26 }
 0x102   :  { %v225_v28 = vpop.f32.mrf.mxu0 }
 0x103   :  { %v3674_v29 = vadd.f32 %v225_v28, %v177_v27 }
 0x105   :  { %3081 = vmatmul.msk.f32.gmra.mxu3 %vm353_vm3, %v3674_v29 }
 0x180   :  { %v377_v32 = vpop.f32.mrf.mxu3 }
 0x181   :  { %v3681_v33 = vadd.f32 %v3396_v31, %v377_v32 }
 0x183   :  { %v421_v35 = vmul.f32 %v3683_v34, %v3681_v33  ;;  %v419_v46 = vmul.f32 %v3702_v43, %v3681_v33  ;;  %v417_v47 = vmul.f32 %v3705_v44, %v3681_v33  ;;  %v415_v48 = vmul.f32 %v3707_v45, %v3681_v33 }
 0x185   :  { %475 = vrot.lane.b32.xlu2 %v421_v35, %s3560_s1 }
 0x188   :  { %v380_v38 = vpop.f32.mrf.mxu3 }
 0x189   :  { %v3692_v39 = vadd.f32 %v3396_v31, %v380_v38  ;;  %v3794_v31 = vld [vmem:[%s3786_s19] sm:$0xff] }
 0x18b   :  { %v422_v40 = vmul.f32 %v3678_v30, %v3692_v39  ;;  %v420_v41 = vmul.f32 %v3687_v36, %v3692_v39  ;;  %v418_v42 = vmul.f32 %v3690_v37, %v3692_v39  ;;  %v416_v51 = vmul.f32 %v3723_v49, %v3692_v39 }
 0x18d   :  { %477 = vrot.lane.b32.xlu1 %v422_v40, %s3560_s1  ;;  %473 = vrot.lane.b32.xlu0 %v420_v41, %s3560_s1  ;;  %v3799_v40 = vld [vmem:[%s3791_s23 + $0x38] sm:$0xff]  ;;  %v3802_v41 = vld [vmem:[%s3791_s23 + $0x30] sm:$0xff] }
 0x18e   :  { %469 = vrot.lane.b32.xlu2 %v418_v42, %s3560_s1  ;;  %v3805_v42 = vld [vmem:[%s3786_s19 + $0x8] sm:$0xff]  ;;  %551 = vmatpush.msrb.mxu1 %v3799_v40 }
 0x18f   :  { %3210 = vmatpush.msrb.mxu3 %v3799_v40 }
 0x190   :  { %552 = vmatpush.msrb.mxu1 %v3802_v41 }
 0x191   :  { %3211 = vmatpush.msrb.mxu3 %v3802_v41 }
 0x195   :  { %471 = vrot.lane.b32.xlu1 %v419_v46, %s3560_s1  ;;  %467 = vrot.lane.b32.xlu0 %v417_v47, %s3560_s1 }
 0x196   :  { %463 = vrot.lane.b32.xlu2 %v415_v48, %s3560_s1 }
 0x19d   :  { %229 = vperm.xlu0 %3269, %v182_v50   ;;  %465 = vrot.lane.b32.xlu1 %v416_v51, %s3560_s1 }
 0x19e   :  { %232 = vperm.xlu2 %3270, %v183_v52  }
 0x1a6   :  { %437 = vrot.lane.b32.xlu2 %v3643_v16, %s3562_s6 }
 0x1ae   :  { %435 = vrot.lane.b32.xlu2 %v164_v17, %s3562_s6 }
 0x1b6   :  { %433 = vrot.lane.b32.xlu2 %v163_v19, %s3562_s6  ;;  %v280_v19 = vld [vmem:[%s3039_s15 + $0x8] sm:$0xff] }
 0x1be   :  { %431 = vrot.lane.b32.xlu2 %v162_v22, %s3562_s6 }
 0x1c6   :  { %429 = vrot.lane.b32.xlu2 %v3647_v18, %s3562_s6 }
 0x1ce   :  { %425 = vrot.lane.b32.xlu2 %v159_v23, %s3562_s6  ;;  %v279_v23 = vld [vmem:[%s3039_s15] sm:$0xff] }
 0x1d6   :  { %3272 = vperm.xlu2 %3270, %v3271_v56   ;;  %v3848_v56 = vld [vmem:[%s3791_s23] sm:$0xff] }
 0x1df   :  { %v476_v53 = vpop.permute.xlu2 %475 }
 0x1e8   :  { %v470_v57 = vpop.permute.xlu2 %469 }
 0x1f0   :  { %v464_v59 = vpop.permute.xlu2 %463 }
 0x1f8   :  { %v233_v61 = vpop.permute.xlu2 %232 }
 0x1f9   :  { %vm235_vm7 = vcmp.eq.s32.totalorder %v233_v61, %v3628_v11 }
 0x1fa   :  { %v3073_v13 = vsel %vm235_vm7, 1.0, %v3555_v9 }
 0x1ff   :  { %v478_v62 = vpop.permute.xlu1 %477  ;;  %v474_v63 = vpop.permute.xlu0 %473 }
 0x200   :  { %v3745_v1 = vpop.permute.xlu2 %437  ;;  %3082 = vmatpush.xpose.msk.msrb.mxu0 %vm353_vm3, %v478_v62 }
 0x201   :  { %v454_v5 = vmul.f32 %v3745_v1, %v3692_v39 }
 0x204   :  { %3083 = vmatpush.xpose.msk.msrb.mxu0 %vm353_vm3, %v476_v53  ;;  %v3823_v53 = vld [vmem:[%s3791_s23 + $0x28] sm:$0xff] }
 0x205   :  { %553 = vmatpush.msrb.mxu1 %v3823_v53  ;;  %3212 = vmatpush.msrb.mxu3 %v3823_v53 }
 0x207   :  { %v468_v2 = vpop.permute.xlu0 %467  ;;  %v472_v6 = vpop.permute.xlu1 %471 }
 0x208   :  { %v3749_v3 = vpop.permute.xlu2 %435  ;;  %3084 = vmatpush.xpose.msk.msrb.mxu0 %vm353_vm3, %v474_v63 }
 0x209   :  { %v453_v4 = vmul.f32 %v3749_v3, %v3681_v33 }
 0x20b   :  { %v3276_v8 = vpack.i.bf16 %v453_v4, %v454_v5 }
 0x20c   :  { %3085 = vmatpush.xpose.msk.msrb.mxu0 %vm353_vm3, %v472_v6 }
 0x20d   :  { %3277 = vrot.lane.b32.xlu2 %v3276_v8, %s3562_s6 }
 0x20f   :  { %v230_v10 = vpop.permute.xlu0 %229  ;;  %v466_v14 = vpop.permute.xlu1 %465 }
 0x210   :  { %vm234_vm6 = vcmp.eq.s32.totalorder %v230_v10, %v3623_v7  ;;  %3086 = vmatpush.xpose.msk.msrb.mxu0 %vm353_vm3, %v470_v57  ;;  %v3766_v15 = vpop.permute.xlu2 %433 }
 0x211   :  { %v3072_v12 = vsel %vm234_vm6, 1.0, %v3555_v9  ;;  %v452_v51 = vmul.f32 %v3766_v15, %v3692_v39 }
 0x212   :  { %3074 = vmatmul.msk.f32.vlgmr.msra.gmra.mxu1 %vm198_vm0, %v3072_v12 }
 0x214   :  { %3087 = vmatpush.xpose.msk.msrb.mxu0 %vm353_vm3, %v468_v2 }
 0x218   :  { %3088 = vmatpush.xpose.msk.msrb.mxu0 %vm353_vm3, %v466_v14  ;;  %v3772_v7 = vpop.permute.xlu2 %431 }
 0x219   :  { %v451_v50 = vmul.f32 %v3772_v7, %v3681_v33 }
 0x21a   :  { %3075 = vmatmul.msk.f32.gmra.mxu1 %vm198_vm0, %v3073_v13 }
 0x21b   :  { %v3281_v52 = vpack.i.bf16 %v451_v50, %v452_v51 }
 0x21c   :  { %3089 = vmatpush.xpose.msk.msrb.mxu0 %vm353_vm3, %v464_v59 }
 0x21f   :  { %3090 = vmatmul.msk.f32.vlgmr.msrb.gmra.mxu0 %vm353_vm3, %v3681_v33 }
 0x220   :  { %v3776_v11 = vpop.permute.xlu2 %429 }
 0x221   :  { %v450_v6 = vmul.f32 %v3776_v11, %v3692_v39 }
 0x227   :  { %3091 = vmatmul.msk.f32.gmra.mxu0 %vm353_vm3, %v3692_v39 }
 0x228   :  { %v3778_v9 = vpop.permute.xlu2 %425 }
 0x229   :  { %v448_v13 = vmul.f32 %v3778_v9, %v3692_v39 }
 0x230   :  { %v3273_v16 = vpop.permute.xlu2 %3272 }
 0x231   :  { %v3274_v17 = vunpack.i.l.bf16 %v3273_v16  ;;  %v3275_v18 = vunpack.i.h.bf16 %v3273_v16 }
 0x233   :  { %v292_v22 = vmul.f32 %v3274_v17, %v280_v19  ;;  %v291_v24 = vmul.f32 %v3275_v18, %v279_v23  ;;  %v277_v19 = vld [vmem:[%s3040_s29] sm:$0xff] }
 0x235   :  { %313 = vmatpush.msra.mxu2 %v292_v22 }
 0x237   :  { %314 = vmatpush.msra.mxu2 %v291_v24 }
 0x238   :  { %3078 = vmatmul.msk.f32.vlgmr.msra.gmra.mxu2 %vm198_vm0, %v277_v19 }
 0x267   :  { %v3278_v25 = vpop.permute.xlu2 %3277 }
 0x268   :  { %v3279_v27 = vunpack.i.l.bf16 %v3278_v25  ;;  %v3280_v28 = vunpack.i.h.bf16 %v3278_v25 }
 0x26a   :  { %642 = vmatpush.msrb.mxu2 %v3279_v27 }
 0x26c   :  { %643 = vmatpush.msrb.mxu2 %v3280_v28 }
 0x28f   :  { %v3876_v39 = vpop.f32.mrf.mxu1 }
 0x297   :  { %v3878_v22 = vpop.f32.mrf.mxu1 }
 0x29c   :  { %v518_v32 = vpop.f32.mrf.mxu0 }
 0x29d   :  { %v519_v35 = vadd.f32 %v518_v32, %v3794_v31 }
 0x29f   :  { %v525_v38 = vsel %vm524_vm8, %v519_v35, -inf }
 0x2a0   :  { %526 = vmax.xlane.f32.xlu1 %v525_v38 }
 0x2a4   :  { %v521_v46 = vpop.f32.mrf.mxu0 }
 0x2a5   :  { %v522_v47 = vadd.f32 %v521_v46, %v3805_v42 }
 0x2a7   :  { %v528_v48 = vsel %vm524_vm8, %v522_v47, -inf }
 0x2a8   :  { %529 = vmax.xlane.f32.xlu0 %v528_v48 }
 0x2b9   :  { %427 = vrot.lane.b32.xlu1 %v3653_v20, %s3562_s6  ;;  %v3828_v20 = vld [vmem:[%s3791_s23 + $0x20] sm:$0xff] }
 0x2ba   :  { %554 = vmatpush.msrb.mxu1 %v3828_v20  ;;  %3213 = vmatpush.msrb.mxu3 %v3828_v20 }
 0x2bc   :  { %423 = vrot.lane.b32.xlu0 %v3655_v21, %s3562_s6  ;;  %v3833_v21 = vld [vmem:[%s3791_s23 + $0x18] sm:$0xff] }
 0x2bd   :  { %555 = vmatpush.msrb.mxu1 %v3833_v21  ;;  %3214 = vmatpush.msrb.mxu3 %v3833_v21 }
 0x2bf   :  { %556 = vmatpush.msrb.mxu1 %v3836_v54  ;;  %3215 = vmatpush.msrb.mxu3 %v3836_v54 }
 0x2c1   :  { %3282 = vrot.lane.b32.xlu1 %v3281_v52, %s3562_s6  ;;  %557 = vmatpush.msrb.mxu1 %v3843_v55 }
 0x2c2   :  { %3216 = vmatpush.msrb.mxu3 %v3843_v55 }
 0x2c3   :  { %558 = vmatpush.msrb.mxu1 %v3848_v56 }
 0x2c4   :  { %3217 = vmatpush.msrb.mxu3 %v3848_v56 }
 0x313   :  { %v527_v57 = vpop.xlane.xlu1 %526 }
 0x314   :  { %v531_v58 = vsub.f32 %v519_v35, %v527_v57 }
 0x316   :  { %v533_v59 = vmul.f32 1.442695, %v531_v58 }
 0x318   :  { %3437 = vpow2.f32 %v533_v59 }
 0x31b   :  { %v530_v60 = vpop.xlane.xlu0 %529 }
 0x31c   :  { %v532_v61 = vsub.f32 %v522_v47, %v530_v60 }
 0x31e   :  { %v3438_v62 = vpop.eup %3437  ;;  %v535_v63 = vmul.f32 1.442695, %v532_v61 }
 0x31f   :  { %3092 = vmatmul.msk.f32.vlgmr.msrb.gmra.mxu1 %vm524_vm8, %v3438_v62 }
 0x320   :  { %3439 = vpow2.f32 %v535_v63 }
 0x326   :  { %v3853_v2 = vpop.eup %3439 }
 0x327   :  { %3093 = vmatmul.msk.f32.vlgmr.msrb.gmra.mxu3 %vm524_vm8, %v3853_v2 }
 0x32b   :  { %v3857_v4 = vpop.permute.xlu1 %427 }
 0x32c   :  { %v449_v5 = vmul.f32 %v3857_v4, %v3681_v33 }
 0x32e   :  { %v3863_v8 = vpop.permute.xlu0 %423  ;;  %v3286_v10 = vpack.i.bf16 %v449_v5, %v450_v6 }
 0x32f   :  { %v447_v12 = vmul.f32 %v3863_v8, %v3681_v33  ;;  %v278_v33 = vld [vmem:[%s3040_s29 + $0x8] sm:$0xff]  ;;  %s3574_s29 = smov 19  }
 0x330   :  { %3287 = vrot.lane.b32.xlu0 %v3286_v10, %s3562_s6  ;;  %3079 = vmatmul.msk.f32.gmra.mxu2 %vm198_vm0, %v278_v33  ;;  %v348_v33 = vld [vmem:[%s3891_s11 + $0x8] sm:$0xff]  ;;  %s3955_s4 = sld [smem:[%s4734_s0 + %s3574_s29]]  }
 0x331   :  { %v3291_v14 = vpack.i.bf16 %v447_v12, %v448_v13  ;;  %s4069_s29 = sld [smem:[%s4734_s0 + %s3578_s22]]  }
 0x333   :  { %v3283_v16 = vpop.permute.xlu1 %3282  ;;  %3292 = vrot.lane.b32.xlu2 %v3291_v14, %s3562_s6 }
 0x334   :  { %v3284_v17 = vunpack.i.l.bf16 %v3283_v16  ;;  %v3285_v18 = vunpack.i.h.bf16 %v3283_v16 }
 0x336   :  { %644 = vmatpush.msrb.mxu2 %v3284_v17 }
 0x338   :  { %645 = vmatpush.msrb.mxu2 %v3285_v18 }
 0x38d   :  { %v3293_v28 = vpop.permute.xlu2 %3292 }
 0x38e   :  { %v3294_v47 = vunpack.i.l.bf16 %v3293_v28  ;;  %v3295_v51 = vunpack.i.h.bf16 %v3293_v28 }
 0x39c   :  { %v560_v23 = vpop.f32.mrf.mxu1 }
 0x39d   :  { %3441 = vrcp.f32 %v560_v23  ;;  %v577_v46 = vand.u32 2147483648, %v560_v23  ;;  %v575_v50 = vand.u32 2147483647, %v560_v23  ;;  %vm571_vm10 = vweird.f32 %v560_v23 }
 0x39f   :  { %v578_v58 = vor.u32 1.1754944e-38, %v577_v46  ;;  %vm576_vm12 = vcmp.eq.f32.partialorder %v575_v50, 8.507059e+37  ;;  %v3397_v50 = vld [vmem:[%s3886_s7] ss:$0 sm:$0xff] }
 0x3a2   :  { %v3288_v24 = vpop.permute.xlu0 %3287 }
 0x3a3   :  { %v3442_v25 = vpop.eup %3441  ;;  %v3289_v27 = vunpack.i.l.bf16 %v3288_v24  ;;  %v3290_v35 = vunpack.i.h.bf16 %v3288_v24  ;;  %v3902_v24 = vpop.f32.mrf.mxu2 }
 0x3a4   :  { %v567_v32 = vmul.f32 %v3442_v25, %v560_v23  ;;  %vm572_vm9 = vweird.f32 %v3442_v25  ;;  %v347_v23 = vld [vmem:[%s3891_s11] sm:$0xff]  ;;  %vm322_vm1 = vcmp.gt.f32.partialorder %v3902_v24, 0.5 }
 0x3a5   :  { %646 = vmatpush.msrb.mxu2 %v3289_v27  ;;  %vm573_vm11 = vmor %vm571_vm10, %vm572_vm9  ;;  %v752_v27 = vld [vmem:[%s3900_s16 + $0x10] sm:$0xff] }
 0x3a6   :  { %v568_v38 = vsub.f32 1.0, %v567_v32 }
 0x3a7   :  { %647 = vmatpush.msrb.mxu2 %v3290_v35 }
 0x3a8   :  { %v569_v48 = vmul.f32 %v3442_v25, %v568_v38 }
 0x3a9   :  { %648 = vmatpush.msrb.mxu2 %v3294_v47  ;;  %v751_v47 = vld [vmem:[%s3900_s16 + $0x8] sm:$0xff] }
 0x3aa   :  { %v570_v52 = vadd.f32 %v3442_v25, %v569_v48  ;;  %v563_v57 = vpop.f32.mrf.mxu3  ;;  %v750_v48 = vld [vmem:[%s3900_s16] sm:$0xff] }
 0x3ab   :  { %3443 = vrcp.f32 %v563_v57  ;;  %649 = vmatpush.msrb.mxu2 %v3295_v51  ;;  %v592_v10 = vand.u32 2147483648, %v563_v57  ;;  %v590_v13 = vand.u32 2147483647, %v563_v57  ;;  %vm586_vm14 = vweird.f32 %v563_v57 }
 0x3ac   :  { %v574_v59 = vsel %vm573_vm11, %v3442_v25, %v570_v52  ;;  %v753_v25 = vld [vmem:[%s3900_s16 + $0x18] sm:$0xff] }
 0x3ad   :  { %v579_v60 = vsel %vm576_vm12, %v578_v58, %v574_v59  ;;  %v593_v16 = vor.u32 1.1754944e-38, %v592_v10  ;;  %vm591_vm0 = vcmp.eq.f32.partialorder %v590_v13, 8.507059e+37  ;;  %779 = vmatpush.msra.mxu1 %v753_v25  ;;  %v755_v10 = vld [vmem:[%s3941_s28] sm:$0xff] }
 0x3ae   :  { %v580_v61 = vmul.f32 %v3438_v62, %v579_v60  ;;  %v350_v62 = vld [vmem:[%s3891_s11 + $0x18] sm:$0xff] }
 0x3af   :  { %678 = vmatpush.msra.mxu3 %v350_v62  ;;  %780 = vmatpush.msra.mxu1 %v752_v27 }
 0x3b0   :  { %3094 = vmatmul.msk.f32.vlgmr.msrb.gmra.mxu2 %vm524_vm8, %v580_v61 }
 0x3b1   :  { %v3444_v63 = vpop.eup %3443  ;;  %781 = vmatpush.msra.mxu1 %v751_v47 }
 0x3b2   :  { %v582_v5 = vmul.f32 %v3444_v63, %v563_v57  ;;  %vm587_vm13 = vweird.f32 %v3444_v63 }
 0x3b3   :  { %vm588_vm15 = vmor %vm586_vm14, %vm587_vm13  ;;  %v3906_v28 = vpop.f32.mrf.mxu2  ;;  %782 = vmatpush.msra.mxu1 %v750_v48 }
 0x3b4   :  { %v583_v6 = vsub.f32 1.0, %v582_v5  ;;  %vm323_vm2 = vcmp.gt.f32.partialorder %v3906_v28, 0.5  ;;  %v3573_v5 = vmov 32.0  }
 0x3b5   :  { %1027 = vmatpush.msrb.mxu1 %v3799_v40  ;;  %3445 = vrcp.f32 %v3573_v5 }
 0x3b6   :  { %v584_v12 = vmul.f32 %v3444_v63, %v583_v6  ;;  %v757_v6 = vld [vmem:[%s3941_s28 + $0x10] sm:$0xff] }
 0x3b7   :  { %1028 = vmatpush.msrb.mxu1 %v3802_v41 }
 0x3b8   :  { %v585_v14 = vadd.f32 %v3444_v63, %v584_v12 }
 0x3b9   :  { %1029 = vmatpush.msrb.mxu1 %v3823_v53 }
 0x3ba   :  { %v589_v17 = vsel %vm588_vm15, %v3444_v63, %v585_v14 }
 0x3bb   :  { %v594_v18 = vsel %vm591_vm0, %v593_v16, %v589_v17  ;;  %1030 = vmatpush.msrb.mxu1 %v3828_v20  ;;  %v3446_v12 = vpop.eup %3445 }
 0x3bc   :  { %v595_v19 = vmul.f32 %v3853_v2, %v594_v18  ;;  %v349_v2 = vld [vmem:[%s3891_s11 + $0x10] sm:$0xff]  ;;  %v700_v13 = vmul.f32 32.0, %v3446_v12  ;;  %vm704_vm4 = vweird.f32 %v3446_v12 }
 0x3bd   :  { %679 = vmatpush.msra.mxu3 %v349_v2  ;;  %1031 = vmatpush.msrb.mxu1 %v3833_v21 }
 0x3be   :  { %3095 = vmatmul.msk.f32.gmra.mxu2 %vm524_vm8, %v595_v19  ;;  %v701_v14 = vsub.f32 1.0, %v700_v13 }
 0x3bf   :  { %680 = vmatpush.msra.mxu3 %v348_v33  ;;  %1032 = vmatpush.msrb.mxu1 %v3836_v54  ;;  %v3398_v33 = vld [vmem:[%s3929_s21] ss:$0 sm:$0xff] }
 0x3c0   :  { %v702_v16 = vmul.f32 %v3446_v12, %v701_v14  ;;  %v3400_v14 = vld [vmem:[%s3961_s12] ss:$0 sm:$0xff] }
 0x3c1   :  { %681 = vmatpush.msra.mxu3 %v347_v23  ;;  %1033 = vmatpush.msrb.mxu1 %v3843_v55 }
 0x3c2   :  { %v703_v17 = vadd.f32 %v3446_v12, %v702_v16 }
 0x3c3   :  { %1034 = vmatpush.msrb.mxu1 %v3848_v56 }
 0x3c4   :  { %v3947_v18 = vsel %vm704_vm4, %v3446_v12, %v703_v17  ;;  %v3399_v17 = vld [vmem:[%s3955_s4] ss:$0 sm:$0xff] }
 0x433   :  { %v651_v32 = vpop.f32.mrf.mxu2 }
 0x434   :  { %v657_v35 = vsel %vm322_vm1, -1e+09, %v651_v32 }
 0x435   :  { %3096 = vmatmul.msk.f32.vlgmr.msra.gmra.mxu3 %vm353_vm3, %v657_v35 }
 0x441   :  { %v654_v38 = vpop.f32.mrf.mxu2 }
 0x442   :  { %v658_v46 = vsel %vm323_vm2, -1e+09, %v654_v38 }
 0x443   :  { %3097 = vmatmul.msk.f32.gmra.mxu3 %vm353_vm3, %v658_v46 }
 0x4b8   :  { %v683_v51 = vpop.f32.mrf.mxu3 }
 0x4b9   :  { %v684_v52 = vadd.f32 %v3397_v50, %v683_v51 }
 0x4bb   :  { %3098 = vmatmul.msk.f32.vlgmr.msra.gmra.mxu1 %vm353_vm3, %v684_v52  ;;  %v689_v57 = vadd.f32 %v684_v52, %v3669_v26  ;;  %v758_v26 = vld [vmem:[%s3941_s28 + $0x18] sm:$0xff] }
 0x4bc   :  { %811 = vmatpush.msra.mxu2 %v758_v26 }
 0x4bd   :  { %v693_v58 = vsel %vm353_vm3, %v689_v57, 0.0 }
 0x4be   :  { %694 = vadd.xlane.f32.xlu1 %v693_v58  ;;  %812 = vmatpush.msra.mxu2 %v757_v6 }
 0x4c6   :  { %v686_v59 = vpop.f32.mrf.mxu3 }
 0x4c7   :  { %v687_v60 = vadd.f32 %v3397_v50, %v686_v59 }
 0x4c9   :  { %3099 = vmatmul.msk.f32.gmra.mxu1 %vm353_vm3, %v687_v60  ;;  %v690_v61 = vadd.f32 %v687_v60, %v3674_v29  ;;  %v756_v29 = vld [vmem:[%s3941_s28 + $0x8] sm:$0xff] }
 0x4ca   :  { %813 = vmatpush.msra.mxu2 %v756_v29 }
 0x4cb   :  { %v696_v63 = vsel %vm353_vm3, %v690_v61, 0.0 }
 0x4cc   :  { %697 = vadd.xlane.f32.xlu0 %v696_v63  ;;  %814 = vmatpush.msra.mxu2 %v755_v10 }
 0x531   :  { %v695_v19 = vpop.xlane.xlu1 %694 }
 0x532   :  { %v706_v62 = vmul.f32 %v3947_v18, %v695_v19 }
 0x534   :  { %v708_v2 = vsub.f32 %v689_v57, %v706_v62  ;;  %v3401_v62 = vld [vmem:[%s3967_s18] ss:$0 sm:$0xff] }
 0x536   :  { %v710_v23 = vmul.f32 %v708_v2, %v708_v2 }
 0x538   :  { %v784_v25 = vpop.f32.mrf.mxu1  ;;  %v712_v27 = vsel %vm353_vm3, %v710_v23, 0.0 }
 0x539   :  { %v785_v32 = vadd.f32 %v3398_v33, %v784_v25  ;;  %713 = vadd.xlane.f32.xlu2 %v712_v27 }
 0x53b   :  { %v790_v35 = vmax.f32 %v785_v32, 0.0 }
 0x53d   :  { %3100 = vmatmul.msk.f32.vlgmr.msra.gmra.mxu2 %vm353_vm3, %v790_v35 }
 0x53f   :  { %v698_v38 = vpop.xlane.xlu0 %697 }
 0x540   :  { %v707_v46 = vmul.f32 %v3947_v18, %v698_v38 }
 0x542   :  { %v709_v47 = vsub.f32 %v690_v61, %v707_v46 }
 0x544   :  { %v711_v48 = vmul.f32 %v709_v47, %v709_v47 }
 0x546   :  { %v787_v50 = vpop.f32.mrf.mxu1  ;;  %v715_v51 = vsel %vm353_vm3, %v711_v48, 0.0 }
 0x547   :  { %v788_v52 = vadd.f32 %v3398_v33, %v787_v50  ;;  %716 = vadd.xlane.f32.xlu1 %v715_v51 }
 0x549   :  { %v791_v57 = vmax.f32 %v788_v52, 0.0 }
 0x54b   :  { %3101 = vmatmul.msk.f32.gmra.mxu2 %vm353_vm3, %v791_v57 }
 0x5ac   :  { %v714_v58 = vpop.xlane.xlu2 %713 }
 0x5ad   :  { %v718_v59 = vmul.f32 %v714_v58, %v3947_v18 }
 0x5af   :  { %v720_v60 = vadd.f32 1e-05, %v718_v59 }
 0x5b1   :  { %3447 = vrsqrt.f32 %v720_v60  ;;  %vm728_vm6 = vweird.f32 %v720_v60 }
 0x5b7   :  { %v3448_v63 = vpop.eup %3447 }
 0x5b8   :  { %v723_v26 = vmul.f32 %v3448_v63, %v720_v60  ;;  %vm729_vm5 = vweird.f32 %v3448_v63 }
 0x5b9   :  { %vm730_vm7 = vmor %vm728_vm6, %vm729_vm5 }
 0x5ba   :  { %v724_v61 = vmul.f32 %v3448_v63, %v723_v26  ;;  %v717_v5 = vpop.xlane.xlu1 %716 }
 0x5bb   :  { %v719_v6 = vmul.f32 %v717_v5, %v3947_v18 }
 0x5bc   :  { %v725_v29 = vmul.f32 0.5, %v724_v61 }
 0x5bd   :  { %v721_v10 = vadd.f32 1e-05, %v719_v6 }
 0x5be   :  { %v726_v12 = vsub.f32 1.5, %v725_v29 }
 0x5bf   :  { %3449 = vrsqrt.f32 %v721_v10  ;;  %vm738_vm10 = vweird.f32 %v721_v10 }
 0x5c0   :  { %v727_v13 = vmul.f32 %v3448_v63, %v726_v12  ;;  %v816_v33 = vpop.f32.mrf.mxu2 }
 0x5c1   :  { %v817_v32 = vadd.f32 %v3399_v17, %v816_v33  ;;  %v877_v33 = vld [vmem:[%s3616_s13 + $0x28] sm:$0xff] }
 0x5c2   :  { %v731_v16 = vsel %vm730_vm7, %v3448_v63, %v727_v13 }
 0x5c3   :  { %v742_v19 = vmul.f32 %v731_v16, %v708_v2 }
 0x5c5   :  { %v3450_v23 = vpop.eup %3449  ;;  %v745_v25 = vmul.f32 %v3400_v14, %v742_v19  ;;  %v879_v19 = vld [vmem:[%s3616_s13 + $0x38] sm:$0xff] }
 0x5c6   :  { %v733_v27 = vmul.f32 %v3450_v23, %v721_v10  ;;  %vm739_vm9 = vweird.f32 %v3450_v23  ;;  %905 = vmatpush.msrb.mxu3 %v879_v19 }
 0x5c7   :  { %v748_v35 = vadd.f32 %v3401_v62, %v745_v25  ;;  %vm740_vm11 = vmor %vm738_vm10, %vm739_vm9 }
 0x5c8   :  { %v734_v38 = vmul.f32 %v3450_v23, %v733_v27 }
 0x5c9   :  { %v822_v46 = vadd.f32 %v817_v32, %v748_v35 }
 0x5ca   :  { %v735_v48 = vmul.f32 0.5, %v734_v38 }
 0x5cb   :  { %v826_v50 = vsel %vm353_vm3, %v822_v46, 0.0 }
 0x5cc   :  { %v736_v51 = vsub.f32 1.5, %v735_v48  ;;  %827 = vadd.xlane.f32.xlu0 %v826_v50 }
 0x5ce   :  { %v737_v52 = vmul.f32 %v3450_v23, %v736_v51  ;;  %v819_v58 = vpop.f32.mrf.mxu2 }
 0x5cf   :  { %v820_v60 = vadd.f32 %v3399_v17, %v819_v58  ;;  %v3402_v58 = vld [vmem:[%s3961_s12 + $0x1] ss:$0 sm:$0xff] }
 0x5d0   :  { %v741_v57 = vsel %vm740_vm11, %v3450_v23, %v737_v52  ;;  %v876_v23 = vld [vmem:[%s3616_s13 + $0x20] sm:$0xff] }
 0x5d1   :  { %v743_v2 = vmul.f32 %v741_v57, %v709_v47 }
 0x5d3   :  { %v746_v59 = vmul.f32 %v3400_v14, %v743_v2 }
 0x5d5   :  { %v749_v63 = vadd.f32 %v3401_v62, %v746_v59  ;;  %v878_v62 = vld [vmem:[%s3616_s13 + $0x30] sm:$0xff]  ;;  %s3577_s13 = smov 22  }
 0x5d6   :  { %906 = vmatpush.msrb.mxu3 %v878_v62  ;;  %v3404_v62 = vld [vmem:[%s3640_s25 + $0x1] ss:$0 sm:$0xff]  ;;  %s4052_s20 = sld [smem:[%s4734_s0 + %s3577_s13]]   ;;  %s3583_s25 = smov 35  }
 0x5d7   :  { %v823_v26 = vadd.f32 %v820_v60, %v749_v63  ;;  %v3403_v63 = vld [vmem:[%s3967_s18 + $0x1] ss:$0 sm:$0xff]  ;;  %s4312_s24 = sld [smem:[%s4734_s0 + %s3583_s25]]   ;;  %s3588_s25 = smov 31  }
 0x5d8   :  { %907 = vmatpush.msrb.mxu3 %v877_v33 }
 0x5d9   :  { %v829_v61 = vsel %vm353_vm3, %v823_v26, 0.0 }
 0x5da   :  { %830 = vadd.xlane.f32.xlu2 %v829_v61  ;;  %908 = vmatpush.msrb.mxu3 %v876_v23 }
 0x63f   :  { %v828_v5 = vpop.xlane.xlu0 %827 }
 0x640   :  { %v832_v6 = vmul.f32 %v828_v5, %v3947_v18 }
 0x642   :  { %v834_v29 = vsub.f32 %v822_v46, %v832_v6 }
 0x644   :  { %v836_v10 = vmul.f32 %v834_v29, %v834_v29 }
 0x646   :  { %v838_v12 = vsel %vm353_vm3, %v836_v10, 0.0 }
 0x647   :  { %839 = vadd.xlane.f32.xlu1 %v838_v12 }
 0x64d   :  { %v831_v47 = vpop.xlane.xlu2 %830 }
 0x64e   :  { %v833_v13 = vmul.f32 %v831_v47, %v3947_v18 }
 0x650   :  { %v835_v14 = vsub.f32 %v823_v26, %v833_v13 }
 0x652   :  { %v837_v16 = vmul.f32 %v835_v14, %v835_v14 }
 0x654   :  { %v841_v17 = vsel %vm353_vm3, %v837_v16, 0.0 }
 0x655   :  { %842 = vadd.xlane.f32.xlu0 %v841_v17 }
 0x6ba   :  { %v840_v25 = vpop.xlane.xlu1 %839 }
 0x6bb   :  { %v844_v27 = vmul.f32 %v840_v25, %v3947_v18 }
 0x6bd   :  { %v846_v32 = vadd.f32 1e-05, %v844_v27 }
 0x6bf   :  { %3451 = vrsqrt.f32 %v846_v32  ;;  %vm854_vm13 = vweird.f32 %v846_v32 }
 0x6c5   :  { %v3452_v35 = vpop.eup %3451 }
 0x6c6   :  { %v849_v38 = vmul.f32 %v3452_v35, %v846_v32  ;;  %vm855_vm12 = vweird.f32 %v3452_v35 }
 0x6c7   :  { %vm856_vm14 = vmor %vm854_vm13, %vm855_vm12 }
 0x6c8   :  { %v850_v46 = vmul.f32 %v3452_v35, %v849_v38  ;;  %v843_v48 = vpop.xlane.xlu0 %842 }
 0x6c9   :  { %v845_v50 = vmul.f32 %v843_v48, %v3947_v18 }
 0x6ca   :  { %v851_v51 = vmul.f32 0.5, %v850_v46 }
 0x6cb   :  { %v847_v52 = vadd.f32 1e-05, %v845_v50 }
 0x6cc   :  { %v852_v57 = vsub.f32 1.5, %v851_v51 }
 0x6cd   :  { %3453 = vrsqrt.f32 %v847_v52  ;;  %vm864_vm0 = vweird.f32 %v847_v52 }
 0x6ce   :  { %v853_v2 = vmul.f32 %v3452_v35, %v852_v57 }
 0x6d0   :  { %v857_v59 = vsel %vm856_vm14, %v3452_v35, %v853_v2 }
 0x6d1   :  { %v868_v60 = vmul.f32 %v857_v59, %v834_v29 }
 0x6d3   :  { %v3454_v26 = vpop.eup %3453  ;;  %v871_v61 = vmul.f32 %v3402_v58, %v868_v60 }
 0x6d4   :  { %v859_v5 = vmul.f32 %v3454_v26, %v847_v52  ;;  %vm865_vm15 = vweird.f32 %v3454_v26 }
 0x6d5   :  { %v3990_v6 = vadd.f32 %v3403_v63, %v871_v61  ;;  %vm866_vm4 = vmor %vm864_vm0, %vm865_vm15 }
 0x6d6   :  { %v860_v10 = vmul.f32 %v3454_v26, %v859_v5 }
 0x6d7   :  { %3102 = vmatmul.msk.f32.vlgmr.msrb.gmra.mxu3 %vm353_vm3, %v3990_v6 }
 0x6d8   :  { %v861_v12 = vmul.f32 0.5, %v860_v10 }
 0x6da   :  { %v862_v47 = vsub.f32 1.5, %v861_v12 }
 0x6dc   :  { %v863_v13 = vmul.f32 %v3454_v26, %v862_v47 }
 0x6de   :  { %v867_v16 = vsel %vm866_vm4, %v3454_v26, %v863_v13 }
 0x6df   :  { %v869_v17 = vmul.f32 %v867_v16, %v835_v14 }
 0x6e1   :  { %v872_v29 = vmul.f32 %v3402_v58, %v869_v17 }
 0x6e3   :  { %v3994_v19 = vadd.f32 %v3403_v63, %v872_v29 }
 0x6e5   :  { %3103 = vmatmul.msk.f32.gmra.mxu3 %vm353_vm3, %v3994_v19 }
 0x75a   :  { %v910_v33 = vpop.f32.mrf.mxu3 }
 0x75b   :  { %v911_v23 = vadd.f32 %v3404_v62, %v910_v33 }
 0x75d   :  { %v922_v25 = vmul.f32 %v911_v23, %v3683_v34  ;;  %v918_v27 = vmul.f32 %v911_v23, %v3705_v44  ;;  %v920_v46 = vmul.f32 %v911_v23, %v3702_v43  ;;  %v916_v50 = vmul.f32 %v911_v23, %v3707_v45 }
 0x75e   :  { %v930_v57 = vmul.f32 %v911_v23, %v3749_v3  ;;  %v928_v59 = vmul.f32 %v911_v23, %v3772_v7  ;;  %v926_v26 = vmul.f32 %v911_v23, %v3857_v4  ;;  %v924_v10 = vmul.f32 %v911_v23, %v3863_v8 }
 0x75f   :  { %952 = vrot.lane.b32.xlu1 %v922_v25, %s3560_s1 }
 0x767   :  { %944 = vrot.lane.b32.xlu1 %v918_v27, %s3560_s1 }
 0x768   :  { %v913_v32 = vpop.f32.mrf.mxu3 }
 0x769   :  { %v914_v35 = vadd.f32 %v3404_v62, %v913_v32 }
 0x76b   :  { %v923_v14 = vmul.f32 %v914_v35, %v3678_v30  ;;  %v921_v38 = vmul.f32 %v914_v35, %v3687_v36  ;;  %v919_v48 = vmul.f32 %v914_v35, %v3690_v37  ;;  %v917_v51 = vmul.f32 %v914_v35, %v3723_v49 }
 0x76c   :  { %v931_v52 = vmul.f32 %v914_v35, %v3745_v1  ;;  %v929_v58 = vmul.f32 %v914_v35, %v3766_v15  ;;  %v927_v63 = vmul.f32 %v914_v35, %v3776_v11  ;;  %v925_v5 = vmul.f32 %v914_v35, %v3778_v9 }
 0x76d   :  { %954 = vrot.lane.b32.xlu2 %v923_v14, %s3560_s1  ;;  %950 = vrot.lane.b32.xlu0 %v921_v38, %s3560_s1 }
 0x76e   :  { %v3296_v2 = vpack.i.bf16 %v930_v57, %v931_v52  ;;  %v3301_v60 = vpack.i.bf16 %v928_v59, %v929_v58  ;;  %v3306_v61 = vpack.i.bf16 %v926_v26, %v927_v63  ;;  %v3311_v12 = vpack.i.bf16 %v924_v10, %v925_v5 }
 0x775   :  { %948 = vrot.lane.b32.xlu2 %v920_v46, %s3560_s1  ;;  %946 = vrot.lane.b32.xlu0 %v919_v48, %s3560_s1 }
 0x77d   :  { %940 = vrot.lane.b32.xlu0 %v916_v50, %s3560_s1  ;;  %942 = vrot.lane.b32.xlu2 %v917_v51, %s3560_s1 }
 0x785   :  { %3297 = vrot.lane.b32.xlu0 %v3296_v2, %s3562_s6 }
 0x78d   :  { %3302 = vrot.lane.b32.xlu0 %v3301_v60, %s3562_s6 }
 0x795   :  { %3307 = vrot.lane.b32.xlu0 %v3306_v61, %s3562_s6 }
 0x79d   :  { %3312 = vrot.lane.b32.xlu0 %v3311_v12, %s3562_s6 }
 0x7c7   :  { %v955_v47 = vpop.permute.xlu2 %954 }
 0x7c8   :  { %3104 = vmatpush.xpose.msk.msra.mxu0 %vm353_vm3, %v955_v47 }
 0x7cf   :  { %v949_v17 = vpop.permute.xlu2 %948 }
 0x7d1   :  { %v953_v13 = vpop.permute.xlu1 %952 }
 0x7d2   :  { %3105 = vmatpush.xpose.msk.msra.mxu0 %vm353_vm3, %v953_v13 }
 0x7d7   :  { %v943_v33 = vpop.permute.xlu2 %942 }
 0x7d9   :  { %v945_v62 = vpop.permute.xlu1 %944 }
 0x7df   :  { %v951_v16 = vpop.permute.xlu0 %950 }
 0x7e0   :  { %3106 = vmatpush.xpose.msk.msra.mxu0 %vm353_vm3, %v951_v16 }
 0x7e4   :  { %3107 = vmatpush.xpose.msk.msra.mxu0 %vm353_vm3, %v949_v17  ;;  %v883_v17 = vld [vmem:[%s3891_s11 + $0x30] sm:$0xff] }
 0x7e7   :  { %v947_v29 = vpop.permute.xlu0 %946 }
 0x7e8   :  { %3108 = vmatpush.xpose.msk.msra.mxu0 %vm353_vm3, %v947_v29  ;;  %v882_v29 = vld [vmem:[%s3891_s11 + $0x28] sm:$0xff] }
 0x7ec   :  { %3109 = vmatpush.xpose.msk.msra.mxu0 %vm353_vm3, %v945_v62 }
 0x7ef   :  { %v941_v25 = vpop.permute.xlu0 %940 }
 0x7f0   :  { %3110 = vmatpush.xpose.msk.msra.mxu0 %vm353_vm3, %v943_v33  ;;  %v881_v33 = vld [vmem:[%s3891_s11 + $0x20] sm:$0xff] }
 0x7f4   :  { %3111 = vmatpush.xpose.msk.msra.mxu0 %vm353_vm3, %v941_v25 }
 0x7f7   :  { %v3298_v27 = vpop.permute.xlu0 %3297  ;;  %3112 = vmatmul.msk.f32.vlgmr.msra.gmra.mxu0 %vm353_vm3, %v911_v23 }
 0x7f8   :  { %v3299_v32 = vunpack.i.l.bf16 %v3298_v27  ;;  %v3300_v14 = vunpack.i.h.bf16 %v3298_v27 }
 0x7fa   :  { %1118 = vmatpush.msrb.mxu2 %v3299_v32 }
 0x7fc   :  { %1119 = vmatpush.msrb.mxu2 %v3300_v14 }
 0x7ff   :  { %v3303_v38 = vpop.permute.xlu0 %3302  ;;  %3113 = vmatmul.msk.f32.gmra.mxu0 %vm353_vm3, %v914_v35 }
 0x800   :  { %v3304_v46 = vunpack.i.l.bf16 %v3303_v38  ;;  %v3305_v48 = vunpack.i.h.bf16 %v3303_v38 }
 0x802   :  { %1120 = vmatpush.msrb.mxu2 %v3304_v46 }
 0x804   :  { %1121 = vmatpush.msrb.mxu2 %v3305_v48 }
 0x807   :  { %v3308_v50 = vpop.permute.xlu0 %3307 }
 0x808   :  { %v3309_v51 = vunpack.i.l.bf16 %v3308_v50  ;;  %v3310_v52 = vunpack.i.h.bf16 %v3308_v50 }
 0x80a   :  { %1122 = vmatpush.msrb.mxu2 %v3309_v51 }
 0x80c   :  { %1123 = vmatpush.msrb.mxu2 %v3310_v52 }
 0x80f   :  { %v3313_v57 = vpop.permute.xlu0 %3312 }
 0x810   :  { %v3314_v2 = vunpack.i.l.bf16 %v3313_v57  ;;  %v3315_v58 = vunpack.i.h.bf16 %v3313_v57 }
 0x812   :  { %1124 = vmatpush.msrb.mxu2 %v3314_v2 }
 0x814   :  { %1125 = vmatpush.msrb.mxu2 %v3315_v58 }
 0x874   :  { %v995_v23 = vpop.f32.mrf.mxu0 }
 0x875   :  { %v996_v59 = vadd.f32 %v995_v23, %v3794_v31 }
 0x877   :  { %v1001_v60 = vsel %vm524_vm8, %v996_v59, -inf }
 0x878   :  { %1002 = vmax.xlane.f32.xlu1 %v1001_v60 }
 0x87c   :  { %v998_v35 = vpop.f32.mrf.mxu0 }
 0x87d   :  { %v999_v63 = vadd.f32 %v998_v35, %v3805_v42  ;;  %v884_v42 = vld [vmem:[%s3891_s11 + $0x38] sm:$0xff] }
 0x87e   :  { %1154 = vmatpush.msra.mxu3 %v884_v42  ;;  %v1345_v42 = vld [vmem:[%s4052_s20] sm:$0xff] }
 0x87f   :  { %v1004_v26 = vsel %vm524_vm8, %v999_v63, -inf }
 0x880   :  { %1005 = vmax.xlane.f32.xlu2 %v1004_v26  ;;  %1155 = vmatpush.msra.mxu3 %v883_v17  ;;  %v1221_v17 = vld [vmem:[%s3900_s16 + $0x30] sm:$0xff] }
 0x882   :  { %1156 = vmatpush.msra.mxu3 %v882_v29 }
 0x884   :  { %1157 = vmatpush.msra.mxu3 %v881_v33 }
 0x8eb   :  { %v1003_v61 = vpop.xlane.xlu1 %1002 }
 0x8ec   :  { %v1007_v5 = vsub.f32 %v996_v59, %v1003_v61 }
 0x8ee   :  { %v1009_v10 = vmul.f32 1.442695, %v1007_v5 }
 0x8f0   :  { %3455 = vpow2.f32 %v1009_v10 }
 0x8f3   :  { %v1006_v12 = vpop.xlane.xlu2 %1005 }
 0x8f4   :  { %v1008_v47 = vsub.f32 %v999_v63, %v1006_v12 }
 0x8f6   :  { %v3456_v31 = vpop.eup %3455  ;;  %v1011_v13 = vmul.f32 1.442695, %v1008_v47  ;;  %v1348_v47 = vld [vmem:[%s4052_s20 + $0x18] sm:$0xff] }
 0x8f7   :  { %3114 = vmatmul.msk.f32.vlgmr.msrb.gmra.mxu1 %vm524_vm8, %v3456_v31  ;;  %1374 = vmatpush.msrb.mxu3 %v1348_v47 }
 0x8f8   :  { %3457 = vpow2.f32 %v1011_v13  ;;  %v1346_v13 = vld [vmem:[%s4052_s20 + $0x8] sm:$0xff] }
 0x8fe   :  { %v3458_v16 = vpop.eup %3457 }
 0x8ff   :  { %3115 = vmatmul.msk.f32.gmra.mxu1 %vm524_vm8, %v3458_v16 }
 0x974   :  { %v1036_v62 = vpop.f32.mrf.mxu1 }
 0x975   :  { %3459 = vrcp.f32 %v1036_v62  ;;  %v1053_v38 = vand.u32 2147483648, %v1036_v62  ;;  %v1051_v48 = vand.u32 2147483647, %v1036_v62  ;;  %vm1047_vm6 = vweird.f32 %v1036_v62 }
 0x977   :  { %v1054_v52 = vor.u32 1.1754944e-38, %v1053_v38  ;;  %vm1052_vm9 = vcmp.eq.f32.partialorder %v1051_v48, 8.507059e+37  ;;  %v1219_v48 = vld [vmem:[%s3900_s16 + $0x20] sm:$0xff] }
 0x97b   :  { %v3460_v25 = vpop.eup %3459 }
 0x97c   :  { %v1043_v27 = vmul.f32 %v3460_v25, %v1036_v62  ;;  %v1039_v32 = vpop.f32.mrf.mxu1  ;;  %vm1048_vm5 = vweird.f32 %v3460_v25 }
 0x97d   :  { %3461 = vrcp.f32 %v1039_v32  ;;  %vm1049_vm7 = vmor %vm1047_vm6, %vm1048_vm5  ;;  %v1068_v60 = vand.u32 2147483648, %v1039_v32  ;;  %v1066_v63 = vand.u32 2147483647, %v1039_v32  ;;  %vm1062_vm11 = vweird.f32 %v1039_v32 }
 0x97e   :  { %v1044_v14 = vsub.f32 1.0, %v1043_v27  ;;  %v3527_v27 = vld [vmem:[%s3665_s30] sm:$0xff] }
 0x97f   :  { %v1069_v61 = vor.u32 1.1754944e-38, %v1068_v60  ;;  %vm1067_vm13 = vcmp.eq.f32.partialorder %v1066_v63, 8.507059e+37 }
 0x980   :  { %v1045_v46 = vmul.f32 %v3460_v25, %v1044_v14  ;;  %v3528_v14 = vld [vmem:[%s3665_s30 + $0x8] sm:$0xff]  ;;  %s3579_s30 = smov 24  }
 0x981   :  { %v4079_v38 = vadd.f32 %v3528_v14, %v3878_v22 }
 0x982   :  { %v1046_v50 = vadd.f32 %v3460_v25, %v1045_v46  ;;  %v1220_v46 = vld [vmem:[%s3900_s16 + $0x28] sm:$0xff] }
 0x983   :  { %v3462_v51 = vpop.eup %3461 }
 0x984   :  { %v1050_v57 = vsel %vm1049_vm7, %v3460_v25, %v1046_v50  ;;  %v1058_v2 = vmul.f32 %v3462_v51, %v1039_v32  ;;  %vm1063_vm10 = vweird.f32 %v3462_v51  ;;  %v4073_v32 = vadd.f32 %v3527_v27, %v3876_v39  ;;  %v3405_v39 = vld [vmem:[%s3886_s7 + $0x1] ss:$0 sm:$0xff]  ;;  %s4329_s7 = sld [smem:[%s4734_s0 + %s3584_s27]]  }
 0x985   :  { %v1055_v58 = vsel %vm1052_vm9, %v1054_v52, %v1050_v57  ;;  %vm1064_vm12 = vmor %vm1062_vm11, %vm1063_vm10  ;;  %s4453_s27 = sld [smem:[%s4734_s0 + %s3588_s25]]  }
 0x986   :  { %v1059_v23 = vsub.f32 1.0, %v1058_v2  ;;  %v1056_v59 = vmul.f32 %v3456_v31, %v1055_v58  ;;  %v1347_v31 = vld [vmem:[%s4052_s20 + $0x10] sm:$0xff] }
 0x987   :  { %1375 = vmatpush.msrb.mxu3 %v1347_v31 }
 0x988   :  { %v1060_v35 = vmul.f32 %v3462_v51, %v1059_v23  ;;  %3116 = vmatmul.msk.f32.vlgmr.msrb.gmra.mxu2 %vm524_vm8, %v1056_v59 }
 0x989   :  { %1376 = vmatpush.msrb.mxu3 %v1346_v13 }
 0x98a   :  { %v1061_v26 = vadd.f32 %v3462_v51, %v1060_v35 }
 0x98b   :  { %1377 = vmatpush.msrb.mxu3 %v1345_v42 }
 0x98c   :  { %v1065_v5 = vsel %vm1064_vm12, %v3462_v51, %v1061_v26 }
 0x98d   :  { %v1070_v10 = vsel %vm1067_vm13, %v1069_v61, %v1065_v5 }
 0x98e   :  { %v1071_v12 = vmul.f32 %v3458_v16, %v1070_v10  ;;  %v1222_v16 = vld [vmem:[%s3900_s16 + $0x38] sm:$0xff]  ;;  %s4212_s16 = sld [smem:[%s4734_s0 + %s3579_s30]]   ;;  %s3589_s30 = smov 30  }
 0x98f   :  { %1248 = vmatpush.msra.mxu1 %v1222_v16  ;;  %v3529_v16 = vld [vmem:[%s3712_s5] sm:$0xff] }
 0x990   :  { %3117 = vmatmul.msk.f32.gmra.mxu2 %vm524_vm8, %v1071_v12  ;;  %vm324_vm14 = vcmp.ne.s32.totalorder %v3529_v16, 0 }
 0x991   :  { %1249 = vmatpush.msra.mxu1 %v1221_v17  ;;  %v330_v17 = vsel %vm324_vm14, 1, %v3551_v0 }
 0x993   :  { %1250 = vmatpush.msra.mxu1 %v1220_v46 }
 0x995   :  { %1251 = vmatpush.msra.mxu1 %v1219_v48  ;;  %v3407_v48 = vld [vmem:[%s3929_s21 + $0x1] ss:$0 sm:$0xff]  ;;  %s3580_s21 = smov 25  }
 0x996   :  { %s4256_s3 = sld [smem:[%s4734_s0 + %s3580_s21]]   ;;  %s3585_s21 = smov 26  }
 0x997   :  { %1496 = vmatpush.msrb.mxu1 %v3799_v40  ;;  %s4334_s8 = sld [smem:[%s4734_s0 + %s3585_s21]]  }
 0x999   :  { %1497 = vmatpush.msrb.mxu1 %v3802_v41  ;;  %v3406_v41 = vld [vmem:[%s4069_s29] ss:$0 sm:$0xff] }
 0x99b   :  { %1498 = vmatpush.msrb.mxu1 %v3823_v53 }
 0x99d   :  { %1499 = vmatpush.msrb.mxu1 %v3828_v20 }
 0x99f   :  { %1500 = vmatpush.msrb.mxu1 %v3833_v21 }
 0x9a1   :  { %1501 = vmatpush.msrb.mxu1 %v3836_v54 }
 0x9a3   :  { %1502 = vmatpush.msrb.mxu1 %v3843_v55 }
 0x9a5   :  { %1503 = vmatpush.msrb.mxu1 %v3848_v56 }
 0xa0b   :  { %v1127_v29 = vpop.f32.mrf.mxu2 }
 0xa0c   :  { %v1133_v62 = vsel %vm322_vm1, -1e+09, %v1127_v29  ;;  %v1227_v29 = vld [vmem:[%s3941_s28 + $0x38] sm:$0xff] }
 0xa0d   :  { %3118 = vmatmul.msk.f32.vlgmr.msra.gmra.mxu3 %vm353_vm3, %v1133_v62  ;;  %1280 = vmatpush.msra.mxu2 %v1227_v29  ;;  %v1226_v62 = vld [vmem:[%s3941_s28 + $0x30] sm:$0xff] }
 0xa0f   :  { %1281 = vmatpush.msra.mxu2 %v1226_v62  ;;  %v4182_v62 = vld [vmem:[%s3786_s19 + $0x8] sm:$0xff] }
 0xa13   :  { %v1130_v33 = vpop.f32.mrf.mxu2 }
 0xa14   :  { %v1134_v25 = vsel %vm323_vm2, -1e+09, %v1130_v33  ;;  %v1225_v33 = vld [vmem:[%s3941_s28 + $0x28] sm:$0xff] }
 0xa15   :  { %3119 = vmatmul.msk.f32.gmra.mxu3 %vm353_vm3, %v1134_v25  ;;  %1282 = vmatpush.msra.mxu2 %v1225_v33  ;;  %v1224_v25 = vld [vmem:[%s3941_s28 + $0x20] sm:$0xff]  ;;  %s4458_s28 = sld [smem:[%s4734_s0 + %s3589_s30]]  }
 0xa17   :  { %1283 = vmatpush.msra.mxu2 %v1224_v25 }
 0xa1d   :  { %3124 = vmatmul.msk.f32.vlgmr.msrb.gmra.mxu3 %vm353_vm3, %v4073_v32 }
 0xa25   :  { %3125 = vmatmul.msk.f32.gmra.mxu3 %vm353_vm3, %v4079_v38 }
 0xa90   :  { %v1159_v22 = vpop.f32.mrf.mxu3 }
 0xa91   :  { %v1160_v50 = vadd.f32 %v3405_v39, %v1159_v22 }
 0xa93   :  { %3120 = vmatmul.msk.f32.vlgmr.msra.gmra.mxu1 %vm353_vm3, %v1160_v50  ;;  %v4155_v27 = vadd.f32 %v1160_v50, %v3990_v6 }
 0xa95   :  { %v1169_v14 = vsel %vm353_vm3, %v4155_v27, 0.0 }
 0xa98   :  { %v1162_v40 = vpop.f32.mrf.mxu3 }
 0xa99   :  { %v4095_v51 = vadd.f32 %v3405_v39, %v1162_v40 }
 0xa9b   :  { %3121 = vmatmul.msk.f32.gmra.mxu1 %vm353_vm3, %v4095_v51 }
 0xaa0   :  { %v1379_v53 = vpop.f32.mrf.mxu3 }
 0xaa1   :  { %v4100_v20 = vadd.f32 %v3406_v41, %v1379_v53 }
 0xaa3   :  { %v1391_v21 = vmul.f32 %v4100_v20, %v3683_v34  ;;  %v1389_v2 = vmul.f32 %v4100_v20, %v3702_v43  ;;  %v1385_v58 = vmul.f32 %v4100_v20, %v3707_v45  ;;  %v1399_v59 = vmul.f32 %v4100_v20, %v3749_v3 }
 0xaa4   :  { %v1397_v26 = vmul.f32 %v4100_v20, %v3772_v7  ;;  %v1387_v61 = vmul.f32 %v4100_v20, %v3705_v44  ;;  %v1395_v12 = vmul.f32 %v4100_v20, %v3857_v4  ;;  %v1393_v13 = vmul.f32 %v4100_v20, %v3863_v8 }
 0xaa5   :  { %1421 = vrot.lane.b32.xlu1 %v1391_v21, %s3560_s1 }
 0xaa8   :  { %v1382_v54 = vpop.f32.mrf.mxu3 }
 0xaa9   :  { %v4105_v55 = vadd.f32 %v3406_v41, %v1382_v54 }
 0xaab   :  { %v1392_v56 = vmul.f32 %v4105_v55, %v3678_v30  ;;  %v1390_v52 = vmul.f32 %v4105_v55, %v3687_v36  ;;  %v1386_v57 = vmul.f32 %v4105_v55, %v3723_v49  ;;  %v1400_v23 = vmul.f32 %v4105_v55, %v3745_v1 }
 0xaac   :  { %v1388_v60 = vmul.f32 %v4105_v55, %v3690_v37  ;;  %v1398_v63 = vmul.f32 %v4105_v55, %v3766_v15  ;;  %v1396_v10 = vmul.f32 %v4105_v55, %v3776_v11  ;;  %v1394_v31 = vmul.f32 %v4105_v55, %v3778_v9 }
 0xaad   :  { %1423 = vrot.lane.b32.xlu0 %v1392_v56, %s3560_s1  ;;  %1419 = vrot.lane.b32.xlu2 %v1390_v52, %s3560_s1  ;;  %v3316_v35 = vpack.i.bf16 %v1399_v59, %v1400_v23 }
 0xaae   :  { %1411 = vrot.lane.b32.xlu1 %v1386_v57, %s3560_s1  ;;  %v3321_v5 = vpack.i.bf16 %v1397_v26, %v1398_v63  ;;  %v3326_v47 = vpack.i.bf16 %v1395_v12, %v1396_v10  ;;  %v3331_v42 = vpack.i.bf16 %v1393_v13, %v1394_v31  ;;  %v4175_v13 = vld [vmem:[%s3786_s19] sm:$0xff] }
 0xab5   :  { %1417 = vrot.lane.b32.xlu0 %v1389_v2, %s3560_s1  ;;  %1409 = vrot.lane.b32.xlu2 %v1385_v58, %s3560_s1 }
 0xabd   :  { %1415 = vrot.lane.b32.xlu0 %v1388_v60, %s3560_s1  ;;  %3317 = vrot.lane.b32.xlu2 %v3316_v35, %s3562_s6 }
 0xac5   :  { %1413 = vrot.lane.b32.xlu0 %v1387_v61, %s3560_s1  ;;  %3322 = vrot.lane.b32.xlu2 %v3321_v5, %s3562_s6 }
 0xacd   :  { %3327 = vrot.lane.b32.xlu2 %v3326_v47, %s3562_s6 }
 0xad5   :  { %3332 = vrot.lane.b32.xlu2 %v3331_v42, %s3562_s6 }
 0xadd   :  { %333 = vperm.xlu2 %3270, %v330_v17  }
 0xb06   :  { %1170 = vadd.xlane.f32.xlu2 %v1169_v14  ;;  %v1166_v14 = vadd.f32 %v4095_v51, %v3994_v19 }
 0xb07   :  { %v1420_v46 = vpop.permute.xlu2 %1419 }
 0xb0f   :  { %v1410_v39 = vpop.permute.xlu2 %1409 }
 0xb10   :  { %v1253_v22 = vpop.f32.mrf.mxu1 }
 0xb11   :  { %v1254_v40 = vadd.f32 %v3407_v48, %v1253_v22 }
 0xb13   :  { %v1259_v41 = vmax.f32 %v1254_v40, 0.0 }
 0xb15   :  { %3122 = vmatmul.msk.f32.vlgmr.msra.gmra.mxu2 %vm353_vm3, %v1259_v41 }
 0xb17   :  { %v3318_v53 = vpop.permute.xlu2 %3317  ;;  %v1422_v23 = vpop.permute.xlu1 %1421 }
 0xb18   :  { %v3319_v21 = vunpack.i.l.bf16 %v3318_v53  ;;  %v1256_v54 = vpop.f32.mrf.mxu1  ;;  %v3320_v52 = vunpack.i.h.bf16 %v3318_v53 }
 0xb19   :  { %v1257_v56 = vadd.f32 %v3407_v48, %v1256_v54 }
 0xb1a   :  { %1587 = vmatpush.msrb.mxu2 %v3319_v21 }
 0xb1b   :  { %v1260_v6 = vmax.f32 %v1257_v56, 0.0 }
 0xb1c   :  { %1588 = vmatpush.msrb.mxu2 %v3320_v52 }
 0xb1d   :  { %3123 = vmatmul.msk.f32.gmra.mxu2 %vm353_vm3, %v1260_v6 }
 0xb1f   :  { %v1424_v50 = vpop.permute.xlu0 %1423  ;;  %v3323_v57 = vpop.permute.xlu2 %3322 }
 0xb20   :  { %v3324_v2 = vunpack.i.l.bf16 %v3323_v57  ;;  %3126 = vmatpush.xpose.msk.msrb.mxu0 %vm353_vm3, %v1424_v50  ;;  %v3325_v58 = vunpack.i.h.bf16 %v3323_v57  ;;  %v1412_v47 = vpop.permute.xlu1 %1411 }
 0xb22   :  { %1589 = vmatpush.msrb.mxu2 %v3324_v2 }
 0xb24   :  { %3127 = vmatpush.xpose.msk.msrb.mxu0 %vm353_vm3, %v1422_v23  ;;  %1590 = vmatpush.msrb.mxu2 %v3325_v58  ;;  %v1353_v58 = vld [vmem:[%s4212_s16 + $0x18] sm:$0xff]  ;;  %v1352_v23 = vld [vmem:[%s4212_s16 + $0x10] sm:$0xff] }
 0xb25   :  { %1623 = vmatpush.msra.mxu3 %v1353_v58 }
 0xb27   :  { %v1418_v59 = vpop.permute.xlu0 %1417  ;;  %v3328_v60 = vpop.permute.xlu2 %3327  ;;  %1624 = vmatpush.msra.mxu3 %v1352_v23  ;;  %v326_v23 = vld [vmem:[%s3038_s14] sm:$0xff] }
 0xb28   :  { %v3329_v35 = vunpack.i.l.bf16 %v3328_v60  ;;  %3128 = vmatpush.xpose.msk.msrb.mxu0 %vm353_vm3, %v1420_v46  ;;  %v3330_v63 = vunpack.i.h.bf16 %v3328_v60  ;;  %v3532_v46 = vld [vmem:[%s3712_s5 + $0x8] sm:$0xff]  ;;  %vm328_vm13 = vcmp.gt.f32.partialorder %v326_v23, 0.5 }
 0xb29   :  { %vm325_vm15 = vcmp.ne.s32.totalorder %v3532_v46, 0 }
 0xb2a   :  { %1591 = vmatpush.msrb.mxu2 %v3329_v35  ;;  %v331_v22 = vsel %vm325_vm15, 1, %v3551_v0  ;;  %v1350_v35 = vld [vmem:[%s4212_s16] sm:$0xff] }
 0xb2c   :  { %3129 = vmatpush.xpose.msk.msrb.mxu0 %vm353_vm3, %v1418_v59  ;;  %1592 = vmatpush.msrb.mxu2 %v3330_v63  ;;  %v1351_v59 = vld [vmem:[%s4212_s16 + $0x8] sm:$0xff]  ;;  %v4219_v63 = vld [vmem:[%s3791_s23 + $0x38] sm:$0xff] }
 0xb2d   :  { %1625 = vmatpush.msra.mxu3 %v1351_v59 }
 0xb2f   :  { %v1416_v26 = vpop.permute.xlu0 %1415  ;;  %v3333_v61 = vpop.permute.xlu2 %3332  ;;  %1626 = vmatpush.msra.mxu3 %v1350_v35 }
 0xb30   :  { %v3334_v5 = vunpack.i.l.bf16 %v3333_v61  ;;  %3130 = vmatpush.xpose.msk.msrb.mxu0 %vm353_vm3, %v1416_v26  ;;  %v3335_v10 = vunpack.i.h.bf16 %v3333_v61  ;;  %v4223_v26 = vld [vmem:[%s3791_s23 + $0x30] sm:$0xff] }
 0xb31   :  { %1851 = vmatpush.msrb.mxu3 %v4219_v63 }
 0xb32   :  { %1593 = vmatpush.msrb.mxu2 %v3334_v5 }
 0xb33   :  { %1852 = vmatpush.msrb.mxu3 %v4223_v26 }
 0xb34   :  { %1594 = vmatpush.msrb.mxu2 %v3335_v10 }
 0xb37   :  { %v1414_v12 = vpop.permute.xlu0 %1413  ;;  %v4179_v17 = vpop.permute.xlu2 %333 }
 0xb38   :  { %3131 = vmatpush.xpose.msk.msrb.mxu0 %vm353_vm3, %v1414_v12  ;;  %v4227_v12 = vld [vmem:[%s3791_s23 + $0x28] sm:$0xff]  ;;  %vm338_vm12 = vcmp.eq.s32.totalorder %v4179_v17, 1 }
 0xb39   :  { %1853 = vmatpush.msrb.mxu3 %v4227_v12  ;;  %vm4266_vm14 = vmand %vm338_vm12, %vm328_vm13 }
 0xb3c   :  { %3132 = vmatpush.xpose.msk.msrb.mxu0 %vm353_vm3, %v1412_v47 }
 0xb40   :  { %3133 = vmatpush.xpose.msk.msrb.mxu0 %vm353_vm3, %v1410_v39  ;;  %v1172_v39 = vsel %vm353_vm3, %v1166_v14, 0.0 }
 0xb43   :  { %3134 = vmatmul.msk.f32.vlgmr.msrb.gmra.mxu0 %vm353_vm3, %v4100_v20 }
 0xb4b   :  { %3135 = vmatmul.msk.f32.gmra.mxu0 %vm353_vm3, %v4105_v55 }
 0xb79   :  { %v1171_v25 = vpop.xlane.xlu2 %1170 }
 0xb7a   :  { %v1175_v55 = vmul.f32 %v1171_v25, %v3947_v18  ;;  %v4239_v25 = vld [vmem:[%s3791_s23 + $0x10] sm:$0xff] }
 0xb7c   :  { %v4191_v48 = vsub.f32 %v4155_v27, %v1175_v55 }
 0xb7e   :  { %v1179_v40 = vmul.f32 %v4191_v48, %v4191_v48 }
 0xb80   :  { %v1181_v41 = vsel %vm353_vm3, %v1179_v40, 0.0 }
 0xbc0   :  { %v1464_v31 = vpop.f32.mrf.mxu0 }
 0xbc1   :  { %v1465_v42 = vadd.f32 %v4175_v13, %v1464_v31  ;;  %v4231_v31 = vld [vmem:[%s3791_s23 + $0x20] sm:$0xff] }
 0xbc2   :  { %1854 = vmatpush.msrb.mxu3 %v4231_v31 }
 0xbc3   :  { %v1470_v16 = vsel %vm524_vm8, %v1465_v42, -inf }
 0xbc4   :  { %1471 = vmax.xlane.f32.xlu0 %v1470_v16 }
 0xbc8   :  { %v1467_v29 = vpop.f32.mrf.mxu0 }
 0xbc9   :  { %v1468_v33 = vadd.f32 %v4182_v62, %v1467_v29 }
 0xbcb   :  { %v1473_v20 = vsel %vm524_vm8, %v1468_v33, -inf }
 0xbcc   :  { %1474 = vmax.xlane.f32.xlu1 %v1473_v20 }
 0xbd4   :  { %1173 = vadd.xlane.f32.xlu1 %v1172_v39 }
 0xbd8   :  { %336 = vperm.xlu0 %3269, %v331_v22   ;;  %v4243_v22 = vld [vmem:[%s3791_s23 + $0x8] sm:$0xff] }
 0xbdc   :  { %1182 = vadd.xlane.f32.xlu1 %v1181_v41 }
 0xc37   :  { %v1472_v53 = vpop.xlane.xlu0 %1471 }
 0xc38   :  { %v1476_v21 = vsub.f32 %v1465_v42, %v1472_v53 }
 0xc3a   :  { %v1478_v19 = vmul.f32 1.442695, %v1476_v21  ;;  %v4247_v21 = vld [vmem:[%s3791_s23] sm:$0xff] }
 0xc3c   :  { %3463 = vpow2.f32 %v1478_v19 }
 0xc3f   :  { %v1475_v51 = vpop.xlane.xlu1 %1474 }
 0xc40   :  { %v1477_v54 = vsub.f32 %v1468_v33, %v1475_v51  ;;  %v4235_v33 = vld [vmem:[%s3791_s23 + $0x18] sm:$0xff] }
 0xc41   :  { %1855 = vmatpush.msrb.mxu3 %v4235_v33 }
 0xc42   :  { %v3464_v27 = vpop.eup %3463  ;;  %v1480_v56 = vmul.f32 1.442695, %v1477_v54 }
 0xc43   :  { %3136 = vmatmul.msk.f32.vlgmr.msrb.gmra.mxu1 %vm524_vm8, %v3464_v27  ;;  %1856 = vmatpush.msrb.mxu3 %v4239_v25 }
 0xc44   :  { %3465 = vpow2.f32 %v1480_v56 }
 0xc45   :  { %1857 = vmatpush.msrb.mxu3 %v4243_v22 }
 0xc47   :  { %v1174_v52 = vpop.xlane.xlu1 %1173  ;;  %1858 = vmatpush.msrb.mxu3 %v4247_v21 }
 0xc48   :  { %v1176_v0 = vmul.f32 %v1174_v52, %v3947_v18 }
 0xc4a   :  { %v4200_v6 = vpop.eup %3465  ;;  %v4202_v50 = vsub.f32 %v1166_v14, %v1176_v0  ;;  %v337_v35 = vpop.permute.xlu0 %336 }
 0xc4b   :  { %3137 = vmatmul.msk.f32.gmra.mxu1 %vm524_vm8, %v4200_v6  ;;  %vm339_vm15 = vcmp.eq.s32.totalorder %v337_v35, 1 }
 0xc4c   :  { %v1180_v57 = vmul.f32 %v4202_v50, %v4202_v50 }
 0xc4e   :  { %v1184_v2 = vsel %vm353_vm3, %v1180_v57, 0.0 }
 0xc4f   :  { %1185 = vadd.xlane.f32.xlu0 %v1184_v2 }
 0xcc0   :  { %v1505_v60 = vpop.f32.mrf.mxu1 }
 0xcc1   :  { %3467 = vrcp.f32 %v1505_v60  ;;  %v1522_v42 = vand.u32 2147483648, %v1505_v60  ;;  %v1520_v29 = vand.u32 2147483647, %v1505_v60  ;;  %vm1516_vm4 = vweird.f32 %v1505_v60 }
 0xcc3   :  { %v1523_v14 = vor.u32 1.1754944e-38, %v1522_v42  ;;  %vm1521_vm6 = vcmp.eq.f32.partialorder %v1520_v29, 8.507059e+37  ;;  %v1186_v29 = vpop.xlane.xlu0 %1185 }
 0xcc7   :  { %v3468_v61 = vpop.eup %3467 }
 0xcc8   :  { %v1512_v5 = vmul.f32 %v3468_v61, %v1505_v60  ;;  %v1508_v10 = vpop.f32.mrf.mxu1  ;;  %vm1517_vm0 = vweird.f32 %v3468_v61 }
 0xcc9   :  { %3469 = vrcp.f32 %v1508_v10  ;;  %vm1518_vm5 = vmor %vm1516_vm4, %vm1517_vm0  ;;  %v1537_v19 = vand.u32 2147483648, %v1508_v10  ;;  %v1535_v54 = vand.u32 2147483647, %v1508_v10  ;;  %vm1531_vm9 = vweird.f32 %v1508_v10 }
 0xcca   :  { %v1513_v47 = vsub.f32 1.0, %v1512_v5 }
 0xccb   :  { %v1538_v52 = vor.u32 1.1754944e-38, %v1537_v19  ;;  %vm1536_vm11 = vcmp.eq.f32.partialorder %v1535_v54, 8.507059e+37  ;;  %v3409_v54 = vld [vmem:[%s4256_s3] ss:$0 sm:$0xff] }
 0xccc   :  { %v1514_v16 = vmul.f32 %v3468_v61, %v1513_v47  ;;  %v1183_v47 = vpop.xlane.xlu1 %1182 }
 0xccd   :  { %v1187_v42 = vmul.f32 %v1183_v47, %v3947_v18 }
 0xcce   :  { %v1515_v20 = vadd.f32 %v3468_v61, %v1514_v16 }
 0xccf   :  { %v3470_v55 = vpop.eup %3469  ;;  %v1189_v16 = vadd.f32 1e-05, %v1187_v42 }
 0xcd0   :  { %v1519_v46 = vsel %vm1518_vm5, %v3468_v61, %v1515_v20  ;;  %v1527_v39 = vmul.f32 %v3470_v55, %v1508_v10  ;;  %vm1532_vm7 = vweird.f32 %v3470_v55  ;;  %v327_v61 = vld [vmem:[%s3038_s14 + $0x8] sm:$0xff]  ;;  %v1188_v20 = vmul.f32 %v1186_v29, %v3947_v18  ;;  %s3587_s14 = smov 29  }
 0xcd1   :  { %v1524_v40 = vsel %vm1521_vm6, %v1523_v14, %v1519_v46  ;;  %vm1533_vm10 = vmor %vm1531_vm9, %vm1532_vm7  ;;  %vm329_vm0 = vcmp.gt.f32.partialorder %v327_v61, 0.5  ;;  %3471 = vrsqrt.f32 %v1189_v16  ;;  %vm1197_vm6 = vweird.f32 %v1189_v16  ;;  %v3410_v61 = vld [vmem:[%s3961_s12 + $0x2] ss:$0 sm:$0xff]  ;;  %s4428_s17 = sld [smem:[%s4734_s0 + %s3587_s14]]  }
 0xcd2   :  { %v1528_v41 = vsub.f32 1.0, %v1527_v39  ;;  %v1525_v53 = vmul.f32 %v3464_v27, %v1524_v40  ;;  %v4258_v27 = vpop.f32.mrf.mxu2  ;;  %vm4273_vm4 = vmand %vm339_vm15, %vm329_vm0 }
 0xcd4   :  { %v1529_v51 = vmul.f32 %v3470_v55, %v1528_v41  ;;  %3138 = vmatmul.msk.f32.vlgmr.msrb.gmra.mxu2 %vm524_vm8, %v1525_v53 }
 0xcd6   :  { %v1530_v56 = vadd.f32 %v3470_v55, %v1529_v51 }
 0xcd7   :  { %v3472_v14 = vpop.eup %3471 }
 0xcd8   :  { %v1534_v0 = vsel %vm1533_vm10, %v3470_v55, %v1530_v56  ;;  %v1190_v55 = vadd.f32 1e-05, %v1188_v20  ;;  %v1192_v46 = vmul.f32 %v3472_v14, %v1189_v16  ;;  %vm1198_vm5 = vweird.f32 %v3472_v14  ;;  %v3411_v16 = vld [vmem:[%s3967_s18 + $0x2] ss:$0 sm:$0xff]  ;;  %v3408_v20 = vld [vmem:[%s3955_s4 + $0x1] ss:$0 sm:$0xff] }
 0xcd9   :  { %v1539_v57 = vsel %vm1536_vm11, %v1538_v52, %v1534_v0  ;;  %vm1199_vm7 = vmor %vm1197_vm6, %vm1198_vm5  ;;  %s3582_s4 = smov 34  }
 0xcda   :  { %v1540_v2 = vmul.f32 %v4200_v6, %v1539_v57  ;;  %v4263_v58 = vpop.f32.mrf.mxu2  ;;  %3473 = vrsqrt.f32 %v1190_v55  ;;  %v1193_v39 = vmul.f32 %v3472_v14, %v1192_v46  ;;  %vm1207_vm10 = vweird.f32 %v1190_v55  ;;  %s4298_s13 = sld [smem:[%s4734_s0 + %s3582_s4]]  }
 0xcdc   :  { %3139 = vmatmul.msk.f32.gmra.mxu2 %vm524_vm8, %v1540_v2  ;;  %v1194_v41 = vmul.f32 0.5, %v1193_v39 }
 0xcde   :  { %v1195_v19 = vsub.f32 1.5, %v1194_v41 }
 0xce0   :  { %v3474_v40 = vpop.eup %3473  ;;  %v1196_v56 = vmul.f32 %v3472_v14, %v1195_v19 }
 0xce1   :  { %v1202_v53 = vmul.f32 %v3474_v40, %v1190_v55  ;;  %vm1208_vm9 = vweird.f32 %v3474_v40 }
 0xce2   :  { %v1200_v2 = vsel %vm1199_vm7, %v3472_v14, %v1196_v56  ;;  %vm1209_vm11 = vmor %vm1207_vm10, %vm1208_vm9 }
 0xce3   :  { %v1203_v51 = vmul.f32 %v3474_v40, %v1202_v53  ;;  %v1211_v35 = vmul.f32 %v1200_v2, %v4191_v48  ;;  %v1286_v48 = vadd.f32 %v3408_v20, %v4258_v27 }
 0xce5   :  { %v1204_v52 = vmul.f32 0.5, %v1203_v51  ;;  %v1214_v42 = vmul.f32 %v3410_v61, %v1211_v35  ;;  %v1289_v51 = vadd.f32 %v3408_v20, %v4263_v58  ;;  %v1691_v20 = vld [vmem:[%s4334_s8 + $0x18] sm:$0xff] }
 0xce6   :  { %1723 = vmatpush.msra.mxu1 %v1691_v20 }
 0xce7   :  { %v1205_v23 = vsub.f32 1.5, %v1204_v52  ;;  %v1217_v46 = vadd.f32 %v3411_v16, %v1214_v42 }
 0xce9   :  { %v1291_v41 = vadd.f32 %v1286_v48, %v1217_v46  ;;  %v1688_v46 = vld [vmem:[%s4334_s8] sm:$0xff] }
 0xceb   :  { %v1295_v55 = vsel %vm353_vm3, %v1291_v41, 0.0 }
 0xd57   :  { %v1596_v59 = vpop.f32.mrf.mxu2 }
 0xd58   :  { %v1602_v60 = vsel %vm4266_vm14, -1e+09, %v1596_v59 }
 0xd59   :  { %3140 = vmatmul.msk.f32.vlgmr.msra.gmra.mxu3 %vm353_vm3, %v1602_v60 }
 0xd5f   :  { %v1599_v17 = vpop.f32.mrf.mxu2 }
 0xd60   :  { %v1603_v10 = vsel %vm4273_vm4, -1e+09, %v1599_v17  ;;  %v1206_v17 = vmul.f32 %v3474_v40, %v1205_v23 }
 0xd61   :  { %3141 = vmatmul.msk.f32.gmra.mxu3 %vm353_vm3, %v1603_v10 }
 0xd62   :  { %v1210_v29 = vsel %vm1209_vm11, %v3474_v40, %v1206_v17 }
 0xd63   :  { %v1212_v39 = vmul.f32 %v1210_v29, %v4202_v50 }
 0xd65   :  { %v1215_v53 = vmul.f32 %v3410_v61, %v1212_v39 }
 0xd67   :  { %v1218_v19 = vadd.f32 %v3411_v16, %v1215_v53 }
 0xd69   :  { %v1292_v40 = vadd.f32 %v1289_v51, %v1218_v19 }
 0xddc   :  { %v1628_v0 = vpop.f32.mrf.mxu3 }
 0xddd   :  { %v1629_v57 = vadd.f32 %v3409_v54, %v1628_v0 }
 0xddf   :  { %v1634_v59 = vadd.f32 %v1629_v57, %v4073_v32 }
 0xde1   :  { %v1638_v60 = vsel %vm353_vm3, %v1634_v59, 0.0 }
 0xde2   :  { %1639 = vadd.xlane.f32.xlu1 %v1638_v60 }
 0xde4   :  { %v1631_v10 = vpop.f32.mrf.mxu3 }
 0xde5   :  { %v1632_v47 = vadd.f32 %v3409_v54, %v1631_v10 }
 0xde7   :  { %v1635_v14 = vadd.f32 %v1632_v47, %v4079_v38  ;;  %v1298_v38 = vsel %vm353_vm3, %v1292_v40, 0.0 }
 0xde9   :  { %v1641_v32 = vsel %vm353_vm3, %v1635_v14, 0.0 }
 0xdea   :  { %1642 = vadd.xlane.f32.xlu1 %v1641_v32  ;;  %v1689_v32 = vld [vmem:[%s4334_s8 + $0x8] sm:$0xff] }
 0xdf2   :  { %1296 = vadd.xlane.f32.xlu1 %v1295_v55 }
 0xdfa   :  { %1299 = vadd.xlane.f32.xlu1 %v1298_v38 }
 0xe55   :  { %v1640_v50 = vpop.xlane.xlu1 %1639 }
 0xe56   :  { %v1644_v27 = vmul.f32 %v1640_v50, %v3947_v18 }
 0xe58   :  { %v1646_v54 = vsub.f32 %v1634_v59, %v1644_v27 }
 0xe5a   :  { %v1648_v56 = vmul.f32 %v1646_v54, %v1646_v54 }
 0xe5c   :  { %v1650_v52 = vsel %vm353_vm3, %v1648_v56, 0.0 }
 0xe5d   :  { %1651 = vadd.xlane.f32.xlu2 %v1650_v52  ;;  %v1643_v0 = vpop.xlane.xlu1 %1642 }
 0xe5e   :  { %v1645_v58 = vmul.f32 %v1643_v0, %v3947_v18 }
 0xe60   :  { %v4304_v57 = vsub.f32 %v1635_v14, %v1645_v58  ;;  %v1690_v14 = vld [vmem:[%s4334_s8 + $0x10] sm:$0xff] }
 0xe61   :  { %1724 = vmatpush.msra.mxu1 %v1690_v14 }
 0xe62   :  { %v1649_v2 = vmul.f32 %v4304_v57, %v4304_v57 }
 0xe63   :  { %1725 = vmatpush.msra.mxu1 %v1689_v32 }
 0xe64   :  { %v1653_v23 = vsel %vm353_vm3, %v1649_v2, 0.0 }
 0xe65   :  { %1654 = vadd.xlane.f32.xlu1 %v1653_v23  ;;  %v1297_v59 = vpop.xlane.xlu1 %1296  ;;  %1726 = vmatpush.msra.mxu1 %v1688_v46 }
 0xe66   :  { %v1301_v60 = vmul.f32 %v1297_v59, %v3947_v18  ;;  %v3412_v59 = vld [vmem:[%s4298_s13] ss:$0 sm:$0xff] }
 0xe68   :  { %v4315_v35 = vsub.f32 %v1291_v41, %v1301_v60 }
 0xe6a   :  { %v1305_v61 = vmul.f32 %v4315_v35, %v4315_v35 }
 0xe6c   :  { %v1307_v17 = vsel %vm353_vm3, %v1305_v61, 0.0 }
 0xe6d   :  { %1308 = vadd.xlane.f32.xlu2 %v1307_v17  ;;  %v1300_v10 = vpop.xlane.xlu1 %1299 }
 0xe6e   :  { %v1302_v47 = vmul.f32 %v1300_v10, %v3947_v18  ;;  %v3413_v10 = vld [vmem:[%s4312_s24] ss:$0 sm:$0xff] }
 0xe70   :  { %v4321_v42 = vsub.f32 %v1292_v40, %v1302_v47 }
 0xe72   :  { %v1306_v16 = vmul.f32 %v4321_v42, %v4321_v42 }
 0xe74   :  { %v1310_v29 = vsel %vm353_vm3, %v1306_v16, 0.0 }
 0xe75   :  { %1311 = vadd.xlane.f32.xlu1 %v1310_v29 }
 0xed0   :  { %v1652_v39 = vpop.xlane.xlu2 %1651 }
 0xed1   :  { %v1656_v48 = vmul.f32 %v1652_v39, %v3947_v18 }
 0xed3   :  { %v1658_v41 = vadd.f32 1e-05, %v1656_v48 }
 0xed5   :  { %3475 = vrsqrt.f32 %v1658_v41  ;;  %vm1666_vm13 = vweird.f32 %v1658_v41 }
 0xed8   :  { %v1655_v53 = vpop.xlane.xlu1 %1654 }
 0xed9   :  { %v1657_v55 = vmul.f32 %v1655_v53, %v3947_v18 }
 0xedb   :  { %v3476_v19 = vpop.eup %3475  ;;  %v1659_v51 = vadd.f32 1e-05, %v1657_v55 }
 0xedc   :  { %v1661_v40 = vmul.f32 %v3476_v19, %v1658_v41  ;;  %vm1667_vm12 = vweird.f32 %v3476_v19 }
 0xedd   :  { %3477 = vrsqrt.f32 %v1659_v51  ;;  %vm1668_vm15 = vmor %vm1666_vm13, %vm1667_vm12  ;;  %vm1676_vm5 = vweird.f32 %v1659_v51 }
 0xede   :  { %v1662_v38 = vmul.f32 %v3476_v19, %v1661_v40 }
 0xee0   :  { %v1663_v50 = vmul.f32 0.5, %v1662_v38  ;;  %v1309_v27 = vpop.xlane.xlu2 %1308 }
 0xee1   :  { %v1313_v56 = vmul.f32 %v1309_v27, %v3947_v18 }
 0xee2   :  { %v1664_v52 = vsub.f32 1.5, %v1663_v50 }
 0xee3   :  { %v3478_v0 = vpop.eup %3477  ;;  %v1315_v58 = vadd.f32 1e-05, %v1313_v56 }
 0xee4   :  { %v1665_v2 = vmul.f32 %v3476_v19, %v1664_v52  ;;  %v1671_v23 = vmul.f32 %v3478_v0, %v1659_v51  ;;  %vm1677_vm0 = vweird.f32 %v3478_v0  ;;  %v3414_v52 = vld [vmem:[%s3961_s12 + $0x3] ss:$0 sm:$0xff]  ;;  %s3586_s12 = smov 28  }
 0xee5   :  { %3479 = vrsqrt.f32 %v1315_v58  ;;  %vm1678_vm6 = vmor %vm1676_vm5, %vm1677_vm0  ;;  %vm1323_vm9 = vweird.f32 %v1315_v58  ;;  %s4418_s10 = sld [smem:[%s4734_s0 + %s3586_s12]]  }
 0xee6   :  { %v1669_v60 = vsel %vm1668_vm15, %v3476_v19, %v1665_v2  ;;  %v1672_v61 = vmul.f32 %v3478_v0, %v1671_v23  ;;  %v3415_v23 = vld [vmem:[%s3967_s18 + $0x3] ss:$0 sm:$0xff]  ;;  %s4472_s18 = sld [smem:[%s4734_s0 + %s3558_s26]]   ;;  %s3590_s26 = smov 33  }
 0xee7   :  { %v1680_v17 = vmul.f32 %v1669_v60, %v1646_v54  ;;  %s4491_s4 = sld [smem:[%s4734_s0 + %s3590_s26]]  }
 0xee8   :  { %v1673_v47 = vmul.f32 0.5, %v1672_v61  ;;  %v1312_v16 = vpop.xlane.xlu1 %1311 }
 0xee9   :  { %v1683_v29 = vmul.f32 %v3412_v59, %v1680_v17  ;;  %v1314_v20 = vmul.f32 %v1312_v16, %v3947_v18 }
 0xeea   :  { %v1674_v14 = vsub.f32 1.5, %v1673_v47 }
 0xeeb   :  { %v3480_v32 = vpop.eup %3479  ;;  %v1316_v46 = vadd.f32 1e-05, %v1314_v20  ;;  %v4346_v39 = vadd.f32 %v3413_v10, %v1683_v29 }
 0xeec   :  { %v1675_v48 = vmul.f32 %v3478_v0, %v1674_v14  ;;  %v1318_v41 = vmul.f32 %v3480_v32, %v1315_v58  ;;  %vm1324_vm7 = vweird.f32 %v3480_v32 }
 0xeed   :  { %3481 = vrsqrt.f32 %v1316_v46  ;;  %3142 = vmatmul.msk.f32.vlgmr.msra.gmra.mxu1 %vm353_vm3, %v4346_v39  ;;  %vm1325_vm10 = vmor %vm1323_vm9, %vm1324_vm7  ;;  %vm1333_vm12 = vweird.f32 %v1316_v46 }
 0xeee   :  { %v1679_v54 = vsel %vm1678_vm6, %v3478_v0, %v1675_v48  ;;  %v1319_v53 = vmul.f32 %v3480_v32, %v1318_v41 }
 0xeef   :  { %v1681_v55 = vmul.f32 %v1679_v54, %v4304_v57 }
 0xef0   :  { %v1320_v19 = vmul.f32 0.5, %v1319_v53 }
 0xef1   :  { %v1684_v40 = vmul.f32 %v3412_v59, %v1681_v55 }
 0xef2   :  { %v1321_v38 = vsub.f32 1.5, %v1320_v19 }
 0xef3   :  { %v3482_v50 = vpop.eup %3481  ;;  %v4351_v27 = vadd.f32 %v3413_v10, %v1684_v40 }
 0xef4   :  { %v1322_v51 = vmul.f32 %v3480_v32, %v1321_v38  ;;  %v1328_v56 = vmul.f32 %v3482_v50, %v1316_v46  ;;  %vm1334_vm11 = vweird.f32 %v3482_v50 }
 0xef5   :  { %3143 = vmatmul.msk.f32.gmra.mxu1 %vm353_vm3, %v4351_v27  ;;  %vm1335_vm13 = vmor %vm1333_vm12, %vm1334_vm11 }
 0xef6   :  { %v1326_v0 = vsel %vm1325_vm10, %v3480_v32, %v1322_v51  ;;  %v1329_v2 = vmul.f32 %v3482_v50, %v1328_v56 }
 0xef7   :  { %v1337_v57 = vmul.f32 %v1326_v0, %v4315_v35  ;;  %v3416_v35 = vld [vmem:[%s4329_s7] ss:$0 sm:$0xff] }
 0xef8   :  { %v1330_v59 = vmul.f32 0.5, %v1329_v2 }
 0xef9   :  { %v1340_v60 = vmul.f32 %v3414_v52, %v1337_v57 }
 0xefa   :  { %v1331_v61 = vsub.f32 1.5, %v1330_v59 }
 0xefb   :  { %v4358_v17 = vadd.f32 %v3415_v23, %v1340_v60 }
 0xefc   :  { %v1332_v10 = vmul.f32 %v3482_v50, %v1331_v61 }
 0xefd   :  { %3144 = vmatmul.msk.f32.gmra.mxu1 %vm353_vm3, %v4358_v17 }
 0xefe   :  { %v1336_v58 = vsel %vm1335_vm13, %v3482_v50, %v1332_v10 }
 0xeff   :  { %v1338_v47 = vmul.f32 %v1336_v58, %v4321_v42 }
 0xf01   :  { %v1341_v16 = vmul.f32 %v3414_v52, %v1338_v47 }
 0xf03   :  { %v4363_v29 = vadd.f32 %v3415_v23, %v1341_v16 }
 0xf05   :  { %3145 = vmatmul.msk.f32.gmra.mxu1 %vm353_vm3, %v4363_v29 }
 0xf6a   :  { %v1728_v20 = vpop.f32.mrf.mxu1 }
 0xf6b   :  { %v1729_v14 = vadd.f32 %v3416_v35, %v1728_v20 }
 0xf72   :  { %v1731_v32 = vpop.f32.mrf.mxu1 }
 0xf73   :  { %v4368_v48 = vadd.f32 %v3416_v35, %v1731_v32 }
 0xf7a   :  { %v1734_v46 = vpop.f32.mrf.mxu1 }
 0xf7b   :  { %v1735_v41 = vadd.f32 %v3416_v35, %v1734_v46 }
 0xf7d   :  { %v1746_v54 = vmul.f32 %v1735_v41, %v3683_v34  ;;  %v1744_v55 = vmul.f32 %v1735_v41, %v3702_v43  ;;  %v1742_v38 = vmul.f32 %v1735_v41, %v3705_v44  ;;  %v1740_v51 = vmul.f32 %v1735_v41, %v3707_v45 }
 0xf7e   :  { %v1754_v52 = vmul.f32 %v1735_v41, %v3749_v3  ;;  %v1752_v23 = vmul.f32 %v1735_v41, %v3772_v7  ;;  %v1750_v61 = vmul.f32 %v1735_v41, %v3857_v4  ;;  %v1748_v47 = vmul.f32 %v1735_v41, %v3863_v8 }
 0xf7f   :  { %1776 = vrot.lane.b32.xlu0 %v1746_v54, %s3560_s1 }
 0xf82   :  { %v1737_v53 = vpop.f32.mrf.mxu1 }
 0xf83   :  { %v1738_v42 = vadd.f32 %v3416_v35, %v1737_v53 }
 0xf85   :  { %v1747_v19 = vmul.f32 %v1738_v42, %v3678_v30  ;;  %v1745_v40 = vmul.f32 %v1738_v42, %v3687_v36  ;;  %v1743_v50 = vmul.f32 %v1738_v42, %v3690_v37  ;;  %v1755_v56 = vmul.f32 %v1738_v42, %v3745_v1 }
 0xf86   :  { %v1741_v0 = vmul.f32 %v1738_v42, %v3723_v49  ;;  %v1753_v57 = vmul.f32 %v1738_v42, %v3766_v15  ;;  %v1751_v60 = vmul.f32 %v1738_v42, %v3776_v11  ;;  %v1749_v58 = vmul.f32 %v1738_v42, %v3778_v9 }
 0xf87   :  { %1772 = vrot.lane.b32.xlu0 %v1744_v55, %s3560_s1  ;;  %1778 = vrot.lane.b32.xlu2 %v1747_v19, %s3560_s1  ;;  %v3336_v2 = vpack.i.bf16 %v1754_v52, %v1755_v56 }
 0xf88   :  { %1774 = vrot.lane.b32.xlu1 %v1745_v40, %s3560_s1  ;;  %v3341_v59 = vpack.i.bf16 %v1752_v23, %v1753_v57  ;;  %v3346_v10 = vpack.i.bf16 %v1750_v61, %v1751_v60  ;;  %v3351_v16 = vpack.i.bf16 %v1748_v47, %v1749_v58 }
 0xf8f   :  { %1768 = vrot.lane.b32.xlu0 %v1742_v38, %s3560_s1  ;;  %1770 = vrot.lane.b32.xlu2 %v1743_v50, %s3560_s1 }
 0xf90   :  { %1764 = vrot.lane.b32.xlu1 %v1740_v51, %s3560_s1 }
 0xf97   :  { %1766 = vrot.lane.b32.xlu2 %v1741_v0, %s3560_s1 }
 0xf98   :  { %3337 = vrot.lane.b32.xlu1 %v3336_v2, %s3562_s6 }
 0xfa0   :  { %3342 = vrot.lane.b32.xlu1 %v3341_v59, %s3562_s6 }
 0xfa8   :  { %3347 = vrot.lane.b32.xlu1 %v3346_v10, %s3562_s6 }
 0xfb0   :  { %3352 = vrot.lane.b32.xlu1 %v3351_v16, %s3562_s6 }
 0xfe1   :  { %v1779_v35 = vpop.permute.xlu2 %1778 }
 0xfe2   :  { %3146 = vmatpush.xpose.msk.msra.mxu2 %vm353_vm3, %v1779_v35 }
 0xfe9   :  { %v1771_v54 = vpop.permute.xlu2 %1770 }
 0xff1   :  { %v1777_v20 = vpop.permute.xlu0 %1776  ;;  %v1767_v42 = vpop.permute.xlu2 %1766 }
 0xff2   :  { %3147 = vmatpush.xpose.msk.msra.mxu2 %vm353_vm3, %v1777_v20 }
 0xff9   :  { %v1773_v46 = vpop.permute.xlu0 %1772 }
 0xffa   :  { %v1775_v32 = vpop.permute.xlu1 %1774 }
 0xffb   :  { %3148 = vmatpush.xpose.msk.msra.mxu2 %vm353_vm3, %v1775_v32 }
 0xfff   :  { %3149 = vmatpush.xpose.msk.msra.mxu2 %vm353_vm3, %v1773_v46 }
0x1001   :  { %v1769_v41 = vpop.permute.xlu0 %1768 }
0x1002   :  { %v1765_v53 = vpop.permute.xlu1 %1764 }
0x1003   :  { %3150 = vmatpush.xpose.msk.msra.mxu2 %vm353_vm3, %v1771_v54  ;;  %v1695_v54 = vld [vmem:[%s4418_s10 + $0x10] sm:$0xff] }
0x1007   :  { %3151 = vmatpush.xpose.msk.msra.mxu2 %vm353_vm3, %v1769_v41 }
0x100a   :  { %v3338_v55 = vpop.permute.xlu1 %3337 }
0x100b   :  { %v3339_v19 = vunpack.i.l.bf16 %v3338_v55  ;;  %3152 = vmatpush.xpose.msk.msra.mxu2 %vm353_vm3, %v1767_v42  ;;  %v3340_v40 = vunpack.i.h.bf16 %v3338_v55 }
0x100d   :  { %1942 = vmatpush.msra.mxu0 %v3339_v19 }
0x100f   :  { %3153 = vmatpush.xpose.msk.msra.mxu2 %vm353_vm3, %v1765_v53  ;;  %1943 = vmatpush.msra.mxu0 %v3340_v40  ;;  %v1694_v53 = vld [vmem:[%s4418_s10 + $0x8] sm:$0xff] }
0x1012   :  { %v3343_v38 = vpop.permute.xlu1 %3342  ;;  %3154 = vmatmul.msk.f32.vlgmr.msra.gmra.mxu2 %vm353_vm3, %v1729_v14 }
0x1013   :  { %3218 = vmatpush.msrb.mxu2 %v3339_v19  ;;  %v3344_v50 = vunpack.i.l.bf16 %v3343_v38  ;;  %v3345_v51 = vunpack.i.h.bf16 %v3343_v38 }
0x1015   :  { %3219 = vmatpush.msrb.mxu2 %v3340_v40  ;;  %1944 = vmatpush.msra.mxu0 %v3344_v50 }
0x1017   :  { %3220 = vmatpush.msrb.mxu2 %v3344_v50  ;;  %1945 = vmatpush.msra.mxu0 %v3345_v51 }
0x1019   :  { %3221 = vmatpush.msrb.mxu2 %v3345_v51 }
0x101a   :  { %v3348_v56 = vpop.permute.xlu1 %3347  ;;  %3155 = vmatmul.msk.f32.gmra.mxu2 %vm353_vm3, %v4368_v48 }
0x101b   :  { %v3349_v52 = vunpack.i.l.bf16 %v3348_v56  ;;  %v3350_v0 = vunpack.i.h.bf16 %v3348_v56 }
0x101d   :  { %1946 = vmatpush.msra.mxu0 %v3349_v52  ;;  %3222 = vmatpush.msrb.mxu2 %v3349_v52 }
0x101f   :  { %1947 = vmatpush.msra.mxu0 %v3350_v0  ;;  %3223 = vmatpush.msrb.mxu2 %v3350_v0 }
0x1022   :  { %v3353_v2 = vpop.permute.xlu1 %3352 }
0x1023   :  { %v3354_v57 = vunpack.i.l.bf16 %v3353_v2  ;;  %v3355_v14 = vunpack.i.h.bf16 %v3353_v2 }
0x1025   :  { %1948 = vmatpush.msra.mxu0 %v3354_v57  ;;  %3224 = vmatpush.msrb.mxu2 %v3354_v57 }
0x1027   :  { %1949 = vmatpush.msra.mxu0 %v3355_v14  ;;  %3225 = vmatpush.msrb.mxu2 %v3355_v14 }
0x1095   :  { %v1819_v23 = vpop.f32.mrf.mxu2 }
0x1096   :  { %v1820_v59 = vadd.f32 %v4175_v13, %v1819_v23 }
0x1098   :  { %v1825_v60 = vsel %vm524_vm8, %v1820_v59, -inf }
0x1099   :  { %1826 = vmax.xlane.f32.xlu0 %v1825_v60 }
0x109d   :  { %v1822_v48 = vpop.f32.mrf.mxu2 }
0x109e   :  { %v1823_v61 = vadd.f32 %v4182_v62, %v1822_v48  ;;  %v1696_v62 = vld [vmem:[%s4418_s10 + $0x18] sm:$0xff] }
0x109f   :  { %1978 = vmatpush.msra.mxu3 %v1696_v62 }
0x10a0   :  { %v1828_v10 = vsel %vm524_vm8, %v1823_v61, -inf }
0x10a1   :  { %1829 = vmax.xlane.f32.xlu2 %v1828_v10  ;;  %1979 = vmatpush.msra.mxu3 %v1695_v54  ;;  %v3417_v54 = vld [vmem:[%s4428_s17] ss:$0 sm:$0xff] }
0x10a3   :  { %1980 = vmatpush.msra.mxu3 %v1694_v53 }
0x110c   :  { %v1827_v58 = vpop.xlane.xlu0 %1826 }
0x110d   :  { %v1831_v47 = vsub.f32 %v1820_v59, %v1827_v58 }
0x110f   :  { %v1833_v16 = vmul.f32 1.442695, %v1831_v47 }
0x1111   :  { %3483 = vpow2.f32 %v1833_v16 }
0x1114   :  { %v1830_v35 = vpop.xlane.xlu2 %1829 }
0x1115   :  { %v1832_v20 = vsub.f32 %v1823_v61, %v1830_v35 }
0x1117   :  { %v3484_v32 = vpop.eup %3483  ;;  %v1835_v46 = vmul.f32 1.442695, %v1832_v20  ;;  %v1693_v20 = vld [vmem:[%s4418_s10] sm:$0xff] }
0x1118   :  { %3156 = vmatmul.msk.f32.vlgmr.msrb.gmra.mxu3 %vm524_vm8, %v3484_v32 }
0x1119   :  { %3485 = vpow2.f32 %v1835_v46  ;;  %1981 = vmatpush.msra.mxu3 %v1693_v20 }
0x111f   :  { %v3486_v13 = vpop.eup %3485 }
0x1120   :  { %3157 = vmatmul.msk.f32.gmra.mxu3 %vm524_vm8, %v3486_v13 }
0x119b   :  { %v1860_v41 = vpop.f32.mrf.mxu3 }
0x119c   :  { %3487 = vrcp.f32 %v1860_v41  ;;  %v1877_v38 = vand.u32 2147483648, %v1860_v41  ;;  %v1875_v51 = vand.u32 2147483647, %v1860_v41  ;;  %vm1871_vm0 = vweird.f32 %v1860_v41 }
0x119e   :  { %v1878_v0 = vor.u32 1.1754944e-38, %v1877_v38  ;;  %vm1876_vm6 = vcmp.eq.f32.partialorder %v1875_v51, 8.507059e+37 }
0x11a2   :  { %v3488_v42 = vpop.eup %3487 }
0x11a3   :  { %v1867_v55 = vmul.f32 %v3488_v42, %v1860_v41  ;;  %v1863_v19 = vpop.f32.mrf.mxu3  ;;  %vm1872_vm15 = vweird.f32 %v3488_v42 }
0x11a4   :  { %3489 = vrcp.f32 %v1863_v19  ;;  %vm1873_vm5 = vmor %vm1871_vm0, %vm1872_vm15  ;;  %v1892_v60 = vand.u32 2147483648, %v1863_v19  ;;  %v1890_v61 = vand.u32 2147483647, %v1863_v19  ;;  %vm1886_vm9 = vweird.f32 %v1863_v19 }
0x11a5   :  { %v1868_v40 = vsub.f32 1.0, %v1867_v55 }
0x11a6   :  { %v1893_v58 = vor.u32 1.1754944e-38, %v1892_v60  ;;  %vm1891_vm11 = vcmp.eq.f32.partialorder %v1890_v61, 8.507059e+37  ;;  %v2045_v60 = vld [vmem:[%s4458_s28 + $0x10] sm:$0xff]  ;;  %v2043_v61 = vld [vmem:[%s4458_s28] sm:$0xff] }
0x11a7   :  { %v1869_v50 = vmul.f32 %v3488_v42, %v1868_v40 }
0x11a9   :  { %v1870_v56 = vadd.f32 %v3488_v42, %v1869_v50 }
0x11aa   :  { %v3490_v52 = vpop.eup %3489 }
0x11ab   :  { %v1874_v2 = vsel %vm1873_vm5, %v3488_v42, %v1870_v56  ;;  %v1882_v57 = vmul.f32 %v3490_v52, %v1863_v19  ;;  %vm1887_vm7 = vweird.f32 %v3490_v52 }
0x11ac   :  { %v1879_v14 = vsel %vm1876_vm6, %v1878_v0, %v1874_v2  ;;  %vm1888_vm10 = vmor %vm1886_vm9, %vm1887_vm7 }
0x11ad   :  { %v1883_v23 = vsub.f32 1.0, %v1882_v57  ;;  %v1880_v59 = vmul.f32 %v3484_v32, %v1879_v14 }
0x11af   :  { %v1884_v48 = vmul.f32 %v3490_v52, %v1883_v23  ;;  %3158 = vmatmul.msk.f32.vlgmr.msra.gmra.mxu0 %vm524_vm8, %v1880_v59  ;;  %v2046_v59 = vld [vmem:[%s4458_s28 + $0x18] sm:$0xff] }
0x11b0   :  { %2072 = vmatpush.msrb.mxu0 %v2046_v59 }
0x11b1   :  { %v1885_v10 = vadd.f32 %v3490_v52, %v1884_v48  ;;  %v2044_v48 = vld [vmem:[%s4458_s28 + $0x8] sm:$0xff] }
0x11b2   :  { %2073 = vmatpush.msrb.mxu0 %v2045_v60 }
0x11b3   :  { %v1889_v47 = vsel %vm1888_vm10, %v3490_v52, %v1885_v10 }
0x11b4   :  { %v1894_v16 = vsel %vm1891_vm11, %v1893_v58, %v1889_v47  ;;  %2074 = vmatpush.msrb.mxu0 %v2044_v48  ;;  %v3421_v48 = vld [vmem:[%s4491_s4] ss:$0 sm:$0xff] }
0x11b5   :  { %v1895_v35 = vmul.f32 %v3486_v13, %v1894_v16 }
0x11b6   :  { %2075 = vmatpush.msrb.mxu0 %v2043_v61 }
0x11b7   :  { %3159 = vmatmul.msk.f32.vlgmr.msrb.gmra.mxu2 %vm524_vm8, %v1895_v35  ;;  %v2049_v35 = vld [vmem:[%s4472_s18 + $0x8] sm:$0xff] }
0x11b8   :  { %2320 = vmatpush.msra.mxu0 %v4219_v63 }
0x11ba   :  { %2321 = vmatpush.msra.mxu0 %v4223_v26  ;;  %v2051_v26 = vld [vmem:[%s4472_s18 + $0x18] sm:$0xff] }
0x11bb   :  { %2104 = vmatpush.msrb.mxu1 %v2051_v26 }
0x11bc   :  { %2322 = vmatpush.msra.mxu0 %v4227_v12  ;;  %v2050_v12 = vld [vmem:[%s4472_s18 + $0x10] sm:$0xff] }
0x11bd   :  { %2105 = vmatpush.msrb.mxu1 %v2050_v12 }
0x11be   :  { %2323 = vmatpush.msra.mxu0 %v4231_v31 }
0x11bf   :  { %2106 = vmatpush.msrb.mxu1 %v2049_v35 }
0x11c0   :  { %2324 = vmatpush.msra.mxu0 %v4235_v33 }
0x11c2   :  { %2325 = vmatpush.msra.mxu0 %v4239_v25 }
0x11c4   :  { %2326 = vmatpush.msra.mxu0 %v4243_v22 }
0x11c6   :  { %2327 = vmatpush.msra.mxu0 %v4247_v21  ;;  %v3419_v21 = vld [vmem:[%s4312_s24 + $0x1] ss:$0 sm:$0xff] }
0x122c   :  { %v1951_v32 = vpop.f32.mrf.mxu0 }
0x122d   :  { %v1957_v46 = vsel %vm322_vm1, -1e+09, %v1951_v32 }
0x122e   :  { %3160 = vmatmul.msk.f32.vlgmr.msra.gmra.mxu3 %vm353_vm3, %v1957_v46 }
0x123a   :  { %v1954_v62 = vpop.f32.mrf.mxu2 }
0x123b   :  { %v1958_v13 = vsel %vm323_vm2, -1e+09, %v1954_v62  ;;  %v3418_v62 = vld [vmem:[%s4298_s13 + $0x1] ss:$0 sm:$0xff] }
0x123c   :  { %3161 = vmatmul.msk.f32.gmra.mxu3 %vm353_vm3, %v1958_v13 }
0x12b1   :  { %v1983_v53 = vpop.f32.mrf.mxu3 }
0x12b2   :  { %v1984_v41 = vadd.f32 %v3417_v54, %v1983_v53 }
0x12b4   :  { %v1989_v42 = vadd.f32 %v1984_v41, %v4346_v39 }
0x12b6   :  { %v1993_v55 = vsel %vm353_vm3, %v1989_v42, 0.0 }
0x12b7   :  { %1994 = vadd.xlane.f32.xlu1 %v1993_v55 }
0x12bf   :  { %v1986_v19 = vpop.f32.mrf.mxu3 }
0x12c0   :  { %v1987_v40 = vadd.f32 %v3417_v54, %v1986_v19 }
0x12c2   :  { %v1990_v38 = vadd.f32 %v1987_v40, %v4351_v27 }
0x12c4   :  { %v1996_v50 = vsel %vm353_vm3, %v1990_v38, 0.0 }
0x12c5   :  { %1997 = vadd.xlane.f32.xlu0 %v1996_v50 }
0x132a   :  { %v1995_v51 = vpop.xlane.xlu1 %1994 }
0x132b   :  { %v1999_v56 = vmul.f32 %v1995_v51, %v3947_v18 }
0x132d   :  { %v2001_v52 = vsub.f32 %v1989_v42, %v1999_v56 }
0x132f   :  { %v2003_v0 = vmul.f32 %v2001_v52, %v2001_v52 }
0x1331   :  { %v2005_v2 = vsel %vm353_vm3, %v2003_v0, 0.0 }
0x1332   :  { %2006 = vadd.xlane.f32.xlu2 %v2005_v2  ;;  %v2048_v2 = vld [vmem:[%s4472_s18] sm:$0xff] }
0x1333   :  { %2107 = vmatpush.msrb.mxu1 %v2048_v2 }
0x1338   :  { %v1998_v57 = vpop.xlane.xlu0 %1997 }
0x1339   :  { %v2000_v39 = vmul.f32 %v1998_v57, %v3947_v18  ;;  %v3420_v57 = vld [vmem:[%s4453_s27] ss:$0 sm:$0xff] }
0x133b   :  { %v4445_v14 = vsub.f32 %v1990_v38, %v2000_v39 }
0x133d   :  { %v2004_v23 = vmul.f32 %v4445_v14, %v4445_v14 }
0x133f   :  { %v2008_v27 = vsel %vm353_vm3, %v2004_v23, 0.0 }
0x1340   :  { %2009 = vadd.xlane.f32.xlu0 %v2008_v27 }
0x13a5   :  { %v2007_v10 = vpop.xlane.xlu2 %2006 }
0x13a6   :  { %v2011_v58 = vmul.f32 %v2007_v10, %v3947_v18 }
0x13a8   :  { %v2013_v47 = vadd.f32 1e-05, %v2011_v58 }
0x13aa   :  { %3491 = vrsqrt.f32 %v2013_v47  ;;  %vm2021_vm13 = vweird.f32 %v2013_v47 }
0x13b0   :  { %v3492_v63 = vpop.eup %3491 }
0x13b1   :  { %v2016_v16 = vmul.f32 %v3492_v63, %v2013_v47  ;;  %vm2022_vm12 = vweird.f32 %v3492_v63 }
0x13b2   :  { %vm2023_vm15 = vmor %vm2021_vm13, %vm2022_vm12 }
0x13b3   :  { %v2017_v20 = vmul.f32 %v3492_v63, %v2016_v16  ;;  %v2010_v32 = vpop.xlane.xlu0 %2009 }
0x13b4   :  { %v2012_v31 = vmul.f32 %v2010_v32, %v3947_v18 }
0x13b5   :  { %v2018_v33 = vmul.f32 0.5, %v2017_v20 }
0x13b6   :  { %v2014_v25 = vadd.f32 1e-05, %v2012_v31 }
0x13b7   :  { %v2019_v46 = vsub.f32 1.5, %v2018_v33 }
0x13b8   :  { %3493 = vrsqrt.f32 %v2014_v25  ;;  %vm2031_vm5 = vweird.f32 %v2014_v25 }
0x13b9   :  { %v2020_v22 = vmul.f32 %v3492_v63, %v2019_v46 }
0x13bb   :  { %v2024_v13 = vsel %vm2023_vm15, %v3492_v63, %v2020_v22 }
0x13bc   :  { %v2035_v54 = vmul.f32 %v2024_v13, %v2001_v52 }
0x13be   :  { %v3494_v53 = vpop.eup %3493  ;;  %v2038_v41 = vmul.f32 %v3418_v62, %v2035_v54  ;;  %v2172_v54 = vld [vmem:[%s4052_s20 + $0x38] sm:$0xff] }
0x13bf   :  { %v2026_v42 = vmul.f32 %v3494_v53, %v2014_v25  ;;  %vm2032_vm0 = vweird.f32 %v3494_v53  ;;  %2198 = vmatpush.msra.mxu2 %v2172_v54 }
0x13c0   :  { %v2041_v55 = vadd.f32 %v3419_v21, %v2038_v41  ;;  %vm2033_vm6 = vmor %vm2031_vm5, %vm2032_vm0  ;;  %v2169_v41 = vld [vmem:[%s4052_s20 + $0x20] sm:$0xff] }
0x13c1   :  { %v2027_v19 = vmul.f32 %v3494_v53, %v2026_v42 }
0x13c2   :  { %3162 = vmatmul.msk.f32.vlgmr.msrb.gmra.mxu0 %vm353_vm3, %v2041_v55 }
0x13c3   :  { %v2028_v40 = vmul.f32 0.5, %v2027_v19 }
0x13c5   :  { %v2029_v38 = vsub.f32 1.5, %v2028_v40 }
0x13c7   :  { %v2030_v50 = vmul.f32 %v3494_v53, %v2029_v38 }
0x13c9   :  { %v2034_v51 = vsel %vm2033_vm6, %v3494_v53, %v2030_v50  ;;  %v2170_v53 = vld [vmem:[%s4052_s20 + $0x28] sm:$0xff] }
0x13ca   :  { %v2036_v56 = vmul.f32 %v2034_v51, %v4445_v14 }
0x13cc   :  { %v2039_v52 = vmul.f32 %v3418_v62, %v2036_v56 }
0x13ce   :  { %v2042_v0 = vadd.f32 %v3419_v21, %v2039_v52  ;;  %v2171_v21 = vld [vmem:[%s4052_s20 + $0x30] sm:$0xff]  ;;  %s3592_s20 = smov 36  }
0x13cf   :  { %2199 = vmatpush.msra.mxu2 %v2171_v21 }
0x13d0   :  { %3163 = vmatmul.msk.f32.gmra.mxu0 %vm353_vm3, %v2042_v0 }
0x13d1   :  { %2200 = vmatpush.msra.mxu2 %v2170_v53 }
0x13d3   :  { %2201 = vmatpush.msra.mxu2 %v2169_v41 }
0x143f   :  { %v2077_v39 = vpop.f32.mrf.mxu0 }
0x1440   :  { %v2078_v23 = vadd.f32 %v3420_v57, %v2077_v39  ;;  %v3422_v39 = vld [vmem:[%s4298_s13 + $0x2] ss:$0 sm:$0xff] }
0x1442   :  { %v2083_v27 = vmax.f32 %v2078_v23, 0.0 }
0x1444   :  { %3164 = vmatmul.msk.f32.vlgmr.msrb.gmra.mxu1 %vm353_vm3, %v2083_v27 }
0x144d   :  { %v2080_v14 = vpop.f32.mrf.mxu0 }
0x144e   :  { %v2081_v59 = vadd.f32 %v3420_v57, %v2080_v14  ;;  %v3423_v14 = vld [vmem:[%s4312_s24 + $0x2] ss:$0 sm:$0xff] }
0x1450   :  { %v2084_v60 = vmax.f32 %v2081_v59, 0.0 }
0x1452   :  { %3165 = vmatmul.msk.f32.gmra.mxu1 %vm353_vm3, %v2084_v60 }
0x14c1   :  { %v2109_v61 = vpop.f32.mrf.mxu1 }
0x14c2   :  { %v2110_v10 = vadd.f32 %v3421_v48, %v2109_v61 }
0x14c4   :  { %v2115_v58 = vadd.f32 %v2110_v10, %v2041_v55 }
0x14c6   :  { %v2119_v47 = vsel %vm353_vm3, %v2115_v58, 0.0 }
0x14c7   :  { %2120 = vadd.xlane.f32.xlu2 %v2119_v47 }
0x14cf   :  { %v2112_v63 = vpop.f32.mrf.mxu1 }
0x14d0   :  { %v2113_v26 = vadd.f32 %v3421_v48, %v2112_v63 }
0x14d2   :  { %v2116_v12 = vadd.f32 %v2113_v26, %v2042_v0 }
0x14d4   :  { %v2122_v16 = vsel %vm353_vm3, %v2116_v12, 0.0 }
0x14d5   :  { %2123 = vadd.xlane.f32.xlu0 %v2122_v16 }
0x153a   :  { %v2121_v35 = vpop.xlane.xlu2 %2120 }
0x153b   :  { %v2125_v20 = vmul.f32 %v2121_v35, %v3947_v18 }
0x153d   :  { %v2127_v32 = vsub.f32 %v2115_v58, %v2125_v20  ;;  %v3424_v20 = vld [vmem:[%s4069_s29 + $0x1] ss:$0 sm:$0xff] }
0x153f   :  { %v2129_v31 = vmul.f32 %v2127_v32, %v2127_v32 }
0x1541   :  { %v2131_v33 = vsel %vm353_vm3, %v2129_v31, 0.0 }
0x1542   :  { %2132 = vadd.xlane.f32.xlu2 %v2131_v33 }
0x1548   :  { %v2124_v25 = vpop.xlane.xlu0 %2123 }
0x1549   :  { %v2126_v46 = vmul.f32 %v2124_v25, %v3947_v18 }
0x154b   :  { %v2128_v22 = vsub.f32 %v2116_v12, %v2126_v46 }
0x154d   :  { %v2130_v62 = vmul.f32 %v2128_v22, %v2128_v22 }
0x154f   :  { %v2134_v13 = vsel %vm353_vm3, %v2130_v62, 0.0 }
0x1550   :  { %2135 = vadd.xlane.f32.xlu0 %v2134_v13 }
0x15b5   :  { %v2133_v42 = vpop.xlane.xlu2 %2132 }
0x15b6   :  { %v2137_v55 = vmul.f32 %v2133_v42, %v3947_v18 }
0x15b8   :  { %v2139_v19 = vadd.f32 1e-05, %v2137_v55 }
0x15ba   :  { %3495 = vrsqrt.f32 %v2139_v19  ;;  %vm2147_vm9 = vweird.f32 %v2139_v19 }
0x15c0   :  { %v3496_v40 = vpop.eup %3495 }
0x15c1   :  { %v2142_v38 = vmul.f32 %v3496_v40, %v2139_v19  ;;  %vm2148_vm7 = vweird.f32 %v3496_v40 }
0x15c2   :  { %vm2149_vm10 = vmor %vm2147_vm9, %vm2148_vm7 }
0x15c3   :  { %v2143_v50 = vmul.f32 %v3496_v40, %v2142_v38  ;;  %v2136_v51 = vpop.xlane.xlu0 %2135 }
0x15c4   :  { %v2138_v56 = vmul.f32 %v2136_v51, %v3947_v18 }
0x15c5   :  { %v2144_v52 = vmul.f32 0.5, %v2143_v50 }
0x15c6   :  { %v2140_v0 = vadd.f32 1e-05, %v2138_v56 }
0x15c7   :  { %v2145_v2 = vsub.f32 1.5, %v2144_v52 }
0x15c8   :  { %3497 = vrsqrt.f32 %v2140_v0  ;;  %vm2157_vm12 = vweird.f32 %v2140_v0 }
0x15c9   :  { %v2146_v57 = vmul.f32 %v3496_v40, %v2145_v2 }
0x15cb   :  { %v2150_v23 = vsel %vm2149_vm10, %v3496_v40, %v2146_v57 }
0x15cc   :  { %v2161_v27 = vmul.f32 %v2150_v23, %v2127_v32 }
0x15ce   :  { %v3498_v59 = vpop.eup %3497  ;;  %v2164_v60 = vmul.f32 %v3422_v39, %v2161_v27 }
0x15cf   :  { %v2152_v48 = vmul.f32 %v3498_v59, %v2140_v0  ;;  %vm2158_vm11 = vweird.f32 %v3498_v59 }
0x15d0   :  { %v4512_v61 = vadd.f32 %v3423_v14, %v2164_v60  ;;  %vm2159_vm13 = vmor %vm2157_vm12, %vm2158_vm11 }
0x15d1   :  { %v2153_v10 = vmul.f32 %v3498_v59, %v2152_v48 }
0x15d2   :  { %3166 = vmatmul.msk.f32.vlgmr.msra.gmra.mxu2 %vm353_vm3, %v4512_v61 }
0x15d3   :  { %v2154_v58 = vmul.f32 0.5, %v2153_v10 }
0x15d5   :  { %v2155_v47 = vsub.f32 1.5, %v2154_v58 }
0x15d7   :  { %v2156_v63 = vmul.f32 %v3498_v59, %v2155_v47 }
0x15d9   :  { %v2160_v26 = vsel %vm2159_vm13, %v3498_v59, %v2156_v63 }
0x15da   :  { %v2162_v12 = vmul.f32 %v2160_v26, %v2128_v22 }
0x15dc   :  { %v2165_v16 = vmul.f32 %v3422_v39, %v2162_v12 }
0x15de   :  { %v4516_v35 = vadd.f32 %v3423_v14, %v2165_v16 }
0x15e0   :  { %3167 = vmatmul.msk.f32.gmra.mxu2 %vm353_vm3, %v4516_v35 }
0x1655   :  { %v2203_v32 = vpop.f32.mrf.mxu2 }
0x1656   :  { %v2204_v31 = vadd.f32 %v3424_v20, %v2203_v32 }
0x1658   :  { %v2215_v33 = vmul.f32 %v2204_v31, %v3683_v34  ;;  %v2213_v54 = vmul.f32 %v2204_v31, %v3702_v43  ;;  %v2209_v21 = vmul.f32 %v2204_v31, %v3707_v45  ;;  %v2223_v42 = vmul.f32 %v2204_v31, %v3749_v3 }
0x1659   :  { %v2211_v55 = vmul.f32 %v2204_v31, %v3705_v44  ;;  %v2221_v38 = vmul.f32 %v2204_v31, %v3772_v7  ;;  %v2219_v56 = vmul.f32 %v2204_v31, %v3857_v4  ;;  %v2217_v2 = vmul.f32 %v2204_v31, %v3863_v8 }
0x165a   :  { %2245 = vrot.lane.b32.xlu0 %v2215_v33, %s3560_s1 }
0x1663   :  { %v2206_v25 = vpop.f32.mrf.mxu2 }
0x1664   :  { %v2207_v46 = vadd.f32 %v3424_v20, %v2206_v25 }
0x1666   :  { %v2216_v62 = vmul.f32 %v2207_v46, %v3678_v30  ;;  %v2214_v13 = vmul.f32 %v2207_v46, %v3687_v36  ;;  %v2212_v22 = vmul.f32 %v2207_v46, %v3690_v37  ;;  %v2210_v53 = vmul.f32 %v2207_v46, %v3723_v49 }
0x1667   :  { %v2224_v41 = vmul.f32 %v2207_v46, %v3745_v1  ;;  %v2222_v40 = vmul.f32 %v2207_v46, %v3766_v15  ;;  %v2220_v51 = vmul.f32 %v2207_v46, %v3776_v11  ;;  %v2218_v0 = vmul.f32 %v2207_v46, %v3778_v9 }
0x1668   :  { %2247 = vrot.lane.b32.xlu2 %v2216_v62, %s3560_s1  ;;  %2243 = vrot.lane.b32.xlu1 %v2214_v13, %s3560_s1 }
0x1669   :  { %2239 = vrot.lane.b32.xlu0 %v2212_v22, %s3560_s1  ;;  %v3356_v19 = vpack.i.bf16 %v2223_v42, %v2224_v41  ;;  %v3361_v50 = vpack.i.bf16 %v2221_v38, %v2222_v40  ;;  %v3366_v52 = vpack.i.bf16 %v2219_v56, %v2220_v51  ;;  %v3371_v57 = vpack.i.bf16 %v2217_v2, %v2218_v0  ;;  %v2177_v0 = vld [vmem:[%s4212_s16 + $0x38] sm:$0xff]  ;;  %v2176_v2 = vld [vmem:[%s4212_s16 + $0x30] sm:$0xff] }
0x166a   :  { %2447 = vmatpush.msrb.mxu2 %v2177_v0 }
0x166c   :  { %2448 = vmatpush.msrb.mxu2 %v2176_v2 }
0x1670   :  { %2241 = vrot.lane.b32.xlu2 %v2213_v54, %s3560_s1  ;;  %2233 = vrot.lane.b32.xlu1 %v2209_v21, %s3560_s1 }
0x1671   :  { %2235 = vrot.lane.b32.xlu0 %v2210_v53, %s3560_s1 }
0x1678   :  { %2237 = vrot.lane.b32.xlu2 %v2211_v55, %s3560_s1  ;;  %3357 = vrot.lane.b32.xlu1 %v3356_v19, %s3562_s6 }
0x1680   :  { %3362 = vrot.lane.b32.xlu1 %v3361_v50, %s3562_s6 }
0x1688   :  { %3367 = vrot.lane.b32.xlu1 %v3366_v52, %s3562_s6 }
0x1690   :  { %3372 = vrot.lane.b32.xlu1 %v3371_v57, %s3562_s6  ;;  %v2175_v57 = vld [vmem:[%s4212_s16 + $0x28] sm:$0xff] }
0x1691   :  { %2449 = vmatpush.msrb.mxu2 %v2175_v57 }
0x16c2   :  { %v2248_v39 = vpop.permute.xlu2 %2247 }
0x16c3   :  { %3168 = vmatpush.xpose.msk.msrb.mxu3 %vm353_vm3, %v2248_v39 }
0x16ca   :  { %v2242_v14 = vpop.permute.xlu2 %2241 }
0x16cc   :  { %v2246_v23 = vpop.permute.xlu0 %2245 }
0x16cd   :  { %3169 = vmatpush.xpose.msk.msrb.mxu3 %vm353_vm3, %v2246_v23  ;;  %v2174_v23 = vld [vmem:[%s4212_s16 + $0x20] sm:$0xff] }
0x16ce   :  { %2450 = vmatpush.msrb.mxu2 %v2174_v23  ;;  %v3425_v23 = vld [vmem:[%s4256_s3 + $0x1] ss:$0 sm:$0xff]  ;;  %s3065_s3 = sld [smem:[%s4734_s0 + %s3592_s20]]  }
0x16d2   :  { %v2238_v48 = vpop.permute.xlu2 %2237 }
0x16da   :  { %v2244_v27 = vpop.permute.xlu1 %2243 }
0x16db   :  { %3170 = vmatpush.xpose.msk.msrb.mxu3 %vm353_vm3, %v2244_v27  ;;  %v2240_v59 = vpop.permute.xlu0 %2239  ;;  %v3543_v27 = vld [vmem:[%s3791_s23 + $0x38] sm:$0xff] }
0x16dc   :  { %2669 = vmatpush.msra.mxu2 %v3543_v27 }
0x16df   :  { %3171 = vmatpush.xpose.msk.msrb.mxu3 %vm353_vm3, %v2242_v14  ;;  %v3544_v14 = vld [vmem:[%s3791_s23 + $0x30] sm:$0xff] }
0x16e0   :  { %2670 = vmatpush.msra.mxu2 %v3544_v14 }
0x16e2   :  { %v2234_v60 = vpop.permute.xlu1 %2233 }
0x16e3   :  { %3172 = vmatpush.xpose.msk.msrb.mxu3 %vm353_vm3, %v2240_v59  ;;  %v2236_v10 = vpop.permute.xlu0 %2235 }
0x16e7   :  { %3173 = vmatpush.xpose.msk.msrb.mxu3 %vm353_vm3, %v2238_v48 }
0x16ea   :  { %v3358_v58 = vpop.permute.xlu1 %3357 }
0x16eb   :  { %v3359_v47 = vunpack.i.l.bf16 %v3358_v58  ;;  %3174 = vmatpush.xpose.msk.msrb.mxu3 %vm353_vm3, %v2236_v10  ;;  %v3360_v63 = vunpack.i.h.bf16 %v3358_v58  ;;  %v3545_v10 = vld [vmem:[%s3791_s23 + $0x28] sm:$0xff] }
0x16ec   :  { %2671 = vmatpush.msra.mxu2 %v3545_v10 }
0x16ed   :  { %2411 = vmatpush.msra.mxu1 %v3359_v47  ;;  %v3546_v47 = vld [vmem:[%s3791_s23 + $0x20] sm:$0xff] }
0x16ee   :  { %2672 = vmatpush.msra.mxu2 %v3546_v47 }
0x16ef   :  { %3175 = vmatpush.xpose.msk.msrb.mxu3 %vm353_vm3, %v2234_v60  ;;  %2412 = vmatpush.msra.mxu1 %v3360_v63 }
0x16f2   :  { %v3363_v26 = vpop.permute.xlu1 %3362  ;;  %3176 = vmatmul.msk.f32.vlgmr.msrb.gmra.mxu3 %vm353_vm3, %v2204_v31  ;;  %v4560_v31 = vld [vmem:[%s3786_s19] sm:$0xff] }
0x16f3   :  { %v3364_v12 = vunpack.i.l.bf16 %v3363_v26  ;;  %v3365_v16 = vunpack.i.h.bf16 %v3363_v26 }
0x16f5   :  { %2413 = vmatpush.msra.mxu1 %v3364_v12 }
0x16f7   :  { %2414 = vmatpush.msra.mxu1 %v3365_v16  ;;  %v3547_v16 = vld [vmem:[%s3791_s23 + $0x18] sm:$0xff] }
0x16f8   :  { %2673 = vmatpush.msra.mxu2 %v3547_v16 }
0x16fa   :  { %v3368_v20 = vpop.permute.xlu1 %3367  ;;  %3177 = vmatmul.msk.f32.gmra.mxu3 %vm353_vm3, %v2207_v46  ;;  %v4565_v46 = vld [vmem:[%s3786_s19 + $0x8] sm:$0xff] }
0x16fb   :  { %v3369_v32 = vunpack.i.l.bf16 %v3368_v20  ;;  %v3370_v33 = vunpack.i.h.bf16 %v3368_v20 }
0x16fd   :  { %2415 = vmatpush.msra.mxu1 %v3369_v32  ;;  %v3548_v32 = vld [vmem:[%s3791_s23 + $0x10] sm:$0xff] }
0x16fe   :  { %2674 = vmatpush.msra.mxu2 %v3548_v32  ;;  %v2515_v32 = vld [vmem:[%s4334_s8 + $0x38] sm:$0xff] }
0x16ff   :  { %2416 = vmatpush.msra.mxu1 %v3370_v33  ;;  %2541 = vmatpush.msrb.mxu0 %v2515_v32 }
0x1702   :  { %v3373_v25 = vpop.permute.xlu1 %3372 }
0x1703   :  { %v3374_v62 = vunpack.i.l.bf16 %v3373_v25  ;;  %v3375_v13 = vunpack.i.h.bf16 %v3373_v25 }
0x1705   :  { %2417 = vmatpush.msra.mxu1 %v3374_v62 }
0x1707   :  { %2418 = vmatpush.msra.mxu1 %v3375_v13 }
0x1775   :  { %v2288_v22 = vpop.f32.mrf.mxu3 }
0x1776   :  { %v2289_v54 = vadd.f32 %v4560_v31, %v2288_v22  ;;  %v3549_v22 = vld [vmem:[%s3791_s23 + $0x8] sm:$0xff] }
0x1777   :  { %2675 = vmatpush.msra.mxu2 %v3549_v22 }
0x1778   :  { %v2294_v21 = vsel %vm524_vm8, %v2289_v54, -inf }
0x1779   :  { %2295 = vmax.xlane.f32.xlu2 %v2294_v21 }
0x177d   :  { %v2291_v53 = vpop.f32.mrf.mxu3 }
0x177e   :  { %v2292_v41 = vadd.f32 %v4565_v46, %v2291_v53 }
0x1780   :  { %v2297_v42 = vsel %vm524_vm8, %v2292_v41, -inf }
0x1781   :  { %2298 = vmax.xlane.f32.xlu0 %v2297_v42 }
0x17ec   :  { %v2296_v55 = vpop.xlane.xlu2 %2295 }
0x17ed   :  { %v2300_v19 = vsub.f32 %v2289_v54, %v2296_v55 }
0x17ef   :  { %v2302_v40 = vmul.f32 1.442695, %v2300_v19 }
0x17f1   :  { %3499 = vpow2.f32 %v2302_v40 }
0x17f4   :  { %v2299_v38 = vpop.xlane.xlu0 %2298 }
0x17f5   :  { %v2301_v50 = vsub.f32 %v2292_v41, %v2299_v38  ;;  %v3550_v41 = vld [vmem:[%s3791_s23] sm:$0xff] }
0x17f6   :  { %2676 = vmatpush.msra.mxu2 %v3550_v41 }
0x17f7   :  { %v3500_v51 = vpop.eup %3499  ;;  %v2304_v56 = vmul.f32 1.442695, %v2301_v50 }
0x17f8   :  { %3178 = vmatmul.msk.f32.vlgmr.msra.gmra.mxu0 %vm524_vm8, %v3500_v51 }
0x17f9   :  { %3501 = vpow2.f32 %v2304_v56 }
0x17ff   :  { %v3502_v52 = vpop.eup %3501 }
0x1800   :  { %3179 = vmatmul.msk.f32.gmra.mxu0 %vm524_vm8, %v3502_v52 }
0x1875   :  { %v2329_v39 = vpop.f32.mrf.mxu0 }
0x1876   :  { %3503 = vrcp.f32 %v2329_v39  ;;  %v2346_v63 = vand.u32 2147483648, %v2329_v39  ;;  %v2344_v12 = vand.u32 2147483647, %v2329_v39  ;;  %vm2340_vm0 = vweird.f32 %v2329_v39 }
0x1878   :  { %v2347_v25 = vor.u32 1.1754944e-38, %v2346_v63  ;;  %vm2345_vm6 = vcmp.eq.f32.partialorder %v2344_v12, 8.507059e+37 }
0x187c   :  { %v3504_v59 = vpop.eup %3503 }
0x187d   :  { %v2336_v60 = vmul.f32 %v3504_v59, %v2329_v39  ;;  %v2332_v48 = vpop.f32.mrf.mxu0  ;;  %vm2341_vm15 = vweird.f32 %v3504_v59 }
0x187e   :  { %3505 = vrcp.f32 %v2332_v48  ;;  %vm2342_vm5 = vmor %vm2340_vm0, %vm2341_vm15  ;;  %v2361_v42 = vand.u32 2147483648, %v2332_v48  ;;  %v2359_v19 = vand.u32 2147483647, %v2332_v48  ;;  %vm2355_vm9 = vweird.f32 %v2332_v48 }
0x187f   :  { %v2337_v58 = vsub.f32 1.0, %v2336_v60 }
0x1880   :  { %v2362_v38 = vor.u32 1.1754944e-38, %v2361_v42  ;;  %vm2360_vm11 = vcmp.eq.f32.partialorder %v2359_v19, 8.507059e+37 }
0x1881   :  { %v2338_v26 = vmul.f32 %v3504_v59, %v2337_v58 }
0x1883   :  { %v2339_v20 = vadd.f32 %v3504_v59, %v2338_v26 }
0x1884   :  { %v3506_v33 = vpop.eup %3505 }
0x1885   :  { %v2343_v62 = vsel %vm2342_vm5, %v3504_v59, %v2339_v20  ;;  %v2351_v13 = vmul.f32 %v3506_v33, %v2332_v48  ;;  %vm2356_vm7 = vweird.f32 %v3506_v33 }
0x1886   :  { %v2348_v54 = vsel %vm2345_vm6, %v2347_v25, %v2343_v62  ;;  %vm2357_vm10 = vmor %vm2355_vm9, %vm2356_vm7  ;;  %v2513_v25 = vld [vmem:[%s4334_s8 + $0x28] sm:$0xff]  ;;  %v2512_v62 = vld [vmem:[%s4334_s8 + $0x20] sm:$0xff] }
0x1887   :  { %v2352_v21 = vsub.f32 1.0, %v2351_v13  ;;  %v2349_v53 = vmul.f32 %v3500_v51, %v2348_v54 }
0x1889   :  { %v2353_v55 = vmul.f32 %v3506_v33, %v2352_v21  ;;  %3180 = vmatmul.msk.f32.vlgmr.msra.gmra.mxu1 %vm524_vm8, %v2349_v53 }
0x188b   :  { %v2354_v40 = vadd.f32 %v3506_v33, %v2353_v55 }
0x188d   :  { %v2358_v50 = vsel %vm2357_vm10, %v3506_v33, %v2354_v40  ;;  %v2514_v33 = vld [vmem:[%s4334_s8 + $0x30] sm:$0xff] }
0x188e   :  { %v2363_v56 = vsel %vm2360_vm11, %v2362_v38, %v2358_v50  ;;  %2542 = vmatpush.msrb.mxu0 %v2514_v33 }
0x188f   :  { %v2364_v0 = vmul.f32 %v3502_v52, %v2363_v56 }
0x1890   :  { %2543 = vmatpush.msrb.mxu0 %v2513_v25 }
0x1891   :  { %3181 = vmatmul.msk.f32.gmra.mxu1 %vm524_vm8, %v2364_v0 }
0x1892   :  { %2544 = vmatpush.msrb.mxu0 %v2512_v62 }
0x1906   :  { %v2420_v51 = vpop.f32.mrf.mxu1 }
0x1907   :  { %v2426_v2 = vsel %vm4266_vm14, -1e+09, %v2420_v51  ;;  %v3426_v51 = vld [vmem:[%s4298_s13 + $0x3] ss:$0 sm:$0xff] }
0x1908   :  { %3182 = vmatmul.msk.f32.vlgmr.msrb.gmra.mxu2 %vm353_vm3, %v2426_v2 }
0x190e   :  { %v2423_v57 = vpop.f32.mrf.mxu1 }
0x190f   :  { %v2427_v39 = vsel %vm4273_vm4, -1e+09, %v2423_v57 }
0x1910   :  { %3183 = vmatmul.msk.f32.gmra.mxu2 %vm353_vm3, %v2427_v39 }
0x198b   :  { %v2452_v27 = vpop.f32.mrf.mxu2 }
0x198c   :  { %v2453_v14 = vadd.f32 %v3425_v23, %v2452_v27 }
0x198e   :  { %v2458_v59 = vadd.f32 %v2453_v14, %v4512_v61 }
0x1990   :  { %v2462_v52 = vsel %vm353_vm3, %v2458_v59, 0.0 }
0x1991   :  { %2463 = vadd.xlane.f32.xlu1 %v2462_v52 }
0x1993   :  { %v2455_v60 = vpop.f32.mrf.mxu2 }
0x1994   :  { %v2456_v48 = vadd.f32 %v3425_v23, %v2455_v60  ;;  %v3427_v23 = vld [vmem:[%s4312_s24 + $0x3] ss:$0 sm:$0xff] }
0x1996   :  { %v2459_v6 = vadd.f32 %v2456_v48, %v4516_v35 }
0x1998   :  { %v2465_v10 = vsel %vm353_vm3, %v2459_v6, 0.0 }
0x1999   :  { %2466 = vadd.xlane.f32.xlu2 %v2465_v10 }
0x1a04   :  { %v2464_v5 = vpop.xlane.xlu1 %2463 }
0x1a05   :  { %v2468_v58 = vmul.f32 %v2464_v5, %v3947_v18 }
0x1a07   :  { %v2470_v47 = vsub.f32 %v2458_v59, %v2468_v58  ;;  %v3428_v58 = vld [vmem:[%s4329_s7 + $0x1] ss:$0 sm:$0xff] }
0x1a09   :  { %v2472_v63 = vmul.f32 %v2470_v47, %v2470_v47 }
0x1a0b   :  { %v2474_v61 = vsel %vm353_vm3, %v2472_v63, 0.0 }
0x1a0c   :  { %2475 = vadd.xlane.f32.xlu0 %v2474_v61  ;;  %v2467_v26 = vpop.xlane.xlu2 %2466 }
0x1a0d   :  { %v2469_v12 = vmul.f32 %v2467_v26, %v3947_v18 }
0x1a0f   :  { %v2471_v16 = vsub.f32 %v2459_v6, %v2469_v12 }
0x1a11   :  { %v2473_v20 = vmul.f32 %v2471_v16, %v2471_v16 }
0x1a13   :  { %v2477_v35 = vsel %vm353_vm3, %v2473_v20, 0.0 }
0x1a14   :  { %2478 = vadd.xlane.f32.xlu2 %v2477_v35 }
0x1a7f   :  { %v2476_v13 = vpop.xlane.xlu0 %2475 }
0x1a80   :  { %v2480_v22 = vmul.f32 %v2476_v13, %v3947_v18 }
0x1a82   :  { %v2482_v54 = vadd.f32 1e-05, %v2480_v22 }
0x1a84   :  { %3507 = vrsqrt.f32 %v2482_v54  ;;  %vm2490_vm4 = vweird.f32 %v2482_v54 }
0x1a87   :  { %v2479_v21 = vpop.xlane.xlu2 %2478 }
0x1a88   :  { %v2481_v53 = vmul.f32 %v2479_v21, %v3947_v18 }
0x1a8a   :  { %v3508_v41 = vpop.eup %3507  ;;  %v2483_v42 = vadd.f32 1e-05, %v2481_v53 }
0x1a8b   :  { %v2485_v55 = vmul.f32 %v3508_v41, %v2482_v54  ;;  %vm2491_vm14 = vweird.f32 %v3508_v41 }
0x1a8c   :  { %3509 = vrsqrt.f32 %v2483_v42  ;;  %vm2492_vm12 = vmor %vm2490_vm4, %vm2491_vm14  ;;  %vm2500_vm15 = vweird.f32 %v2483_v42 }
0x1a8d   :  { %v2486_v19 = vmul.f32 %v3508_v41, %v2485_v55 }
0x1a8f   :  { %v2487_v40 = vmul.f32 0.5, %v2486_v19 }
0x1a91   :  { %v2488_v38 = vsub.f32 1.5, %v2487_v40 }
0x1a92   :  { %v3510_v50 = vpop.eup %3509 }
0x1a93   :  { %v2489_v56 = vmul.f32 %v3508_v41, %v2488_v38  ;;  %v2495_v0 = vmul.f32 %v3510_v50, %v2483_v42  ;;  %vm2501_vm13 = vweird.f32 %v3510_v50 }
0x1a94   :  { %vm2502_vm0 = vmor %vm2500_vm15, %vm2501_vm13 }
0x1a95   :  { %v2493_v2 = vsel %vm2492_vm12, %v3508_v41, %v2489_v56  ;;  %v2496_v57 = vmul.f32 %v3510_v50, %v2495_v0 }
0x1a96   :  { %v2504_v39 = vmul.f32 %v2493_v2, %v2470_v47 }
0x1a97   :  { %v2497_v27 = vmul.f32 0.5, %v2496_v57 }
0x1a98   :  { %v2507_v14 = vmul.f32 %v3426_v51, %v2504_v39 }
0x1a99   :  { %v2498_v59 = vsub.f32 1.5, %v2497_v27 }
0x1a9a   :  { %v4608_v52 = vadd.f32 %v3427_v23, %v2507_v14 }
0x1a9b   :  { %v2499_v60 = vmul.f32 %v3510_v50, %v2498_v59 }
0x1a9c   :  { %3184 = vmatmul.msk.f32.vlgmr.msrb.gmra.mxu0 %vm353_vm3, %v4608_v52 }
0x1a9d   :  { %v2503_v48 = vsel %vm2502_vm0, %v3510_v50, %v2499_v60 }
0x1a9e   :  { %v2505_v6 = vmul.f32 %v2503_v48, %v2471_v16 }
0x1aa0   :  { %v2508_v10 = vmul.f32 %v3426_v51, %v2505_v6 }
0x1aa2   :  { %v4612_v5 = vadd.f32 %v3427_v23, %v2508_v10 }
0x1aa4   :  { %3185 = vmatmul.msk.f32.gmra.mxu0 %vm353_vm3, %v4612_v5 }
0x1aac   :  { %3186 = vmatmul.msk.f32.gmra.mxu0 %vm353_vm3, %v4358_v17 }
0x1ab4   :  { %3187 = vmatmul.msk.f32.gmra.mxu0 %vm353_vm3, %v4363_v29 }
0x1b19   :  { %v2546_v47 = vpop.f32.mrf.mxu0 }
0x1b1a   :  { %v4621_v63 = vadd.f32 %v3428_v58, %v2546_v47 }
0x1b21   :  { %v2549_v61 = vpop.f32.mrf.mxu0 }
0x1b22   :  { %v4623_v26 = vadd.f32 %v3428_v58, %v2549_v61 }
0x1b29   :  { %v2552_v12 = vpop.f32.mrf.mxu0 }
0x1b2a   :  { %v2553_v16 = vadd.f32 %v3428_v58, %v2552_v12  ;;  %v2519_v12 = vld [vmem:[%s4418_s10 + $0x30] sm:$0xff] }
0x1b2c   :  { %v2564_v20 = vmul.f32 %v2553_v16, %v3683_v34  ;;  %v2562_v35 = vmul.f32 %v2553_v16, %v3702_v43  ;;  %v2560_v33 = vmul.f32 %v2553_v16, %v3705_v44  ;;  %v2572_v25 = vmul.f32 %v2553_v16, %v3749_v3 }
0x1b2d   :  { %v2558_v22 = vmul.f32 %v2553_v16, %v3707_v45  ;;  %v2568_v54 = vmul.f32 %v2553_v16, %v3857_v4 }
0x1b2e   :  { %2594 = vrot.lane.b32.xlu2 %v2564_v20, %s3560_s1  ;;  %2590 = vrot.lane.b32.xlu1 %v2562_v35, %s3560_s1  ;;  %v2517_v35 = vld [vmem:[%s4418_s10 + $0x20] sm:$0xff] }
0x1b31   :  { %v2555_v17 = vpop.f32.mrf.mxu0 }
0x1b32   :  { %v2556_v32 = vadd.f32 %v3428_v58, %v2555_v17 }
0x1b34   :  { %v2565_v29 = vmul.f32 %v2556_v32, %v3678_v30  ;;  %v2573_v62 = vmul.f32 %v2556_v32, %v3745_v1  ;;  %v2571_v43 = vmul.f32 %v2556_v32, %v3766_v15  ;;  %v2563_v13 = vmul.f32 %v2556_v32, %v3687_v36 }
0x1b35   :  { %v2570_v30 = vmul.f32 %v2553_v16, %v3772_v7  ;;  %v2569_v1 = vmul.f32 %v2556_v32, %v3776_v11  ;;  %v2561_v3 = vmul.f32 %v2556_v32, %v3690_v37  ;;  %v2567_v45 = vmul.f32 %v2556_v32, %v3778_v9 }
0x1b36   :  { %2596 = vrot.lane.b32.xlu0 %v2565_v29, %s3560_s1  ;;  %2586 = vrot.lane.b32.xlu2 %v2560_v33, %s3560_s1  ;;  %v3376_v34 = vpack.i.bf16 %v2572_v25, %v2573_v62  ;;  %v2559_v15 = vmul.f32 %v2556_v32, %v3723_v49  ;;  %v2566_v7 = vmul.f32 %v2553_v16, %v3863_v8  ;;  %v2518_v16 = vld [vmem:[%s4418_s10 + $0x28] sm:$0xff] }
0x1b37   :  { %v3381_v44 = vpack.i.bf16 %v2570_v30, %v2571_v43  ;;  %v3386_v36 = vpack.i.bf16 %v2568_v54, %v2569_v1 }
0x1b38   :  { %3377 = vrot.lane.b32.xlu1 %v3376_v34, %s3562_s6  ;;  %v3391_v21 = vpack.i.bf16 %v2566_v7, %v2567_v45 }
0x1b3e   :  { %2592 = vrot.lane.b32.xlu0 %v2563_v13, %s3560_s1  ;;  %2582 = vrot.lane.b32.xlu2 %v2558_v22, %s3560_s1 }
0x1b40   :  { %3382 = vrot.lane.b32.xlu1 %v3381_v44, %s3562_s6 }
0x1b46   :  { %2588 = vrot.lane.b32.xlu0 %v2561_v3, %s3560_s1 }
0x1b48   :  { %3387 = vrot.lane.b32.xlu1 %v3386_v36, %s3562_s6 }
0x1b4e   :  { %2584 = vrot.lane.b32.xlu0 %v2559_v15, %s3560_s1  ;;  %s3591_s1 = smov 37  }
0x1b4f   :  { %s4719_s23 = sld [smem:[%s4734_s0 + %s3591_s1]]  }
0x1b50   :  { %3392 = vrot.lane.b32.xlu1 %v3391_v21, %s3562_s6 }
0x1b88   :  { %v2595_v41 = vpop.permute.xlu2 %2594 }
0x1b90   :  { %v2587_v40 = vpop.permute.xlu2 %2586 }
0x1b98   :  { %v2583_v57 = vpop.permute.xlu2 %2582 }
0x1ba0   :  { %v2591_v11 = vpop.permute.xlu1 %2590 }
0x1ba8   :  { %v2597_v37 = vpop.permute.xlu0 %2596 }
0x1ba9   :  { %3188 = vmatpush.xpose.msk.msrb.mxu1 %vm353_vm3, %v2597_v37 }
0x1baa   :  { %v3378_v4 = vpop.permute.xlu1 %3377 }
0x1bab   :  { %v3379_v53 = vunpack.i.l.bf16 %v3378_v4  ;;  %v3380_v42 = vunpack.i.h.bf16 %v3378_v4 }
0x1bad   :  { %3189 = vmatpush.xpose.msk.msrb.mxu1 %vm353_vm3, %v2595_v41  ;;  %2760 = vmatpush.msra.mxu3 %v3379_v53 }
0x1baf   :  { %2761 = vmatpush.msra.mxu3 %v3380_v42 }
0x1bb0   :  { %v2593_v49 = vpop.permute.xlu0 %2592 }
0x1bb1   :  { %3190 = vmatpush.xpose.msk.msrb.mxu1 %vm353_vm3, %v2593_v49 }
0x1bb2   :  { %v3383_v9 = vpop.permute.xlu1 %3382 }
0x1bb3   :  { %v3384_v8 = vunpack.i.l.bf16 %v3383_v9  ;;  %v3385_v55 = vunpack.i.h.bf16 %v3383_v9  ;;  %v3429_v9 = vld [vmem:[%s4428_s17 + $0x1] ss:$0 sm:$0xff] }
0x1bb5   :  { %3191 = vmatpush.xpose.msk.msrb.mxu1 %vm353_vm3, %v2591_v11  ;;  %2762 = vmatpush.msra.mxu3 %v3384_v8 }
0x1bb7   :  { %2763 = vmatpush.msra.mxu3 %v3385_v55 }
0x1bb8   :  { %v2589_v19 = vpop.permute.xlu0 %2588 }
0x1bb9   :  { %3192 = vmatpush.xpose.msk.msrb.mxu1 %vm353_vm3, %v2589_v19 }
0x1bba   :  { %v3388_v38 = vpop.permute.xlu1 %3387 }
0x1bbb   :  { %v3389_v50 = vunpack.i.l.bf16 %v3388_v38  ;;  %v3390_v56 = vunpack.i.h.bf16 %v3388_v38 }
0x1bbd   :  { %3193 = vmatpush.xpose.msk.msrb.mxu1 %vm353_vm3, %v2587_v40  ;;  %2764 = vmatpush.msra.mxu3 %v3389_v50 }
0x1bbf   :  { %2765 = vmatpush.msra.mxu3 %v3390_v56 }
0x1bc0   :  { %v2585_v0 = vpop.permute.xlu0 %2584 }
0x1bc1   :  { %3194 = vmatpush.xpose.msk.msrb.mxu1 %vm353_vm3, %v2585_v0 }
0x1bc2   :  { %v3393_v51 = vpop.permute.xlu1 %3392 }
0x1bc3   :  { %v3394_v2 = vunpack.i.l.bf16 %v3393_v51  ;;  %v3395_v39 = vunpack.i.h.bf16 %v3393_v51 }
0x1bc5   :  { %3195 = vmatpush.xpose.msk.msrb.mxu1 %vm353_vm3, %v2583_v57  ;;  %2766 = vmatpush.msra.mxu3 %v3394_v2 }
0x1bc7   :  { %2767 = vmatpush.msra.mxu3 %v3395_v39 }
0x1bc8   :  { %3196 = vmatmul.msk.f32.vlgmr.msrb.gmra.mxu1 %vm353_vm3, %v4621_v63 }
0x1bd0   :  { %3197 = vmatmul.msk.f32.gmra.mxu1 %vm353_vm3, %v4623_v26 }
0x1c45   :  { %v2637_v23 = vpop.f32.mrf.mxu1 }
0x1c46   :  { %v2638_v27 = vadd.f32 %v4560_v31, %v2637_v23 }
0x1c48   :  { %v2643_v14 = vsel %vm524_vm8, %v2638_v27, -inf }
0x1c49   :  { %2644 = vmax.xlane.f32.xlu0 %v2643_v14  ;;  %v2864_v14 = vld [vmem:[%s4458_s28 + $0x38] sm:$0xff] }
0x1c4a   :  { %2890 = vmatpush.msrb.mxu3 %v2864_v14  ;;  %v2989_v14 = vld [vmem:[%s3065_s3 + $0x10] sm:$0xff] }
0x1c4d   :  { %v2640_v59 = vpop.f32.mrf.mxu1 }
0x1c4e   :  { %v2641_v60 = vadd.f32 %v4565_v46, %v2640_v59  ;;  %v2520_v46 = vld [vmem:[%s4418_s10 + $0x38] sm:$0xff]  ;;  %v2863_v59 = vld [vmem:[%s4458_s28 + $0x30] sm:$0xff] }
0x1c4f   :  { %2796 = vmatpush.msrb.mxu2 %v2520_v46  ;;  %2891 = vmatpush.msrb.mxu3 %v2863_v59  ;;  %v2866_v46 = vld [vmem:[%s4472_s18 + $0x20] sm:$0xff]  ;;  %v2988_v59 = vld [vmem:[%s3065_s3 + $0x8] sm:$0xff] }
0x1c50   :  { %v2646_v48 = vsel %vm524_vm8, %v2641_v60, -inf }
0x1c51   :  { %2647 = vmax.xlane.f32.xlu2 %v2646_v48  ;;  %2797 = vmatpush.msrb.mxu2 %v2519_v12  ;;  %v2861_v48 = vld [vmem:[%s4458_s28 + $0x20] sm:$0xff] }
0x1c53   :  { %2798 = vmatpush.msrb.mxu2 %v2518_v16 }
0x1c55   :  { %2799 = vmatpush.msrb.mxu2 %v2517_v35 }
0x1cbc   :  { %v2645_v6 = vpop.xlane.xlu0 %2644 }
0x1cbd   :  { %v2649_v10 = vsub.f32 %v2638_v27, %v2645_v6 }
0x1cbf   :  { %v2651_v58 = vmul.f32 1.442695, %v2649_v10 }
0x1cc1   :  { %3511 = vpow2.f32 %v2651_v58 }
0x1cc4   :  { %v2648_v47 = vpop.xlane.xlu2 %2647 }
0x1cc5   :  { %v2650_v63 = vsub.f32 %v2641_v60, %v2648_v47  ;;  %v2862_v60 = vld [vmem:[%s4458_s28 + $0x28] sm:$0xff]  ;;  %v2869_v47 = vld [vmem:[%s4472_s18 + $0x38] sm:$0xff] }
0x1cc6   :  { %2892 = vmatpush.msrb.mxu3 %v2862_v60  ;;  %2922 = vmatpush.msra.mxu0 %v2869_v47  ;;  %v2987_v60 = vld [vmem:[%s3065_s3] sm:$0xff] }
0x1cc7   :  { %v3512_v31 = vpop.eup %3511  ;;  %v2653_v61 = vmul.f32 1.442695, %v2650_v63  ;;  %v2868_v63 = vld [vmem:[%s4472_s18 + $0x30] sm:$0xff] }
0x1cc8   :  { %3198 = vmatmul.msk.f32.vlgmr.msra.gmra.mxu2 %vm524_vm8, %v3512_v31  ;;  %2893 = vmatpush.msrb.mxu3 %v2861_v48 }
0x1cc9   :  { %3513 = vpow2.f32 %v2653_v61  ;;  %2923 = vmatpush.msra.mxu0 %v2868_v63 }
0x1ccf   :  { %v3514_v26 = vpop.eup %3513 }
0x1cd0   :  { %3199 = vmatmul.msk.f32.gmra.mxu2 %vm524_vm8, %v3514_v26 }
0x1d4b   :  { %v2678_v20 = vpop.f32.mrf.mxu2 }
0x1d4c   :  { %3515 = vrcp.f32 %v2678_v20  ;;  %v2695_v25 = vand.u32 2147483648, %v2678_v20  ;;  %v2693_v34 = vand.u32 2147483647, %v2678_v20  ;;  %vm2689_vm6 = vweird.f32 %v2678_v20 }
0x1d4e   :  { %v2696_v22 = vor.u32 1.1754944e-38, %v2695_v25  ;;  %vm2694_vm9 = vcmp.eq.f32.partialorder %v2693_v34, 8.507059e+37 }
0x1d52   :  { %v3516_v17 = vpop.eup %3515 }
0x1d53   :  { %v2685_v32 = vmul.f32 %v3516_v17, %v2678_v20  ;;  %v2681_v29 = vpop.f32.mrf.mxu2  ;;  %vm2690_vm5 = vweird.f32 %v3516_v17 }
0x1d54   :  { %3517 = vrcp.f32 %v2681_v29  ;;  %vm2691_vm7 = vmor %vm2689_vm6, %vm2690_vm5  ;;  %v2710_v36 = vand.u32 2147483648, %v2681_v29  ;;  %v2708_v15 = vand.u32 2147483647, %v2681_v29  ;;  %vm2704_vm11 = vweird.f32 %v2681_v29 }
0x1d55   :  { %v2686_v33 = vsub.f32 1.0, %v2685_v32 }
0x1d56   :  { %v2711_v21 = vor.u32 1.1754944e-38, %v2710_v36  ;;  %vm2709_vm4 = vcmp.eq.f32.partialorder %v2708_v15, 8.507059e+37 }
0x1d57   :  { %v2687_v62 = vmul.f32 %v3516_v17, %v2686_v33 }
0x1d59   :  { %v2688_v43 = vadd.f32 %v3516_v17, %v2687_v62  ;;  %v3430_v62 = vld [vmem:[%s4298_s13 + $0x4] ss:$0 sm:$0xff] }
0x1d5a   :  { %v3518_v13 = vpop.eup %3517 }
0x1d5b   :  { %v2692_v30 = vsel %vm2691_vm7, %v3516_v17, %v2688_v43  ;;  %v2700_v44 = vmul.f32 %v3518_v13, %v2681_v29  ;;  %vm2705_vm10 = vweird.f32 %v3518_v13 }
0x1d5c   :  { %v2697_v1 = vsel %vm2694_vm9, %v2696_v22, %v2692_v30  ;;  %vm2706_vm14 = vmor %vm2704_vm11, %vm2705_vm10  ;;  %v3431_v22 = vld [vmem:[%s4312_s24 + $0x4] ss:$0 sm:$0xff] }
0x1d5d   :  { %v2701_v3 = vsub.f32 1.0, %v2700_v44  ;;  %v2698_v54 = vmul.f32 %v3512_v31, %v2697_v1  ;;  %v2867_v31 = vld [vmem:[%s4472_s18 + $0x28] sm:$0xff] }
0x1d5e   :  { %2924 = vmatpush.msra.mxu0 %v2867_v31 }
0x1d5f   :  { %v2702_v45 = vmul.f32 %v3518_v13, %v2701_v3  ;;  %3200 = vmatmul.msk.f32.vlgmr.msra.gmra.mxu3 %vm524_vm8, %v2698_v54 }
0x1d60   :  { %2925 = vmatpush.msra.mxu0 %v2866_v46 }
0x1d61   :  { %v2703_v7 = vadd.f32 %v3518_v13, %v2702_v45 }
0x1d63   :  { %v2707_v11 = vsel %vm2706_vm14, %v3518_v13, %v2703_v7 }
0x1d64   :  { %v2712_v37 = vsel %vm2709_vm4, %v2711_v21, %v2707_v11  ;;  %v3432_v21 = vld [vmem:[%s4453_s27 + $0x1] ss:$0 sm:$0xff] }
0x1d65   :  { %v2713_v4 = vmul.f32 %v3514_v26, %v2712_v37 }
0x1d67   :  { %3201 = vmatmul.msk.f32.gmra.mxu3 %vm524_vm8, %v2713_v4 }
0x1de2   :  { %v2769_v53 = vpop.f32.mrf.mxu3 }
0x1de3   :  { %v2775_v41 = vsel %vm322_vm1, -1e+09, %v2769_v53 }
0x1de4   :  { %3202 = vmatmul.msk.f32.vlgmr.msrb.gmra.mxu2 %vm353_vm3, %v2775_v41 }
0x1dea   :  { %v2772_v42 = vpop.f32.mrf.mxu3 }
0x1deb   :  { %v2776_v49 = vsel %vm323_vm2, -1e+09, %v2772_v42 }
0x1dec   :  { %3203 = vmatmul.msk.f32.gmra.mxu2 %vm353_vm3, %v2776_v49  ;;  %v3433_v49 = vld [vmem:[%s4491_s4 + $0x1] ss:$0 sm:$0xff] }
0x1e67   :  { %v2801_v8 = vpop.f32.mrf.mxu2 }
0x1e68   :  { %v2802_v55 = vadd.f32 %v3429_v9, %v2801_v8 }
0x1e6a   :  { %v2807_v19 = vadd.f32 %v2802_v55, %v4608_v52 }
0x1e6c   :  { %v2811_v40 = vsel %vm353_vm3, %v2807_v19, 0.0 }
0x1e6d   :  { %2812 = vadd.xlane.f32.xlu1 %v2811_v40 }
0x1e6f   :  { %v2804_v38 = vpop.f32.mrf.mxu2 }
0x1e70   :  { %v2805_v50 = vadd.f32 %v3429_v9, %v2804_v38 }
0x1e72   :  { %v2808_v24 = vadd.f32 %v2805_v50, %v4612_v5 }
0x1e74   :  { %v2814_v56 = vsel %vm353_vm3, %v2808_v24, 0.0 }
0x1e75   :  { %2815 = vadd.xlane.f32.xlu0 %v2814_v56 }
0x1ee0   :  { %v2813_v28 = vpop.xlane.xlu1 %2812 }
0x1ee1   :  { %v2817_v0 = vmul.f32 %v2813_v28, %v3947_v18 }
0x1ee3   :  { %v2819_v51 = vsub.f32 %v2807_v19, %v2817_v0 }
0x1ee5   :  { %v2821_v2 = vmul.f32 %v2819_v51, %v2819_v51 }
0x1ee7   :  { %v2823_v52 = vsel %vm353_vm3, %v2821_v2, 0.0 }
0x1ee8   :  { %2824 = vadd.xlane.f32.xlu2 %v2823_v52  ;;  %v2816_v57 = vpop.xlane.xlu0 %2815 }
0x1ee9   :  { %v2818_v39 = vmul.f32 %v2816_v57, %v3947_v18 }
0x1eeb   :  { %v2820_v23 = vsub.f32 %v2808_v24, %v2818_v39 }
0x1eed   :  { %v2822_v5 = vmul.f32 %v2820_v23, %v2820_v23 }
0x1eef   :  { %v2826_v27 = vsel %vm353_vm3, %v2822_v5, 0.0 }
0x1ef0   :  { %2827 = vadd.xlane.f32.xlu0 %v2826_v27  ;;  %v2990_v27 = vld [vmem:[%s3065_s3 + $0x18] sm:$0xff] }
0x1ef1   :  { %3013 = vmatpush.msra.mxu1 %v2990_v27 }
0x1ef3   :  { %3014 = vmatpush.msra.mxu1 %v2989_v14 }
0x1ef5   :  { %3015 = vmatpush.msra.mxu1 %v2988_v59 }
0x1ef7   :  { %3016 = vmatpush.msra.mxu1 %v2987_v60 }
0x1f5b   :  { %v2825_v6 = vpop.xlane.xlu2 %2824 }
0x1f5c   :  { %v2829_v10 = vmul.f32 %v2825_v6, %v3947_v18 }
0x1f5e   :  { %v2831_v58 = vadd.f32 1e-05, %v2829_v10 }
0x1f60   :  { %3519 = vrsqrt.f32 %v2831_v58  ;;  %vm2839_vm1 = vweird.f32 %v2831_v58 }
0x1f63   :  { %v2828_v61 = vpop.xlane.xlu0 %2827 }
0x1f64   :  { %v2830_v26 = vmul.f32 %v2828_v61, %v3947_v18 }
0x1f66   :  { %v3520_v12 = vpop.eup %3519  ;;  %v2832_v16 = vadd.f32 1e-05, %v2830_v26 }
0x1f67   :  { %v2834_v20 = vmul.f32 %v3520_v12, %v2831_v58  ;;  %vm2840_vm8 = vweird.f32 %v3520_v12 }
0x1f68   :  { %3521 = vrsqrt.f32 %v2832_v16  ;;  %vm2841_vm2 = vmor %vm2839_vm1, %vm2840_vm8  ;;  %vm2849_vm13 = vweird.f32 %v2832_v16 }
0x1f69   :  { %v2835_v35 = vmul.f32 %v3520_v12, %v2834_v20 }
0x1f6b   :  { %v2836_v17 = vmul.f32 0.5, %v2835_v35 }
0x1f6d   :  { %v2837_v32 = vsub.f32 1.5, %v2836_v17  ;;  %v3434_v17 = vld [vmem:[%s4298_s13 + $0x5] ss:$0 sm:$0xff]  ;;  %s3593_s13 = smov 38  }
0x1f6e   :  { %v3522_v29 = vpop.eup %3521  ;;  %s3067_s8 = sld [smem:[%s4734_s0 + %s3593_s13]]  }
0x1f6f   :  { %v2838_v33 = vmul.f32 %v3520_v12, %v2837_v32  ;;  %v2844_v25 = vmul.f32 %v3522_v29, %v2832_v16  ;;  %vm2850_vm12 = vweird.f32 %v3522_v29 }
0x1f70   :  { %vm2851_vm15 = vmor %vm2849_vm13, %vm2850_vm12 }
0x1f71   :  { %v2842_v34 = vsel %vm2841_vm2, %v3520_v12, %v2838_v33  ;;  %v2845_v43 = vmul.f32 %v3522_v29, %v2844_v25  ;;  %v3435_v25 = vld [vmem:[%s4312_s24 + $0x5] ss:$0 sm:$0xff] }
0x1f72   :  { %v2853_v13 = vmul.f32 %v2842_v34, %v2819_v51 }
0x1f73   :  { %v2846_v30 = vmul.f32 0.5, %v2845_v43 }
0x1f74   :  { %v2856_v44 = vmul.f32 %v3430_v62, %v2853_v13 }
0x1f75   :  { %v2847_v1 = vsub.f32 1.5, %v2846_v30 }
0x1f76   :  { %v2859_v3 = vadd.f32 %v3431_v22, %v2856_v44 }
0x1f77   :  { %v2848_v54 = vmul.f32 %v3522_v29, %v2847_v1 }
0x1f78   :  { %3204 = vmatmul.msk.f32.vlgmr.msrb.gmra.mxu3 %vm353_vm3, %v2859_v3 }
0x1f79   :  { %v2852_v36 = vsel %vm2851_vm15, %v3522_v29, %v2848_v54 }
0x1f7a   :  { %v2854_v45 = vmul.f32 %v2852_v36, %v2820_v23 }
0x1f7c   :  { %v2857_v15 = vmul.f32 %v3430_v62, %v2854_v45 }
0x1f7e   :  { %v2860_v7 = vadd.f32 %v3431_v22, %v2857_v15 }
0x1f80   :  { %3205 = vmatmul.msk.f32.gmra.mxu3 %vm353_vm3, %v2860_v7 }
0x1ffb   :  { %v2895_v11 = vpop.f32.mrf.mxu3 }
0x1ffc   :  { %v2896_v37 = vadd.f32 %v3432_v21, %v2895_v11 }
0x1ffe   :  { %v2901_v4 = vmax.f32 %v2896_v37, 0.0 }
0x2000   :  { %3206 = vmatmul.msk.f32.vlgmr.msra.gmra.mxu0 %vm353_vm3, %v2901_v4 }
0x2003   :  { %v2898_v53 = vpop.f32.mrf.mxu3 }
0x2004   :  { %v2899_v41 = vadd.f32 %v3432_v21, %v2898_v53 }
0x2006   :  { %v2902_v42 = vmax.f32 %v2899_v41, 0.0 }
0x2008   :  { %3207 = vmatmul.msk.f32.gmra.mxu0 %vm353_vm3, %v2902_v42 }
0x207d   :  { %v2927_v9 = vpop.f32.mrf.mxu0 }
0x207e   :  { %v2928_v8 = vadd.f32 %v3433_v49, %v2927_v9 }
0x2080   :  { %v2933_v55 = vadd.f32 %v2928_v8, %v2859_v3  ;;  %v3436_v3 = vld [vmem:[%s4719_s23] ss:$0 sm:$0xff] }
0x2082   :  { %v2937_v19 = vsel %vm353_vm3, %v2933_v55, 0.0 }
0x2083   :  { %2938 = vadd.xlane.f32.xlu2 %v2937_v19 }
0x2085   :  { %v2930_v40 = vpop.f32.mrf.mxu0 }
0x2086   :  { %v2931_v38 = vadd.f32 %v3433_v49, %v2930_v40 }
0x2088   :  { %v2934_v50 = vadd.f32 %v2931_v38, %v2860_v7 }
0x208a   :  { %v2940_v24 = vsel %vm353_vm3, %v2934_v50, 0.0 }
0x208b   :  { %2941 = vadd.xlane.f32.xlu0 %v2940_v24 }
0x20f6   :  { %v2939_v56 = vpop.xlane.xlu2 %2938 }
0x20f7   :  { %v2943_v28 = vmul.f32 %v2939_v56, %v3947_v18 }
0x20f9   :  { %v2945_v0 = vsub.f32 %v2933_v55, %v2943_v28 }
0x20fb   :  { %v2947_v51 = vmul.f32 %v2945_v0, %v2945_v0 }
0x20fd   :  { %v2949_v2 = vsel %vm353_vm3, %v2947_v51, 0.0 }
0x20fe   :  { %2950 = vadd.xlane.f32.xlu2 %v2949_v2  ;;  %v2942_v52 = vpop.xlane.xlu0 %2941 }
0x20ff   :  { %v2944_v57 = vmul.f32 %v2942_v52, %v3947_v18 }
0x2101   :  { %v2946_v39 = vsub.f32 %v2934_v50, %v2944_v57 }
0x2103   :  { %v2948_v23 = vmul.f32 %v2946_v39, %v2946_v39 }
0x2105   :  { %v2952_v5 = vsel %vm353_vm3, %v2948_v23, 0.0 }
0x2106   :  { %2953 = vadd.xlane.f32.xlu0 %v2952_v5 }
0x2171   :  { %v2951_v48 = vpop.xlane.xlu2 %2950 }
0x2172   :  { %v2955_v6 = vmul.f32 %v2951_v48, %v3947_v18 }
0x2174   :  { %v2957_v10 = vadd.f32 1e-05, %v2955_v6 }
0x2176   :  { %3523 = vrsqrt.f32 %v2957_v10  ;;  %vm2965_vm5 = vweird.f32 %v2957_v10 }
0x2179   :  { %v2954_v58 = vpop.xlane.xlu0 %2953 }
0x217a   :  { %v2956_v47 = vmul.f32 %v2954_v58, %v3947_v18 }
0x217c   :  { %v3524_v63 = vpop.eup %3523  ;;  %v2958_v31 = vadd.f32 1e-05, %v2956_v47 }
0x217d   :  { %v2960_v61 = vmul.f32 %v3524_v63, %v2957_v10  ;;  %vm2966_vm0 = vweird.f32 %v3524_v63 }
0x217e   :  { %3525 = vrsqrt.f32 %v2958_v31  ;;  %vm2967_vm6 = vmor %vm2965_vm5, %vm2966_vm0  ;;  %vm2975_vm9 = vweird.f32 %v2958_v31 }
0x217f   :  { %v2961_v26 = vmul.f32 %v3524_v63, %v2960_v61 }
0x2181   :  { %v2962_v46 = vmul.f32 0.5, %v2961_v26 }
0x2183   :  { %v2963_v12 = vsub.f32 1.5, %v2962_v46 }
0x2184   :  { %v3526_v16 = vpop.eup %3525 }
0x2185   :  { %v2964_v20 = vmul.f32 %v3524_v63, %v2963_v12  ;;  %v2970_v35 = vmul.f32 %v3526_v16, %v2958_v31  ;;  %vm2976_vm7 = vweird.f32 %v3526_v16 }
0x2186   :  { %vm2977_vm10 = vmor %vm2975_vm9, %vm2976_vm7 }
0x2187   :  { %v2968_v32 = vsel %vm2967_vm6, %v3524_v63, %v2964_v20  ;;  %v2971_v29 = vmul.f32 %v3526_v16, %v2970_v35 }
0x2188   :  { %v2979_v33 = vmul.f32 %v2968_v32, %v2945_v0 }
0x2189   :  { %v2972_v18 = vmul.f32 0.5, %v2971_v29 }
0x218a   :  { %v2982_v62 = vmul.f32 %v3434_v17, %v2979_v33 }
0x218b   :  { %v2973_v34 = vsub.f32 1.5, %v2972_v18 }
0x218c   :  { %v2985_v43 = vadd.f32 %v3435_v25, %v2982_v62 }
0x218d   :  { %v2974_v13 = vmul.f32 %v3526_v16, %v2973_v34 }
0x218e   :  { %3208 = vmatmul.msk.f32.vlgmr.msra.gmra.mxu1 %vm353_vm3, %v2985_v43 }
0x218f   :  { %v2978_v22 = vsel %vm2977_vm10, %v3526_v16, %v2974_v13 }
0x2190   :  { %v2980_v30 = vmul.f32 %v2978_v22, %v2946_v39 }
0x2192   :  { %v2983_v44 = vmul.f32 %v3434_v17, %v2980_v30 }
0x2194   :  { %v2986_v1 = vadd.f32 %v3435_v25, %v2983_v44 }
0x2196   :  { %3209 = vmatmul.msk.f32.gmra.mxu1 %vm353_vm3, %v2986_v1 }
0x220b   :  { %v3018_v54 = vpop.f32.mrf.mxu1 }
0x220c   :  { %v3019_v36 = vadd.f32 %v3436_v3, %v3018_v54 }
0x220e   :  { %3024 = vst [vmem:[%s3067_s8] sm:$0xff] %v3019_v36 }
0x2213   :  { %v3021_v45 = vpop.f32.mrf.mxu1 }
0x2214   :  { %v3022_v15 = vadd.f32 %v3436_v3, %v3021_v45 }
0x2216   :  { %3025 = vst [vmem:[%s3067_s8 + $0x8] sm:$0xff] %v3022_v15 }

</bundles_post_ra>
